<compile_context>
chip_gen: v6e
topology: v6e:2x2x1
jax: 0.10.0
libtpu: 0.0.40
codegen_flags: <defaults>
</compile_context>

<pallas_src>
import math
import functools

import jax
import jax.numpy as jnp
from jax.experimental import pallas as pl
from jax.experimental.pallas import tpu as pltpu

KERNEL_SIZES = (4, 8, 12)        # series_decomp_multi kernel sizes
FOURIER_K = 3                    # FourierLayer(k=3)
N_EXPERT_ARGS = 12               # per-expert inputs to the fused expert kernel


# --------------------------------------------------------------------------- #
# Kernel 1: fused seasonality/trend decomposition + gating logits
#   new_x = x3 + seasonality(x3) + trend(x3)   (kept in VMEM only)
#   logits = w_gate(start_linear(new_x).squeeze(-1))
# --------------------------------------------------------------------------- #
def _decomp_gate_kernel(x3_ref, amp_ref, ph_ref, fr_ref,
                        xp0_ref, xp1_ref, xp2_ref,
                        a0_ref, a1_ref, a2_ref,
                        sel_ref, wg_ref, bg_ref,
                        wl_ref, bl_ref, bs_ref,
                        logits_ref):
    x3 = x3_ref[...]                                            # [R, L]
    _, L = x3.shape
    two_pi = jnp.float32(2.0 * math.pi)

    # ---- seasonality: all 2k Fourier terms as one batched cos, reduce terms ----
    t = jax.lax.broadcasted_iota(jnp.int32, (1, 1, L), 2).astype(jnp.float32)
    arg = two_pi * fr_ref[...][:, :, None] * t + ph_ref[...][:, :, None]   # [R,2k,L]
    season = jnp.sum(amp_ref[...][:, :, None] * jnp.cos(arg), axis=1)      # [R, L]

    # ---- trend: moving averages via tiny matmuls (1/ks folded into A_m) ----
    mov0 = jnp.dot(xp0_ref[...], a0_ref[...], preferred_element_type=jnp.float32)
    mov1 = jnp.dot(xp1_ref[...], a1_ref[...], preferred_element_type=jnp.float32)
    mov2 = jnp.dot(xp2_ref[...], a2_ref[...], preferred_element_type=jnp.float32)

    # softmax over Linear(1, 3)(x3), combine moving means
    lg0 = x3 * wl_ref[0] + bl_ref[0]
    lg1 = x3 * wl_ref[1] + bl_ref[1]
    lg2 = x3 * wl_ref[2] + bl_ref[2]
    mx = jnp.maximum(jnp.maximum(lg0, lg1), lg2)
    e0 = jnp.exp(lg0 - mx)
    e1 = jnp.exp(lg1 - mx)
    e2 = jnp.exp(lg2 - mx)
    inv = pl.reciprocal(e0 + e1 + e2, approx=True)
    trend = (e0 * mov0 + e1 * mov1 + e2 * mov2) * inv

    new_x = x3 + season + trend                                 # [R, L]

    # ---- gating: start_linear (node reduction via selection matmul) + w_gate ----
    x_red = jnp.dot(sel_ref[...], new_x,
                    preferred_element_type=jnp.float32) + bs_ref[0]        # [B, L]
    logits_ref[...] = (jnp.dot(x_red, wg_ref[...],
                               preferred_element_type=jnp.float32) + bg_ref[...])


def decompose_and_gate(x3r, amp, phase, freq, xps, avgs, sel,
                       w_gate_t, b_gate, decomp_w, decomp_b, b_start):
    R, L = x3r.shape
    B = sel.shape[0]
    E = w_gate_t.shape[1]
    vspec = pl.BlockSpec(memory_space=pltpu.MemorySpace.VMEM)
    sspec = pl.BlockSpec(memory_space=pltpu.MemorySpace.SMEM)

    flops = int(2 * R * L * sum(L + ks - 1 for ks in KERNEL_SIZES)
                + 2 * B * R * L + 2 * B * L * E + 24 * R * L)
    trans = int(R * 2 * FOURIER_K * L + 4 * R * L)
    nbytes = int(4 * (x3r.size + 3 * amp.size + sum(v.size for v in xps)
                      + sum(a.size for a in avgs) + sel.size
                      + w_gate_t.size + b_gate.size + 8 + B * E))

    return pl.pallas_call(
        _decomp_gate_kernel,
        out_shape=jax.ShapeDtypeStruct((B, E), jnp.float32),
        in_specs=[vspec] * 13 + [sspec] * 3,
        out_specs=vspec,
        cost_estimate=pl.CostEstimate(flops=flops, transcendentals=trans,
                                      bytes_accessed=nbytes),
    )(x3r, amp, phase, freq, xps[0], xps[1], xps[2],
      avgs[0], avgs[1], avgs[2], sel, w_gate_t, b_gate,
      decomp_w, decomp_b, b_start)


# --------------------------------------------------------------------------- #
# Kernel 2: all experts fused (simplified Transformer_Layer per expert)
#   tokens [R*P, T] -> in-proj -> block-diag self-attention -> FFN -> out-proj
#   -> gate-weighted output (one pallas_call, no grid, weights VMEM-resident)
# --------------------------------------------------------------------------- #
def _experts_kernel(num_experts, d_model, *refs):
    in_refs = refs[:num_experts * N_EXPERT_ARGS]
    out_refs = refs[num_experts * N_EXPERT_ARGS:]
    scale = jnp.float32(1.0 / math.sqrt(d_model))
    bf16 = jnp.bfloat16

    for e in range(num_experts):
        (tok_ref, win_ref, bin_ref, wqkv_ref, w1_ref, b1_ref, w2_ref, b2_ref,
         wout_ref, bout_ref, mb_ref, gs_ref) = \
            in_refs[e * N_EXPERT_ARGS:(e + 1) * N_EXPERT_ARGS]

        tok = tok_ref[...].astype(bf16)                               # [RP, T]
        h = jnp.dot(tok, win_ref[...],
                    preferred_element_type=jnp.float32) + bin_ref[...]  # [RP, dm]

        qkv = jnp.dot(h.astype(bf16), wqkv_ref[...],
                      preferred_element_type=jnp.float32)             # [RP, 3*dm]
        q = qkv[:, :d_model]
        k = qkv[:, d_model:2 * d_model]
        v = qkv[:, 2 * d_model:]

        s = jax.lax.dot_general(q.astype(bf16), k.astype(bf16),
                                (((1,), (1,)), ((), ())),
                                preferred_element_type=jnp.float32)
        s = s * scale + mb_ref[...]                                   # block-diag mask
        s = s - jnp.max(s, axis=-1, keepdims=True)
        p = jnp.exp(s)
        p = p * pl.reciprocal(jnp.sum(p, axis=-1, keepdims=True), approx=True)
        z = jnp.dot(p.astype(bf16), v.astype(bf16),
                    preferred_element_type=jnp.float32)               # [RP, dm]

        f = jnp.maximum(jnp.dot(z.astype(bf16), w1_ref[...],
                                preferred_element_type=jnp.float32) + b1_ref[...], 0.0)
        y = jnp.dot(f.astype(bf16), w2_ref[...],
                    preferred_element_type=jnp.float32) + b2_ref[...]

        o = jnp.dot((z + y).astype(bf16), wout_ref[...],
                    preferred_element_type=jnp.float32) + bout_ref[...]  # [RP, T]
        out_refs[e][...] = o * gs_ref[...]                            # gate-weighted


def run_all_experts(x, gates, expert_params, patch_sizes, d_model):
    B, L, N, D = x.shape
    R = B * N
    E = len(patch_sizes)
    bf16 = jnp.bfloat16

    args = []
    out_shapes = []
    flops = trans = nbytes = 0
    for e, p in enumerate(patch_sizes):
        P = L // p
        T = p * D
        RP = R * P
        w = expert_params[e]
        dff = w['w1'].shape[1]

        tok = to_tokens_2d(x, p)                                       # [RP, T]
        w_qkv = jnp.concatenate([w['wq'], w['wk'], w['wv']], axis=1)   # fused QKV
        ids = jnp.arange(RP) // P
        mask = jnp.where(ids[:, None] == ids[None, :], 0.0, -1e9).astype(jnp.float32)
        gs = jnp.repeat(gates[:, e], N * P)[:, None].astype(jnp.float32)  # [RP, 1]

        args += [tok,
                 w['win'].astype(bf16), w['bin'],
                 w_qkv.astype(bf16),
                 w['w1'].astype(bf16), w['b1'],
                 w['w2'].astype(bf16), w['b2'],
                 w['wout'].astype(bf16), w['bout'],
                 mask, gs]
        out_shapes.append(jax.ShapeDtypeStruct((RP, T), jnp.float32))

        flops += (4 * RP * T * d_model + 2 * RP * d_model * 3 * d_model
                  + 4 * RP * RP * d_model + 4 * RP * d_model * dff)
        trans += RP * RP + RP
        nbytes += 4 * (2 * RP * T + RP * RP + RP) + \
                  2 * (T * d_model + 3 * d_model * d_model + 2 * d_model * dff + d_model * T)

    vspec = pl.BlockSpec(memory_space=pltpu.MemorySpace.VMEM)
    outs = pl.pallas_call(
        functools.partial(_experts_kernel, E, d_model),
        out_shape=tuple(out_shapes),
        in_specs=[vspec] * len(args),
        out_specs=tuple([vspec] * E),
        cost_estimate=pl.CostEstimate(flops=int(flops), transcendentals=int(trans),
                                      bytes_accessed=int(nbytes)),
    )(*args)
    return list(outs)


# --------------------------------------------------------------------------- #
# Plain-JAX glue
# --------------------------------------------------------------------------- #
def cv_squared(v):
    eps = 1e-10
    v = v.astype(jnp.float32)
    if v.shape[0] == 1:
        return jnp.zeros((), jnp.float32)
    return jnp.var(v, ddof=1) / (jnp.mean(v) ** 2 + eps)


def fourier_terms_rows(x3r, k):
    """rFFT + top-k frequency selection per row (FourierLayer, pred_len=0, low_freq=1)."""
    R, L = x3r.shape
    Xf = jnp.fft.rfft(x3r, axis=-1)
    if L % 2 == 0:
        xf = Xf[:, 1:-1]
        freqs = jnp.fft.rfftfreq(L)[1:-1].astype(jnp.float32)
    else:
        xf = Xf[:, 1:]
        freqs = jnp.fft.rfftfreq(L)[1:].astype(jnp.float32)
    mag = jnp.abs(xf)                                   # [R, F]
    _, idx = jax.lax.top_k(mag, k)                      # [R, k]
    xf_top = jnp.take_along_axis(xf, idx, axis=-1)
    f_top = freqs[idx]
    amp = jnp.abs(xf_top) / L
    phase = jnp.angle(xf_top)
    amp_full = jnp.concatenate([amp, amp], axis=-1).astype(jnp.float32)
    phase_full = jnp.concatenate([phase, -phase], axis=-1).astype(jnp.float32)
    f_full = jnp.concatenate([f_top, -f_top], axis=-1).astype(jnp.float32)
    return amp_full, phase_full, f_full


def replicate_padded_rows(x3r, ks):
    front = (ks - 1) // 2
    end = ks - 1 - front
    return jnp.concatenate(
        [jnp.repeat(x3r[:, :1], front, axis=1), x3r,
         jnp.repeat(x3r[:, -1:], end, axis=1)], axis=1)


def avg_matrix(L, ks):
    """A[i, l] = 1/ks for l <= i < l+ks, so moving_avg = x_padded @ A."""
    ii = jnp.arange(L + ks - 1)[:, None]
    ll = jnp.arange(L)[None, :]
    return ((ii >= ll) & (ii < ll + ks)).astype(jnp.float32) / jnp.float32(ks)


def to_tokens_2d(x, p):
    B, L, N, D = x.shape
    P = L // p
    xt = jnp.transpose(x, (0, 2, 1, 3))                 # [B, N, L, D]
    return xt.reshape(B * N * P, p * D)                 # [R*P, p*D]


def from_tokens_2d(tok, B, N, L, D):
    x = tok.reshape(B, N, L, D)
    return jnp.transpose(x, (0, 2, 1, 3))               # [B, L, N, D]


def ams_forward(x, params, patch_sizes, k_top=4, loss_coef=0.01):
    """Deterministic (eval-mode) AMS forward. Returns (output, balance_loss)."""
    B, L, N, D = x.shape
    E = len(patch_sizes)
    R = B * N
    d_model = params['experts'][0]['wq'].shape[0]

    # --- seasonality_and_trend_decompose + noisy_top_k_gating logits (fused) ---
    x3 = x[..., 0]                                      # [B, L, N]
    x3r = jnp.transpose(x3, (0, 2, 1)).reshape(R, L)    # row = (b, n)
    amp, phase, freq = fourier_terms_rows(x3r, FOURIER_K)
    xps = [replicate_padded_rows(x3r, ks) for ks in KERNEL_SIZES]
    avgs = [avg_matrix(L, ks) for ks in KERNEL_SIZES]
    sel = jnp.kron(jnp.eye(B, dtype=jnp.float32),
                   params['w_start'].reshape(1, N))     # [B, R]

    logits = decompose_and_gate(x3r, amp, phase, freq, xps, avgs, sel,
                                params['w_gate'], params['b_gate'],
                                params['decomp_w'], params['decomp_b'],
                                params['b_start'])

    # --- top-k gating (eval path: clean logits) ---
    top_logits, top_idx = jax.lax.top_k(logits, min(k_top + 1, E))
    top_k_logits = top_logits[:, :k_top]
    top_k_idx = top_idx[:, :k_top]
    top_k_gates = jax.nn.softmax(top_k_logits, axis=1)
    gates = jnp.zeros_like(logits).at[jnp.arange(B)[:, None], top_k_idx].set(top_k_gates)

    importance = gates.sum(0)
    load = (gates > 0).sum(0)
    balance_loss = (cv_squared(importance) + cv_squared(load)) * loss_coef

    # --- all experts in one kernel (gate-weighted in-kernel), residual in glue ---
    expert_outs = run_all_experts(x, gates, params['experts'], patch_sizes, d_model)
    output = x
    for e in range(E):
        output = output + from_tokens_2d(expert_outs[e], B, N, L, D)
    return output, balance_loss


def init_params(key, L, N, D, E, d_model, d_ff, patch_sizes):
    keys = jax.random.split(key, 8 + 12 * E)
    it = iter(keys)

    def nrm(shape, s=0.1):
        return jax.random.normal(next(it), shape, jnp.float32) * s

    params = {
        'decomp_w': nrm((3,)),            # series_decomp_multi Linear(1, 3) weight
        'decomp_b': nrm((3,)),            # ... bias
        'w_start': nrm((1, N)),           # start_linear (nn.Linear(N, 1))
        'b_start': nrm((1,)),
        'w_gate': nrm((L, E)),            # w_gate (nn.Linear(L, E)), stored transposed
        'b_gate': nrm((1, E)),
        'experts': [],
    }
    # TODO(synk): w_noise / softplus noise path unused in eval mode, not materialized.
    for p in patch_sizes:
        T = p * D
        params['experts'].append({
            'win': nrm((T, d_model)), 'bin': nrm((1, d_model)),
            'wq': nrm((d_model, d_model)), 'wk': nrm((d_model, d_model)),
            'wv': nrm((d_model, d_model)),
            'w1': nrm((d_model, d_ff)), 'b1': nrm((1, d_ff)),
            'w2': nrm((d_ff, d_model)), 'b2': nrm((1, d_model)),
            'wout': nrm((d_model, T)), 'bout': nrm((1, T)),
        })
    return params


if __name__ == "__main__":
    B, L, N, D = 2, 24, 4, 32          # batch, input_size(seq), num_nodes, d_model
    patch_sizes = (8, 6, 4, 2)         # => num_experts = 4, k = 4
    d_model, d_ff = 32, 64

    key = jax.random.PRNGKey(0)
    k_x, k_p = jax.random.split(key)
    x = jax.random.normal(k_x, (B, L, N, D), jnp.float32)
    params = init_params(k_p, L, N, D, len(patch_sizes), d_model, d_ff, patch_sizes)

    fwd = jax.jit(lambda xx, pp: ams_forward(xx, pp, patch_sizes, k_top=4, loss_coef=0.01))
    output, balance_loss = fwd(x, params)
    jax.block_until_ready((output, balance_loss))
    assert output.shape == (B, L, N, D)
    assert balance_loss.shape == ()
    print("KERNEL_OK")
</pallas_src>

<mosaic_0001>
module attributes {stable_mosaic.version = 11 : i64} {
  func.func @_decomp_gate_kernel(%arg0: memref<8x24xf32, #tpu.memory_space<vmem>>, %arg1: memref<8x6xf32, #tpu.memory_space<vmem>>, %arg2: memref<8x6xf32, #tpu.memory_space<vmem>>, %arg3: memref<8x6xf32, #tpu.memory_space<vmem>>, %arg4: memref<8x27xf32, #tpu.memory_space<vmem>>, %arg5: memref<8x31xf32, #tpu.memory_space<vmem>>, %arg6: memref<8x35xf32, #tpu.memory_space<vmem>>, %arg7: memref<27x24xf32, #tpu.memory_space<vmem>>, %arg8: memref<31x24xf32, #tpu.memory_space<vmem>>, %arg9: memref<35x24xf32, #tpu.memory_space<vmem>>, %arg10: memref<2x8xf32, #tpu.memory_space<vmem>>, %arg11: memref<24x4xf32, #tpu.memory_space<vmem>>, %arg12: memref<1x4xf32, #tpu.memory_space<vmem>>, %arg13: memref<3xf32, #tpu.memory_space<smem>>, %arg14: memref<3xf32, #tpu.memory_space<smem>>, %arg15: memref<1xf32, #tpu.memory_space<smem>>, %arg16: memref<2x4xf32, #tpu.memory_space<vmem>>) attributes {dimension_semantics = [], scalar_prefetch = 0 : i64, scratch_operands = 0 : i64, tpu.core_type = #tpu.core_type<tc>} {
    %c0 = arith.constant 0 : index
    %c0_0 = arith.constant 0 : index
    %0 = vector.load %arg0[%c0, %c0_0] : memref<8x24xf32, #tpu.memory_space<vmem>>, vector<8x24xf32>
    %1 = tpu.iota {dimensions = array<i32: 2>} : vector<1x1x24xi32>
    %2 = arith.sitofp %1 : vector<1x1x24xi32> to vector<1x1x24xf32>
    %c0_1 = arith.constant 0 : index
    %c0_2 = arith.constant 0 : index
    %3 = vector.load %arg3[%c0_1, %c0_2] : memref<8x6xf32, #tpu.memory_space<vmem>>, vector<8x6xf32>
    %4 = vector.shape_cast %3 : vector<8x6xf32> to vector<8x6x1xf32>
    %cst = arith.constant 6.28318548 : f32
    %5 = vector.broadcast %cst : f32 to vector<8x6x1xf32>
    %6 = arith.mulf %5, %4 : vector<8x6x1xf32>
    %7 = vector.broadcast %6 : vector<8x6x1xf32> to vector<8x6x24xf32>
    %8 = vector.broadcast %2 : vector<1x1x24xf32> to vector<8x6x24xf32>
    %9 = arith.mulf %7, %8 : vector<8x6x24xf32>
    %c0_3 = arith.constant 0 : index
    %c0_4 = arith.constant 0 : index
    %10 = vector.load %arg2[%c0_3, %c0_4] : memref<8x6xf32, #tpu.memory_space<vmem>>, vector<8x6xf32>
    %11 = vector.shape_cast %10 : vector<8x6xf32> to vector<8x6x1xf32>
    %12 = vector.broadcast %11 : vector<8x6x1xf32> to vector<8x6x24xf32>
    %13 = arith.addf %9, %12 : vector<8x6x24xf32>
    %c0_5 = arith.constant 0 : index
    %c0_6 = arith.constant 0 : index
    %14 = vector.load %arg1[%c0_5, %c0_6] : memref<8x6xf32, #tpu.memory_space<vmem>>, vector<8x6xf32>
    %15 = vector.shape_cast %14 : vector<8x6xf32> to vector<8x6x1xf32>
    %16 = math.cos %13 : vector<8x6x24xf32>
    %17 = vector.broadcast %15 : vector<8x6x1xf32> to vector<8x6x24xf32>
    %18 = arith.mulf %17, %16 : vector<8x6x24xf32>
    %cst_7 = arith.constant dense<0.000000e+00> : vector<8x24xf32>
    %19 = vector.multi_reduction <add>, %18, %cst_7 [1] : vector<8x6x24xf32> to vector<8x24xf32>
    %c0_8 = arith.constant 0 : index
    %c0_9 = arith.constant 0 : index
    %20 = vector.load %arg4[%c0_8, %c0_9] : memref<8x27xf32, #tpu.memory_space<vmem>>, vector<8x27xf32>
    %c0_10 = arith.constant 0 : index
    %c0_11 = arith.constant 0 : index
    %21 = vector.load %arg7[%c0_10, %c0_11] : memref<27x24xf32, #tpu.memory_space<vmem>>, vector<27x24xf32>
    %cst_12 = arith.constant dense<0.000000e+00> : vector<8x24xf32>
    %22 = tpu.matmul %20, %21, %cst_12 {dimension_numbers = #tpu.dot_dimension_numbers<[1], [0], [0], [1], [0, 0, 1, 1], [], []>} : vector<8x27xf32>, vector<27x24xf32>, vector<8x24xf32> -> vector<8x24xf32>
    %c0_13 = arith.constant 0 : index
    %c0_14 = arith.constant 0 : index
    %23 = vector.load %arg5[%c0_13, %c0_14] : memref<8x31xf32, #tpu.memory_space<vmem>>, vector<8x31xf32>
    %c0_15 = arith.constant 0 : index
    %c0_16 = arith.constant 0 : index
    %24 = vector.load %arg8[%c0_15, %c0_16] : memref<31x24xf32, #tpu.memory_space<vmem>>, vector<31x24xf32>
    %cst_17 = arith.constant dense<0.000000e+00> : vector<8x24xf32>
    %25 = tpu.matmul %23, %24, %cst_17 {dimension_numbers = #tpu.dot_dimension_numbers<[1], [0], [0], [1], [0, 0, 1, 1], [], []>} : vector<8x31xf32>, vector<31x24xf32>, vector<8x24xf32> -> vector<8x24xf32>
    %c0_18 = arith.constant 0 : index
    %c0_19 = arith.constant 0 : index
    %26 = vector.load %arg6[%c0_18, %c0_19] : memref<8x35xf32, #tpu.memory_space<vmem>>, vector<8x35xf32>
    %c0_20 = arith.constant 0 : index
    %c0_21 = arith.constant 0 : index
    %27 = vector.load %arg9[%c0_20, %c0_21] : memref<35x24xf32, #tpu.memory_space<vmem>>, vector<35x24xf32>
    %cst_22 = arith.constant dense<0.000000e+00> : vector<8x24xf32>
    %28 = tpu.matmul %26, %27, %cst_22 {dimension_numbers = #tpu.dot_dimension_numbers<[1], [0], [0], [1], [0, 0, 1, 1], [], []>} : vector<8x35xf32>, vector<35x24xf32>, vector<8x24xf32> -> vector<8x24xf32>
    %c0_23 = arith.constant 0 : index
    %29 = memref.load %arg13[%c0_23] : memref<3xf32, #tpu.memory_space<smem>>
    %30 = vector.broadcast %29 : f32 to vector<8x24xf32>
    %31 = arith.mulf %0, %30 : vector<8x24xf32>
    %c0_24 = arith.constant 0 : index
    %32 = memref.load %arg14[%c0_24] : memref<3xf32, #tpu.memory_space<smem>>
    %33 = vector.broadcast %32 : f32 to vector<8x24xf32>
    %34 = arith.addf %31, %33 : vector<8x24xf32>
    %c1 = arith.constant 1 : index
    %35 = memref.load %arg13[%c1] : memref<3xf32, #tpu.memory_space<smem>>
    %36 = vector.broadcast %35 : f32 to vector<8x24xf32>
    %37 = arith.mulf %0, %36 : vector<8x24xf32>
    %c1_25 = arith.constant 1 : index
    %38 = memref.load %arg14[%c1_25] : memref<3xf32, #tpu.memory_space<smem>>
    %39 = vector.broadcast %38 : f32 to vector<8x24xf32>
    %40 = arith.addf %37, %39 : vector<8x24xf32>
    %c2 = arith.constant 2 : index
    %41 = memref.load %arg13[%c2] : memref<3xf32, #tpu.memory_space<smem>>
    %42 = vector.broadcast %41 : f32 to vector<8x24xf32>
    %43 = arith.mulf %0, %42 : vector<8x24xf32>
    %c2_26 = arith.constant 2 : index
    %44 = memref.load %arg14[%c2_26] : memref<3xf32, #tpu.memory_space<smem>>
    %45 = vector.broadcast %44 : f32 to vector<8x24xf32>
    %46 = arith.addf %43, %45 : vector<8x24xf32>
    %47 = arith.maximumf %34, %40 : vector<8x24xf32>
    %48 = arith.maximumf %47, %46 : vector<8x24xf32>
    %49 = arith.subf %34, %48 : vector<8x24xf32>
    %50 = math.exp %49 : vector<8x24xf32>
    %51 = arith.subf %40, %48 : vector<8x24xf32>
    %52 = math.exp %51 : vector<8x24xf32>
    %53 = arith.subf %46, %48 : vector<8x24xf32>
    %54 = math.exp %53 : vector<8x24xf32>
    %55 = arith.addf %50, %52 : vector<8x24xf32>
    %56 = arith.addf %55, %54 : vector<8x24xf32>
    %57 = tpu.reciprocal %56 {approx = true} : vector<8x24xf32> -> vector<8x24xf32>
    %58 = arith.mulf %50, %22 : vector<8x24xf32>
    %59 = arith.mulf %52, %25 : vector<8x24xf32>
    %60 = arith.addf %58, %59 : vector<8x24xf32>
    %61 = arith.mulf %54, %28 : vector<8x24xf32>
    %62 = arith.addf %60, %61 : vector<8x24xf32>
    %63 = arith.mulf %62, %57 : vector<8x24xf32>
    %64 = arith.addf %0, %19 : vector<8x24xf32>
    %65 = arith.addf %64, %63 : vector<8x24xf32>
    %c0_27 = arith.constant 0 : index
    %c0_28 = arith.constant 0 : index
    %66 = vector.load %arg10[%c0_27, %c0_28] : memref<2x8xf32, #tpu.memory_space<vmem>>, vector<2x8xf32>
    %cst_29 = arith.constant dense<0.000000e+00> : vector<2x24xf32>
    %67 = tpu.matmul %66, %65, %cst_29 {dimension_numbers = #tpu.dot_dimension_numbers<[1], [0], [0], [1], [0, 0, 1, 1], [], []>} : vector<2x8xf32>, vector<8x24xf32>, vector<2x24xf32> -> vector<2x24xf32>
    %c0_30 = arith.constant 0 : index
    %68 = memref.load %arg15[%c0_30] : memref<1xf32, #tpu.memory_space<smem>>
    %69 = vector.broadcast %68 : f32 to vector<2x24xf32>
    %70 = arith.addf %67, %69 : vector<2x24xf32>
    %c0_31 = arith.constant 0 : index
    %c0_32 = arith.constant 0 : index
    %71 = vector.load %arg11[%c0_31, %c0_32] : memref<24x4xf32, #tpu.memory_space<vmem>>, vector<24x4xf32>
    %cst_33 = arith.constant dense<0.000000e+00> : vector<2x4xf32>
    %72 = tpu.matmul %70, %71, %cst_33 {dimension_numbers = #tpu.dot_dimension_numbers<[1], [0], [0], [1], [0, 0, 1, 1], [], []>} : vector<2x24xf32>, vector<24x4xf32>, vector<2x4xf32> -> vector<2x4xf32>
    %c0_34 = arith.constant 0 : index
    %c0_35 = arith.constant 0 : index
    %73 = vector.load %arg12[%c0_34, %c0_35] : memref<1x4xf32, #tpu.memory_space<vmem>>, vector<1x4xf32>
    %74 = vector.broadcast %73 : vector<1x4xf32> to vector<2x4xf32>
    %75 = arith.addf %72, %74 : vector<2x4xf32>
    %c0_36 = arith.constant 0 : index
    %c0_37 = arith.constant 0 : index
    %76 = vector.load %arg16[%c0_36, %c0_37] : memref<2x4xf32, #tpu.memory_space<vmem>>, vector<2x4xf32>
    tpu.vector_store %arg16[%c0_36, %c0_37], %75 {strides = array<i32>} : memref<2x4xf32, #tpu.memory_space<vmem>>, vector<2x4xf32>,
    return
  }
}

module attributes {stable_mosaic.version = 11 : i64} {
  func.func @_experts_kernel(%arg0: memref<24x256xf32, #tpu.memory_space<vmem>>, %arg1: memref<256x32xbf16, #tpu.memory_space<vmem>>, %arg2: memref<1x32xf32, #tpu.memory_space<vmem>>, %arg3: memref<32x96xbf16, #tpu.memory_space<vmem>>, %arg4: memref<32x64xbf16, #tpu.memory_space<vmem>>, %arg5: memref<1x64xf32, #tpu.memory_space<vmem>>, %arg6: memref<64x32xbf16, #tpu.memory_space<vmem>>, %arg7: memref<1x32xf32, #tpu.memory_space<vmem>>, %arg8: memref<32x256xbf16, #tpu.memory_space<vmem>>, %arg9: memref<1x256xf32, #tpu.memory_space<vmem>>, %arg10: memref<24x24xf32, #tpu.memory_space<vmem>>, %arg11: memref<24x1xf32, #tpu.memory_space<vmem>>, %arg12: memref<32x192xf32, #tpu.memory_space<vmem>>, %arg13: memref<192x32xbf16, #tpu.memory_space<vmem>>, %arg14: memref<1x32xf32, #tpu.memory_space<vmem>>, %arg15: memref<32x96xbf16, #tpu.memory_space<vmem>>, %arg16: memref<32x64xbf16, #tpu.memory_space<vmem>>, %arg17: memref<1x64xf32, #tpu.memory_space<vmem>>, %arg18: memref<64x32xbf16, #tpu.memory_space<vmem>>, %arg19: memref<1x32xf32, #tpu.memory_space<vmem>>, %arg20: memref<32x192xbf16, #tpu.memory_space<vmem>>, %arg21: memref<1x192xf32, #tpu.memory_space<vmem>>, %arg22: memref<32x32xf32, #tpu.memory_space<vmem>>, %arg23: memref<32x1xf32, #tpu.memory_space<vmem>>, %arg24: memref<48x128xf32, #tpu.memory_space<vmem>>, %arg25: memref<128x32xbf16, #tpu.memory_space<vmem>>, %arg26: memref<1x32xf32, #tpu.memory_space<vmem>>, %arg27: memref<32x96xbf16, #tpu.memory_space<vmem>>, %arg28: memref<32x64xbf16, #tpu.memory_space<vmem>>, %arg29: memref<1x64xf32, #tpu.memory_space<vmem>>, %arg30: memref<64x32xbf16, #tpu.memory_space<vmem>>, %arg31: memref<1x32xf32, #tpu.memory_space<vmem>>, %arg32: memref<32x128xbf16, #tpu.memory_space<vmem>>, %arg33: memref<1x128xf32, #tpu.memory_space<vmem>>, %arg34: memref<48x48xf32, #tpu.memory_space<vmem>>, %arg35: memref<48x1xf32, #tpu.memory_space<vmem>>, %arg36: memref<96x64xf32, #tpu.memory_space<vmem>>, %arg37: memref<64x32xbf16, #tpu.memory_space<vmem>>, %arg38: memref<1x32xf32, #tpu.memory_space<vmem>>, %arg39: memref<32x96xbf16, #tpu.memory_space<vmem>>, %arg40: memref<32x64xbf16, #tpu.memory_space<vmem>>, %arg41: memref<1x64xf32, #tpu.memory_space<vmem>>, %arg42: memref<64x32xbf16, #tpu.memory_space<vmem>>, %arg43: memref<1x32xf32, #tpu.memory_space<vmem>>, %arg44: memref<32x64xbf16, #tpu.memory_space<vmem>>, %arg45: memref<1x64xf32, #tpu.memory_space<vmem>>, %arg46: memref<96x96xf32, #tpu.memory_space<vmem>>, %arg47: memref<96x1xf32, #tpu.memory_space<vmem>>, %arg48: memref<24x256xf32, #tpu.memory_space<vmem>>, %arg49: memref<32x192xf32, #tpu.memory_space<vmem>>, %arg50: memref<48x128xf32, #tpu.memory_space<vmem>>, %arg51: memref<96x64xf32, #tpu.memory_space<vmem>>) attributes {dimension_semantics = [], scalar_prefetch = 0 : i64, scratch_operands = 0 : i64, tpu.core_type = #tpu.core_type<tc>} {
    %c0 = arith.constant 0 : index
    %c0_0 = arith.constant 0 : index
    %0 = vector.load %arg0[%c0, %c0_0] : memref<24x256xf32, #tpu.memory_space<vmem>>, vector<24x256xf32>
    %1 = arith.truncf %0 : vector<24x256xf32> to vector<24x256xbf16>
    %c0_1 = arith.constant 0 : index
    %c0_2 = arith.constant 0 : index
    %2 = vector.load %arg1[%c0_1, %c0_2] : memref<256x32xbf16, #tpu.memory_space<vmem>>, vector<256x32xbf16>
    %cst = arith.constant dense<0.000000e+00> : vector<24x32xf32>
    %3 = tpu.matmul %1, %2, %cst {dimension_numbers = #tpu.dot_dimension_numbers<[1], [0], [0], [1], [0, 0, 1, 1], [], []>} : vector<24x256xbf16>, vector<256x32xbf16>, vector<24x32xf32> -> vector<24x32xf32>
    %c0_3 = arith.constant 0 : index
    %c0_4 = arith.constant 0 : index
    %4 = vector.load %arg2[%c0_3, %c0_4] : memref<1x32xf32, #tpu.memory_space<vmem>>, vector<1x32xf32>
    %5 = vector.broadcast %4 : vector<1x32xf32> to vector<24x32xf32>
    %6 = arith.addf %3, %5 : vector<24x32xf32>
    %7 = arith.truncf %6 : vector<24x32xf32> to vector<24x32xbf16>
    %c0_5 = arith.constant 0 : index
    %c0_6 = arith.constant 0 : index
    %8 = vector.load %arg3[%c0_5, %c0_6] : memref<32x96xbf16, #tpu.memory_space<vmem>>, vector<32x96xbf16>
    %cst_7 = arith.constant dense<0.000000e+00> : vector<24x96xf32>
    %9 = tpu.matmul %7, %8, %cst_7 {dimension_numbers = #tpu.dot_dimension_numbers<[1], [0], [0], [1], [0, 0, 1, 1], [], []>} : vector<24x32xbf16>, vector<32x96xbf16>, vector<24x96xf32> -> vector<24x96xf32>
    %10 = vector.extract_strided_slice %9 {offsets = [0, 0], sizes = [24, 32], strides = [1, 1]} : vector<24x96xf32> to vector<24x32xf32>
    %11 = vector.extract_strided_slice %9 {offsets = [0, 32], sizes = [24, 32], strides = [1, 1]} : vector<24x96xf32> to vector<24x32xf32>
    %12 = vector.extract_strided_slice %9 {offsets = [0, 64], sizes = [24, 32], strides = [1, 1]} : vector<24x96xf32> to vector<24x32xf32>
    %13 = arith.truncf %10 : vector<24x32xf32> to vector<24x32xbf16>
    %14 = arith.truncf %11 : vector<24x32xf32> to vector<24x32xbf16>
    %cst_8 = arith.constant dense<0.000000e+00> : vector<24x24xf32>
    %15 = tpu.matmul %13, %14, %cst_8 {dimension_numbers = #tpu.dot_dimension_numbers<[1], [1], [0], [0], [0, 0, 1, 0], [], []>} : vector<24x32xbf16>, vector<24x32xbf16>, vector<24x24xf32> -> vector<24x24xf32>
    %cst_9 = arith.constant 0.176776692 : f32
    %16 = vector.broadcast %cst_9 : f32 to vector<24x24xf32>
    %17 = arith.mulf %15, %16 : vector<24x24xf32>
    %c0_10 = arith.constant 0 : index
    %c0_11 = arith.constant 0 : index
    %18 = vector.load %arg10[%c0_10, %c0_11] : memref<24x24xf32, #tpu.memory_space<vmem>>, vector<24x24xf32>
    %19 = arith.addf %17, %18 : vector<24x24xf32>
    %cst_12 = arith.constant dense<0xFF800000> : vector<24xf32>
    %20 = vector.multi_reduction <maximumf>, %19, %cst_12 [1] : vector<24x24xf32> to vector<24xf32>
    %21 = vector.shape_cast %20 : vector<24xf32> to vector<24x1xf32>
    %22 = vector.broadcast %21 : vector<24x1xf32> to vector<24x24xf32>
    %23 = arith.subf %19, %22 : vector<24x24xf32>
    %24 = math.exp %23 : vector<24x24xf32>
    %cst_13 = arith.constant dense<0.000000e+00> : vector<24xf32>
    %25 = vector.multi_reduction <add>, %24, %cst_13 [1] : vector<24x24xf32> to vector<24xf32>
    %26 = vector.shape_cast %25 : vector<24xf32> to vector<24x1xf32>
    %27 = tpu.reciprocal %26 {approx = true} : vector<24x1xf32> -> vector<24x1xf32>
    %28 = vector.broadcast %27 : vector<24x1xf32> to vector<24x24xf32>
    %29 = arith.mulf %24, %28 : vector<24x24xf32>
    %30 = arith.truncf %29 : vector<24x24xf32> to vector<24x24xbf16>
    %31 = arith.truncf %12 : vector<24x32xf32> to vector<24x32xbf16>
    %cst_14 = arith.constant dense<0.000000e+00> : vector<24x32xf32>
    %32 = tpu.matmul %30, %31, %cst_14 {dimension_numbers = #tpu.dot_dimension_numbers<[1], [0], [0], [1], [0, 0, 1, 1], [], []>} : vector<24x24xbf16>, vector<24x32xbf16>, vector<24x32xf32> -> vector<24x32xf32>
    %33 = arith.truncf %32 : vector<24x32xf32> to vector<24x32xbf16>
    %c0_15 = arith.constant 0 : index
    %c0_16 = arith.constant 0 : index
    %34 = vector.load %arg4[%c0_15, %c0_16] : memref<32x64xbf16, #tpu.memory_space<vmem>>, vector<32x64xbf16>
    %cst_17 = arith.constant dense<0.000000e+00> : vector<24x64xf32>
    %35 = tpu.matmul %33, %34, %cst_17 {dimension_numbers = #tpu.dot_dimension_numbers<[1], [0], [0], [1], [0, 0, 1, 1], [], []>} : vector<24x32xbf16>, vector<32x64xbf16>, vector<24x64xf32> -> vector<24x64xf32>
    %c0_18 = arith.constant 0 : index
    %c0_19 = arith.constant 0 : index
    %36 = vector.load %arg5[%c0_18, %c0_19] : memref<1x64xf32, #tpu.memory_space<vmem>>, vector<1x64xf32>
    %37 = vector.broadcast %36 : vector<1x64xf32> to vector<24x64xf32>
    %38 = arith.addf %35, %37 : vector<24x64xf32>
    %cst_20 = arith.constant 0.000000e+00 : f32
    %39 = vector.broadcast %cst_20 : f32 to vector<24x64xf32>
    %40 = arith.maximumf %38, %39 : vector<24x64xf32>
    %41 = arith.truncf %40 : vector<24x64xf32> to vector<24x64xbf16>
    %c0_21 = arith.constant 0 : index
    %c0_22 = arith.constant 0 : index
    %42 = vector.load %arg6[%c0_21, %c0_22] : memref<64x32xbf16, #tpu.memory_space<vmem>>, vector<64x32xbf16>
    %cst_23 = arith.constant dense<0.000000e+00> : vector<24x32xf32>
    %43 = tpu.matmul %41, %42, %cst_23 {dimension_numbers = #tpu.dot_dimension_numbers<[1], [0], [0], [1], [0, 0, 1, 1], [], []>} : vector<24x64xbf16>, vector<64x32xbf16>, vector<24x32xf32> -> vector<24x32xf32>
    %c0_24 = arith.constant 0 : index
    %c0_25 = arith.constant 0 : index
    %44 = vector.load %arg7[%c0_24, %c0_25] : memref<1x32xf32, #tpu.memory_space<vmem>>, vector<1x32xf32>
    %45 = vector.broadcast %44 : vector<1x32xf32> to vector<24x32xf32>
    %46 = arith.addf %43, %45 : vector<24x32xf32>
    %47 = arith.addf %32, %46 : vector<24x32xf32>
    %48 = arith.truncf %47 : vector<24x32xf32> to vector<24x32xbf16>
    %c0_26 = arith.constant 0 : index
    %c0_27 = arith.constant 0 : index
    %49 = vector.load %arg8[%c0_26, %c0_27] : memref<32x256xbf16, #tpu.memory_space<vmem>>, vector<32x256xbf16>
    %cst_28 = arith.constant dense<0.000000e+00> : vector<24x256xf32>
    %50 = tpu.matmul %48, %49, %cst_28 {dimension_numbers = #tpu.dot_dimension_numbers<[1], [0], [0], [1], [0, 0, 1, 1], [], []>} : vector<24x32xbf16>, vector<32x256xbf16>, vector<24x256xf32> -> vector<24x256xf32>
    %c0_29 = arith.constant 0 : index
    %c0_30 = arith.constant 0 : index
    %51 = vector.load %arg9[%c0_29, %c0_30] : memref<1x256xf32, #tpu.memory_space<vmem>>, vector<1x256xf32>
    %52 = vector.broadcast %51 : vector<1x256xf32> to vector<24x256xf32>
    %53 = arith.addf %50, %52 : vector<24x256xf32>
    %c0_31 = arith.constant 0 : index
    %c0_32 = arith.constant 0 : index
    %54 = vector.load %arg11[%c0_31, %c0_32] : memref<24x1xf32, #tpu.memory_space<vmem>>, vector<24x1xf32>
    %55 = vector.broadcast %54 : vector<24x1xf32> to vector<24x256xf32>
    %56 = arith.mulf %53, %55 : vector<24x256xf32>
    %c0_33 = arith.constant 0 : index
    %c0_34 = arith.constant 0 : index
    %57 = vector.load %arg48[%c0_33, %c0_34] : memref<24x256xf32, #tpu.memory_space<vmem>>, vector<24x256xf32>
    tpu.vector_store %arg48[%c0_33, %c0_34], %56 {strides = array<i32>} : memref<24x256xf32, #tpu.memory_space<vmem>>, vector<24x256xf32>,
    %c0_35 = arith.constant 0 : index
    %c0_36 = arith.constant 0 : index
    %58 = vector.load %arg12[%c0_35, %c0_36] : memref<32x192xf32, #tpu.memory_space<vmem>>, vector<32x192xf32>
    %59 = arith.truncf %58 : vector<32x192xf32> to vector<32x192xbf16>
    %c0_37 = arith.constant 0 : index
    %c0_38 = arith.constant 0 : index
    %60 = vector.load %arg13[%c0_37, %c0_38] : memref<192x32xbf16, #tpu.memory_space<vmem>>, vector<192x32xbf16>
    %cst_39 = arith.constant dense<0.000000e+00> : vector<32x32xf32>
    %61 = tpu.matmul %59, %60, %cst_39 {dimension_numbers = #tpu.dot_dimension_numbers<[1], [0], [0], [1], [0, 0, 1, 1], [], []>} : vector<32x192xbf16>, vector<192x32xbf16>, vector<32x32xf32> -> vector<32x32xf32>
    %c0_40 = arith.constant 0 : index
    %c0_41 = arith.constant 0 : index
    %62 = vector.load %arg14[%c0_40, %c0_41] : memref<1x32xf32, #tpu.memory_space<vmem>>, vector<1x32xf32>
    %63 = vector.broadcast %62 : vector<1x32xf32> to vector<32x32xf32>
    %64 = arith.addf %61, %63 : vector<32x32xf32>
    %65 = arith.truncf %64 : vector<32x32xf32> to vector<32x32xbf16>
    %c0_42 = arith.constant 0 : index
    %c0_43 = arith.constant 0 : index
    %66 = vector.load %arg15[%c0_42, %c0_43] : memref<32x96xbf16, #tpu.memory_space<vmem>>, vector<32x96xbf16>
    %cst_44 = arith.constant dense<0.000000e+00> : vector<32x96xf32>
    %67 = tpu.matmul %65, %66, %cst_44 {dimension_numbers = #tpu.dot_dimension_numbers<[1], [0], [0], [1], [0, 0, 1, 1], [], []>} : vector<32x32xbf16>, vector<32x96xbf16>, vector<32x96xf32> -> vector<32x96xf32>
    %68 = vector.extract_strided_slice %67 {offsets = [0, 0], sizes = [32, 32], strides = [1, 1]} : vector<32x96xf32> to vector<32x32xf32>
    %69 = vector.extract_strided_slice %67 {offsets = [0, 32], sizes = [32, 32], strides = [1, 1]} : vector<32x96xf32> to vector<32x32xf32>
    %70 = vector.extract_strided_slice %67 {offsets = [0, 64], sizes = [32, 32], strides = [1, 1]} : vector<32x96xf32> to vector<32x32xf32>
    %71 = arith.truncf %68 : vector<32x32xf32> to vector<32x32xbf16>
    %72 = arith.truncf %69 : vector<32x32xf32> to vector<32x32xbf16>
    %cst_45 = arith.constant dense<0.000000e+00> : vector<32x32xf32>
    %73 = tpu.matmul %71, %72, %cst_45 {dimension_numbers = #tpu.dot_dimension_numbers<[1], [1], [0], [0], [0, 0, 1, 0], [], []>} : vector<32x32xbf16>, vector<32x32xbf16>, vector<32x32xf32> -> vector<32x32xf32>
    %cst_46 = arith.constant 0.176776692 : f32
    %74 = vector.broadcast %cst_46 : f32 to vector<32x32xf32>
    %75 = arith.mulf %73, %74 : vector<32x32xf32>
    %c0_47 = arith.constant 0 : index
    %c0_48 = arith.constant 0 : index
    %76 = vector.load %arg22[%c0_47, %c0_48] : memref<32x32xf32, #tpu.memory_space<vmem>>, vector<32x32xf32>
    %77 = arith.addf %75, %76 : vector<32x32xf32>
    %cst_49 = arith.constant dense<0xFF800000> : vector<32xf32>
    %78 = vector.multi_reduction <maximumf>, %77, %cst_49 [1] : vector<32x32xf32> to vector<32xf32>
    %79 = vector.shape_cast %78 : vector<32xf32> to vector<32x1xf32>
    %80 = vector.broadcast %79 : vector<32x1xf32> to vector<32x32xf32>
    %81 = arith.subf %77, %80 : vector<32x32xf32>
    %82 = math.exp %81 : vector<32x32xf32>
    %cst_50 = arith.constant dense<0.000000e+00> : vector<32xf32>
    %83 = vector.multi_reduction <add>, %82, %cst_50 [1] : vector<32x32xf32> to vector<32xf32>
    %84 = vector.shape_cast %83 : vector<32xf32> to vector<32x1xf32>
    %85 = tpu.reciprocal %84 {approx = true} : vector<32x1xf32> -> vector<32x1xf32>
    %86 = vector.broadcast %85 : vector<32x1xf32> to vector<32x32xf32>
    %87 = arith.mulf %82, %86 : vector<32x32xf32>
    %88 = arith.truncf %87 : vector<32x32xf32> to vector<32x32xbf16>
    %89 = arith.truncf %70 : vector<32x32xf32> to vector<32x32xbf16>
    %cst_51 = arith.constant dense<0.000000e+00> : vector<32x32xf32>
    %90 = tpu.matmul %88, %89, %cst_51 {dimension_numbers = #tpu.dot_dimension_numbers<[1], [0], [0], [1], [0, 0, 1, 1], [], []>} : vector<32x32xbf16>, vector<32x32xbf16>, vector<32x32xf32> -> vector<32x32xf32>
    %91 = arith.truncf %90 : vector<32x32xf32> to vector<32x32xbf16>
    %c0_52 = arith.constant 0 : index
    %c0_53 = arith.constant 0 : index
    %92 = vector.load %arg16[%c0_52, %c0_53] : memref<32x64xbf16, #tpu.memory_space<vmem>>, vector<32x64xbf16>
    %cst_54 = arith.constant dense<0.000000e+00> : vector<32x64xf32>
    %93 = tpu.matmul %91, %92, %cst_54 {dimension_numbers = #tpu.dot_dimension_numbers<[1], [0], [0], [1], [0, 0, 1, 1], [], []>} : vector<32x32xbf16>, vector<32x64xbf16>, vector<32x64xf32> -> vector<32x64xf32>
    %c0_55 = arith.constant 0 : index
    %c0_56 = arith.constant 0 : index
    %94 = vector.load %arg17[%c0_55, %c0_56] : memref<1x64xf32, #tpu.memory_space<vmem>>, vector<1x64xf32>
    %95 = vector.broadcast %94 : vector<1x64xf32> to vector<32x64xf32>
    %96 = arith.addf %93, %95 : vector<32x64xf32>
    %cst_57 = arith.constant 0.000000e+00 : f32
    %97 = vector.broadcast %cst_57 : f32 to vector<32x64xf32>
    %98 = arith.maximumf %96, %97 : vector<32x64xf32>
    %99 = arith.truncf %98 : vector<32x64xf32> to vector<32x64xbf16>
    %c0_58 = arith.constant 0 : index
    %c0_59 = arith.constant 0 : index
    %100 = vector.load %arg18[%c0_58, %c0_59] : memref<64x32xbf16, #tpu.memory_space<vmem>>, vector<64x32xbf16>
    %cst_60 = arith.constant dense<0.000000e+00> : vector<32x32xf32>
    %101 = tpu.matmul %99, %100, %cst_60 {dimension_numbers = #tpu.dot_dimension_numbers<[1], [0], [0], [1], [0, 0, 1, 1], [], []>} : vector<32x64xbf16>, vector<64x32xbf16>, vector<32x32xf32> -> vector<32x32xf32>
    %c0_61 = arith.constant 0 : index
    %c0_62 = arith.constant 0 : index
    %102 = vector.load %arg19[%c0_61, %c0_62] : memref<1x32xf32, #tpu.memory_space<vmem>>, vector<1x32xf32>
    %103 = vector.broadcast %102 : vector<1x32xf32> to vector<32x32xf32>
    %104 = arith.addf %101, %103 : vector<32x32xf32>
    %105 = arith.addf %90, %104 : vector<32x32xf32>
    %106 = arith.truncf %105 : vector<32x32xf32> to vector<32x32xbf16>
    %c0_63 = arith.constant 0 : index
    %c0_64 = arith.constant 0 : index
    %107 = vector.load %arg20[%c0_63, %c0_64] : memref<32x192xbf16, #tpu.memory_space<vmem>>, vector<32x192xbf16>
    %cst_65 = arith.constant dense<0.000000e+00> : vector<32x192xf32>
    %108 = tpu.matmul %106, %107, %cst_65 {dimension_numbers = #tpu.dot_dimension_numbers<[1], [0], [0], [1], [0, 0, 1, 1], [], []>} : vector<32x32xbf16>, vector<32x192xbf16>, vector<32x192xf32> -> vector<32x192xf32>
    %c0_66 = arith.constant 0 : index
    %c0_67 = arith.constant 0 : index
    %109 = vector.load %arg21[%c0_66, %c0_67] : memref<1x192xf32, #tpu.memory_space<vmem>>, vector<1x192xf32>
    %110 = vector.broadcast %109 : vector<1x192xf32> to vector<32x192xf32>
    %111 = arith.addf %108, %110 : vector<32x192xf32>
    %c0_68 = arith.constant 0 : index
    %c0_69 = arith.constant 0 : index
    %112 = vector.load %arg23[%c0_68, %c0_69] : memref<32x1xf32, #tpu.memory_space<vmem>>, vector<32x1xf32>
    %113 = vector.broadcast %112 : vector<32x1xf32> to vector<32x192xf32>
    %114 = arith.mulf %111, %113 : vector<32x192xf32>
    %c0_70 = arith.constant 0 : index
    %c0_71 = arith.constant 0 : index
    %115 = vector.load %arg49[%c0_70, %c0_71] : memref<32x192xf32, #tpu.memory_space<vmem>>, vector<32x192xf32>
    tpu.vector_store %arg49[%c0_70, %c0_71], %114 {strides = array<i32>} : memref<32x192xf32, #tpu.memory_space<vmem>>, vector<32x192xf32>,
    %c0_72 = arith.constant 0 : index
    %c0_73 = arith.constant 0 : index
    %116 = vector.load %arg24[%c0_72, %c0_73] : memref<48x128xf32, #tpu.memory_space<vmem>>, vector<48x128xf32>
    %117 = arith.truncf %116 : vector<48x128xf32> to vector<48x128xbf16>
    %c0_74 = arith.constant 0 : index
    %c0_75 = arith.constant 0 : index
    %118 = vector.load %arg25[%c0_74, %c0_75] : memref<128x32xbf16, #tpu.memory_space<vmem>>, vector<128x32xbf16>
    %cst_76 = arith.constant dense<0.000000e+00> : vector<48x32xf32>
    %119 = tpu.matmul %117, %118, %cst_76 {dimension_numbers = #tpu.dot_dimension_numbers<[1], [0], [0], [1], [0, 0, 1, 1], [], []>} : vector<48x128xbf16>, vector<128x32xbf16>, vector<48x32xf32> -> vector<48x32xf32>
    %c0_77 = arith.constant 0 : index
    %c0_78 = arith.constant 0 : index
    %120 = vector.load %arg26[%c0_77, %c0_78] : memref<1x32xf32, #tpu.memory_space<vmem>>, vector<1x32xf32>
    %121 = vector.broadcast %120 : vector<1x32xf32> to vector<48x32xf32>
    %122 = arith.addf %119, %121 : vector<48x32xf32>
    %123 = arith.truncf %122 : vector<48x32xf32> to vector<48x32xbf16>
    %c0_79 = arith.constant 0 : index
    %c0_80 = arith.constant 0 : index
    %124 = vector.load %arg27[%c0_79, %c0_80] : memref<32x96xbf16, #tpu.memory_space<vmem>>, vector<32x96xbf16>
    %cst_81 = arith.constant dense<0.000000e+00> : vector<48x96xf32>
    %125 = tpu.matmul %123, %124, %cst_81 {dimension_numbers = #tpu.dot_dimension_numbers<[1], [0], [0], [1], [0, 0, 1, 1], [], []>} : vector<48x32xbf16>, vector<32x96xbf16>, vector<48x96xf32> -> vector<48x96xf32>
    %126 = vector.extract_strided_slice %125 {offsets = [0, 0], sizes = [48, 32], strides = [1, 1]} : vector<48x96xf32> to vector<48x32xf32>
    %127 = vector.extract_strided_slice %125 {offsets = [0, 32], sizes = [48, 32], strides = [1, 1]} : vector<48x96xf32> to vector<48x32xf32>
    %128 = vector.extract_strided_slice %125 {offsets = [0, 64], sizes = [48, 32], strides = [1, 1]} : vector<48x96xf32> to vector<48x32xf32>
    %129 = arith.truncf %126 : vector<48x32xf32> to vector<48x32xbf16>
    %130 = arith.truncf %127 : vector<48x32xf32> to vector<48x32xbf16>
    %cst_82 = arith.constant dense<0.000000e+00> : vector<48x48xf32>
    %131 = tpu.matmul %129, %130, %cst_82 {dimension_numbers = #tpu.dot_dimension_numbers<[1], [1], [0], [0], [0, 0, 1, 0], [], []>} : vector<48x32xbf16>, vector<48x32xbf16>, vector<48x48xf32> -> vector<48x48xf32>
    %cst_83 = arith.constant 0.176776692 : f32
    %132 = vector.broadcast %cst_83 : f32 to vector<48x48xf32>
    %133 = arith.mulf %131, %132 : vector<48x48xf32>
    %c0_84 = arith.constant 0 : index
    %c0_85 = arith.constant 0 : index
    %134 = vector.load %arg34[%c0_84, %c0_85] : memref<48x48xf32, #tpu.memory_space<vmem>>, vector<48x48xf32>
    %135 = arith.addf %133, %134 : vector<48x48xf32>
    %cst_86 = arith.constant dense<0xFF800000> : vector<48xf32>
    %136 = vector.multi_reduction <maximumf>, %135, %cst_86 [1] : vector<48x48xf32> to vector<48xf32>
    %137 = vector.shape_cast %136 : vector<48xf32> to vector<48x1xf32>
    %138 = vector.broadcast %137 : vector<48x1xf32> to vector<48x48xf32>
    %139 = arith.subf %135, %138 : vector<48x48xf32>
    %140 = math.exp %139 : vector<48x48xf32>
    %cst_87 = arith.constant dense<0.000000e+00> : vector<48xf32>
    %141 = vector.multi_reduction <add>, %140, %cst_87 [1] : vector<48x48xf32> to vector<48xf32>
    %142 = vector.shape_cast %141 : vector<48xf32> to vector<48x1xf32>
    %143 = tpu.reciprocal %142 {approx = true} : vector<48x1xf32> -> vector<48x1xf32>
    %144 = vector.broadcast %143 : vector<48x1xf32> to vector<48x48xf32>
    %145 = arith.mulf %140, %144 : vector<48x48xf32>
    %146 = arith.truncf %145 : vector<48x48xf32> to vector<48x48xbf16>
    %147 = arith.truncf %128 : vector<48x32xf32> to vector<48x32xbf16>
    %cst_88 = arith.constant dense<0.000000e+00> : vector<48x32xf32>
    %148 = tpu.matmul %146, %147, %cst_88 {dimension_numbers = #tpu.dot_dimension_numbers<[1], [0], [0], [1], [0, 0, 1, 1], [], []>} : vector<48x48xbf16>, vector<48x32xbf16>, vector<48x32xf32> -> vector<48x32xf32>
    %149 = arith.truncf %148 : vector<48x32xf32> to vector<48x32xbf16>
    %c0_89 = arith.constant 0 : index
    %c0_90 = arith.constant 0 : index
    %150 = vector.load %arg28[%c0_89, %c0_90] : memref<32x64xbf16, #tpu.memory_space<vmem>>, vector<32x64xbf16>
    %cst_91 = arith.constant dense<0.000000e+00> : vector<48x64xf32>
    %151 = tpu.matmul %149, %150, %cst_91 {dimension_numbers = #tpu.dot_dimension_numbers<[1], [0], [0], [1], [0, 0, 1, 1], [], []>} : vector<48x32xbf16>, vector<32x64xbf16>, vector<48x64xf32> -> vector<48x64xf32>
    %c0_92 = arith.constant 0 : index
    %c0_93 = arith.constant 0 : index
    %152 = vector.load %arg29[%c0_92, %c0_93] : memref<1x64xf32, #tpu.memory_space<vmem>>, vector<1x64xf32>
    %153 = vector.broadcast %152 : vector<1x64xf32> to vector<48x64xf32>
    %154 = arith.addf %151, %153 : vector<48x64xf32>
    %cst_94 = arith.constant 0.000000e+00 : f32
    %155 = vector.broadcast %cst_94 : f32 to vector<48x64xf32>
    %156 = arith.maximumf %154, %155 : vector<48x64xf32>
    %157 = arith.truncf %156 : vector<48x64xf32> to vector<48x64xbf16>
    %c0_95 = arith.constant 0 : index
    %c0_96 = arith.constant 0 : index
    %158 = vector.load %arg30[%c0_95, %c0_96] : memref<64x32xbf16, #tpu.memory_space<vmem>>, vector<64x32xbf16>
    %cst_97 = arith.constant dense<0.000000e+00> : vector<48x32xf32>
    %159 = tpu.matmul %157, %158, %cst_97 {dimension_numbers = #tpu.dot_dimension_numbers<[1], [0], [0], [1], [0, 0, 1, 1], [], []>} : vector<48x64xbf16>, vector<64x32xbf16>, vector<48x32xf32> -> vector<48x32xf32>
    %c0_98 = arith.constant 0 : index
    %c0_99 = arith.constant 0 : index
    %160 = vector.load %arg31[%c0_98, %c0_99] : memref<1x32xf32, #tpu.memory_space<vmem>>, vector<1x32xf32>
    %161 = vector.broadcast %160 : vector<1x32xf32> to vector<48x32xf32>
    %162 = arith.addf %159, %161 : vector<48x32xf32>
    %163 = arith.addf %148, %162 : vector<48x32xf32>
    %164 = arith.truncf %163 : vector<48x32xf32> to vector<48x32xbf16>
    %c0_100 = arith.constant 0 : index
    %c0_101 = arith.constant 0 : index
    %165 = vector.load %arg32[%c0_100, %c0_101] : memref<32x128xbf16, #tpu.memory_space<vmem>>, vector<32x128xbf16>
    %cst_102 = arith.constant dense<0.000000e+00> : vector<48x128xf32>
    %166 = tpu.matmul %164, %165, %cst_102 {dimension_numbers = #tpu.dot_dimension_numbers<[1], [0], [0], [1], [0, 0, 1, 1], [], []>} : vector<48x32xbf16>, vector<32x128xbf16>, vector<48x128xf32> -> vector<48x128xf32>
    %c0_103 = arith.constant 0 : index
    %c0_104 = arith.constant 0 : index
    %167 = vector.load %arg33[%c0_103, %c0_104] : memref<1x128xf32, #tpu.memory_space<vmem>>, vector<1x128xf32>
    %168 = vector.broadcast %167 : vector<1x128xf32> to vector<48x128xf32>
    %169 = arith.addf %166, %168 : vector<48x128xf32>
    %c0_105 = arith.constant 0 : index
    %c0_106 = arith.constant 0 : index
    %170 = vector.load %arg35[%c0_105, %c0_106] : memref<48x1xf32, #tpu.memory_space<vmem>>, vector<48x1xf32>
    %171 = vector.broadcast %170 : vector<48x1xf32> to vector<48x128xf32>
    %172 = arith.mulf %169, %171 : vector<48x128xf32>
    %c0_107 = arith.constant 0 : index
    %c0_108 = arith.constant 0 : index
    %173 = vector.load %arg50[%c0_107, %c0_108] : memref<48x128xf32, #tpu.memory_space<vmem>>, vector<48x128xf32>
    tpu.vector_store %arg50[%c0_107, %c0_108], %172 {strides = array<i32>} : memref<48x128xf32, #tpu.memory_space<vmem>>, vector<48x128xf32>,
    %c0_109 = arith.constant 0 : index
    %c0_110 = arith.constant 0 : index
    %174 = vector.load %arg36[%c0_109, %c0_110] : memref<96x64xf32, #tpu.memory_space<vmem>>, vector<96x64xf32>
    %175 = arith.truncf %174 : vector<96x64xf32> to vector<96x64xbf16>
    %c0_111 = arith.constant 0 : index
    %c0_112 = arith.constant 0 : index
    %176 = vector.load %arg37[%c0_111, %c0_112] : memref<64x32xbf16, #tpu.memory_space<vmem>>, vector<64x32xbf16>
    %cst_113 = arith.constant dense<0.000000e+00> : vector<96x32xf32>
    %177 = tpu.matmul %175, %176, %cst_113 {dimension_numbers = #tpu.dot_dimension_numbers<[1], [0], [0], [1], [0, 0, 1, 1], [], []>} : vector<96x64xbf16>, vector<64x32xbf16>, vector<96x32xf32> -> vector<96x32xf32>
    %c0_114 = arith.constant 0 : index
    %c0_115 = arith.constant 0 : index
    %178 = vector.load %arg38[%c0_114, %c0_115] : memref<1x32xf32, #tpu.memory_space<vmem>>, vector<1x32xf32>
    %179 = vector.broadcast %178 : vector<1x32xf32> to vector<96x32xf32>
    %180 = arith.addf %177, %179 : vector<96x32xf32>
    %181 = arith.truncf %180 : vector<96x32xf32> to vector<96x32xbf16>
    %c0_116 = arith.constant 0 : index
    %c0_117 = arith.constant 0 : index
    %182 = vector.load %arg39[%c0_116, %c0_117] : memref<32x96xbf16, #tpu.memory_space<vmem>>, vector<32x96xbf16>
    %cst_118 = arith.constant dense<0.000000e+00> : vector<96x96xf32>
    %183 = tpu.matmul %181, %182, %cst_118 {dimension_numbers = #tpu.dot_dimension_numbers<[1], [0], [0], [1], [0, 0, 1, 1], [], []>} : vector<96x32xbf16>, vector<32x96xbf16>, vector<96x96xf32> -> vector<96x96xf32>
    %184 = vector.extract_strided_slice %183 {offsets = [0, 0], sizes = [96, 32], strides = [1, 1]} : vector<96x96xf32> to vector<96x32xf32>
    %185 = vector.extract_strided_slice %183 {offsets = [0, 32], sizes = [96, 32], strides = [1, 1]} : vector<96x96xf32> to vector<96x32xf32>
    %186 = vector.extract_strided_slice %183 {offsets = [0, 64], sizes = [96, 32], strides = [1, 1]} : vector<96x96xf32> to vector<96x32xf32>
    %187 = arith.truncf %184 : vector<96x32xf32> to vector<96x32xbf16>
    %188 = arith.truncf %185 : vector<96x32xf32> to vector<96x32xbf16>
    %cst_119 = arith.constant dense<0.000000e+00> : vector<96x96xf32>
    %189 = tpu.matmul %187, %188, %cst_119 {dimension_numbers = #tpu.dot_dimension_numbers<[1], [1], [0], [0], [0, 0, 1, 0], [], []>} : vector<96x32xbf16>, vector<96x32xbf16>, vector<96x96xf32> -> vector<96x96xf32>
    %cst_120 = arith.constant 0.176776692 : f32
    %190 = vector.broadcast %cst_120 : f32 to vector<96x96xf32>
    %191 = arith.mulf %189, %190 : vector<96x96xf32>
    %c0_121 = arith.constant 0 : index
    %c0_122 = arith.constant 0 : index
    %192 = vector.load %arg46[%c0_121, %c0_122] : memref<96x96xf32, #tpu.memory_space<vmem>>, vector<96x96xf32>
    %193 = arith.addf %191, %192 : vector<96x96xf32>
    %cst_123 = arith.constant dense<0xFF800000> : vector<96xf32>
    %194 = vector.multi_reduction <maximumf>, %193, %cst_123 [1] : vector<96x96xf32> to vector<96xf32>
    %195 = vector.shape_cast %194 : vector<96xf32> to vector<96x1xf32>
    %196 = vector.broadcast %195 : vector<96x1xf32> to vector<96x96xf32>
    %197 = arith.subf %193, %196 : vector<96x96xf32>
    %198 = math.exp %197 : vector<96x96xf32>
    %cst_124 = arith.constant dense<0.000000e+00> : vector<96xf32>
    %199 = vector.multi_reduction <add>, %198, %cst_124 [1] : vector<96x96xf32> to vector<96xf32>
    %200 = vector.shape_cast %199 : vector<96xf32> to vector<96x1xf32>
    %201 = tpu.reciprocal %200 {approx = true} : vector<96x1xf32> -> vector<96x1xf32>
    %202 = vector.broadcast %201 : vector<96x1xf32> to vector<96x96xf32>
    %203 = arith.mulf %198, %202 : vector<96x96xf32>
    %204 = arith.truncf %203 : vector<96x96xf32> to vector<96x96xbf16>
    %205 = arith.truncf %186 : vector<96x32xf32> to vector<96x32xbf16>
    %cst_125 = arith.constant dense<0.000000e+00> : vector<96x32xf32>
    %206 = tpu.matmul %204, %205, %cst_125 {dimension_numbers = #tpu.dot_dimension_numbers<[1], [0], [0], [1], [0, 0, 1, 1], [], []>} : vector<96x96xbf16>, vector<96x32xbf16>, vector<96x32xf32> -> vector<96x32xf32>
    %207 = arith.truncf %206 : vector<96x32xf32> to vector<96x32xbf16>
    %c0_126 = arith.constant 0 : index
    %c0_127 = arith.constant 0 : index
    %208 = vector.load %arg40[%c0_126, %c0_127] : memref<32x64xbf16, #tpu.memory_space<vmem>>, vector<32x64xbf16>
    %cst_128 = arith.constant dense<0.000000e+00> : vector<96x64xf32>
    %209 = tpu.matmul %207, %208, %cst_128 {dimension_numbers = #tpu.dot_dimension_numbers<[1], [0], [0], [1], [0, 0, 1, 1], [], []>} : vector<96x32xbf16>, vector<32x64xbf16>, vector<96x64xf32> -> vector<96x64xf32>
    %c0_129 = arith.constant 0 : index
    %c0_130 = arith.constant 0 : index
    %210 = vector.load %arg41[%c0_129, %c0_130] : memref<1x64xf32, #tpu.memory_space<vmem>>, vector<1x64xf32>
    %211 = vector.broadcast %210 : vector<1x64xf32> to vector<96x64xf32>
    %212 = arith.addf %209, %211 : vector<96x64xf32>
    %cst_131 = arith.constant 0.000000e+00 : f32
    %213 = vector.broadcast %cst_131 : f32 to vector<96x64xf32>
    %214 = arith.maximumf %212, %213 : vector<96x64xf32>
    %215 = arith.truncf %214 : vector<96x64xf32> to vector<96x64xbf16>
    %c0_132 = arith.constant 0 : index
    %c0_133 = arith.constant 0 : index
    %216 = vector.load %arg42[%c0_132, %c0_133] : memref<64x32xbf16, #tpu.memory_space<vmem>>, vector<64x32xbf16>
    %cst_134 = arith.constant dense<0.000000e+00> : vector<96x32xf32>
    %217 = tpu.matmul %215, %216, %cst_134 {dimension_numbers = #tpu.dot_dimension_numbers<[1], [0], [0], [1], [0, 0, 1, 1], [], []>} : vector<96x64xbf16>, vector<64x32xbf16>, vector<96x32xf32> -> vector<96x32xf32>
    %c0_135 = arith.constant 0 : index
    %c0_136 = arith.constant 0 : index
    %218 = vector.load %arg43[%c0_135, %c0_136] : memref<1x32xf32, #tpu.memory_space<vmem>>, vector<1x32xf32>
    %219 = vector.broadcast %218 : vector<1x32xf32> to vector<96x32xf32>
    %220 = arith.addf %217, %219 : vector<96x32xf32>
    %221 = arith.addf %206, %220 : vector<96x32xf32>
    %222 = arith.truncf %221 : vector<96x32xf32> to vector<96x32xbf16>
    %c0_137 = arith.constant 0 : index
    %c0_138 = arith.constant 0 : index
    %223 = vector.load %arg44[%c0_137, %c0_138] : memref<32x64xbf16, #tpu.memory_space<vmem>>, vector<32x64xbf16>
    %cst_139 = arith.constant dense<0.000000e+00> : vector<96x64xf32>
    %224 = tpu.matmul %222, %223, %cst_139 {dimension_numbers = #tpu.dot_dimension_numbers<[1], [0], [0], [1], [0, 0, 1, 1], [], []>} : vector<96x32xbf16>, vector<32x64xbf16>, vector<96x64xf32> -> vector<96x64xf32>
    %c0_140 = arith.constant 0 : index
    %c0_141 = arith.constant 0 : index
    %225 = vector.load %arg45[%c0_140, %c0_141] : memref<1x64xf32, #tpu.memory_space<vmem>>, vector<1x64xf32>
    %226 = vector.broadcast %225 : vector<1x64xf32> to vector<96x64xf32>
    %227 = arith.addf %224, %226 : vector<96x64xf32>
    %c0_142 = arith.constant 0 : index
    %c0_143 = arith.constant 0 : index
    %228 = vector.load %arg47[%c0_142, %c0_143] : memref<96x1xf32, #tpu.memory_space<vmem>>, vector<96x1xf32>
    %229 = vector.broadcast %228 : vector<96x1xf32> to vector<96x64xf32>
    %230 = arith.mulf %227, %229 : vector<96x64xf32>
    %c0_144 = arith.constant 0 : index
    %c0_145 = arith.constant 0 : index
    %231 = vector.load %arg51[%c0_144, %c0_145] : memref<96x64xf32, #tpu.memory_space<vmem>>, vector<96x64xf32>
    tpu.vector_store %arg51[%c0_144, %c0_145], %230 {strides = array<i32>} : memref<96x64xf32, #tpu.memory_space<vmem>>, vector<96x64xf32>,
    return
  }
}

</mosaic_0001>

<bundles_post_ra>
// kernel: neg.3
= control target key start
LH: loop header
LB: loop body
LE: loop exit
PB: predicated region body
PF: predicated region fallthrough
CT: control target
= control target key end

     0   :  { %s24_s0 = inlined_call_operand.vmem [shape: f32[8,3], index: 0, kind: input, shape index: {}]   ;;  %s25_s1 = inlined_call_operand.vmem [shape: f32[8,3], index: 1, kind: output, shape index: {}]  }
   0x1   :  { %v2_v0 = vld [vmem:[%s24_s0] sm:$0xff] }
   0x2   :  { %v5_v1 = vxor.u32 2147483648, %v2_v0 }
   0x4   :  { %7 = vst [vmem:[%s25_s1] sm:$0xff] %v5_v1 }

// kernel: _lambda_.2
= control target key start
LH: loop header
LB: loop body
LE: loop exit
PB: predicated region body
PF: predicated region fallthrough
CT: control target
= control target key end

     0   :  { %s3232_s0 = inlined_call_operand.vmem [shape: f32[8,24], index: 0, kind: input, shape index: {}]   ;;  %s3233_s1 = inlined_call_operand.vmem [shape: f32[8,6], index: 1, kind: input, shape index: {}]   ;;  %s3234_s2 = inlined_call_operand.vmem [shape: f32[8,6], index: 2, kind: input, shape index: {}]   ;;  %s3235_s3 = inlined_call_operand.vmem [shape: f32[8,6], index: 3, kind: input, shape index: {}]   ;;  %s3236_s4 = inlined_call_operand.vmem [shape: f32[8,27], index: 4, kind: input, shape index: {}]   ;;  %s3237_s5 = inlined_call_operand.vmem [shape: f32[8,31], index: 5, kind: input, shape index: {}]   ;;  %s3238_s6 = inlined_call_operand.vmem [shape: f32[8,35], index: 6, kind: input, shape index: {}]   ;;  %s3239_s7 = inlined_call_operand.vmem [shape: f32[27,24], index: 7, kind: input, shape index: {}]   ;;  %s3240_s8 = inlined_call_operand.vmem [shape: f32[31,24], index: 8, kind: input, shape index: {}]   ;;  %s3241_s9 = inlined_call_operand.vmem [shape: f32[35,24], index: 9, kind: input, shape index: {}]   ;;  %s3242_s10 = inlined_call_operand.vmem [shape: f32[2,8], index: 10, kind: input, shape index: {}]   ;;  %s3243_s11 = inlined_call_operand.vmem [shape: f32[24,4], index: 11, kind: input, shape index: {}]   ;;  %s3244_s12 = inlined_call_operand.vmem [shape: f32[1,4], index: 12, kind: input, shape index: {}]   ;;  %s3245_s13 = inlined_call_operand.vmem [shape: f32[3], index: 13, kind: input, shape index: {}]   ;;  %s3246_s14 = inlined_call_operand.vmem [shape: f32[3], index: 14, kind: input, shape index: {}]   ;;  %s3247_s15 = inlined_call_operand.<no memory space> [shape: f32[1], index: 15, kind: input, shape index: {}]   ;;  %s3248_s16 = inlined_call_operand.vmem [shape: f32[2,4], index: 16, kind: output, shape index: {}]  }
   0x1   :  { %3282 = sst [smem:[#allocation19_spill]] %s3232_s0 }
   0x2   :  { %22 = vsyncpa [#allocation4], 0  ;;  %s56_s23 = sshll.u32 %s3245_s13, 4  ;;  %s57_s23 = int_to_ptr.vmem [resolvable:$true] %s56_s23 }
   0x3   :  { %23 = vsyncpa [#allocation6], 0  ;;  %s66_s26 = sshll.u32 %s3246_s14, 4  ;;  %s1846_s27 = scalar_lea.vmem %s57_s23, 16  ;;  %s67_s26 = int_to_ptr.vmem [resolvable:$true] %s66_s26 }
   0x4   :  { %p1847_p0 = scmp.ne.s32.totalorder %s57_s23, %s1846_s27  ;;  %p1851_p1 = scmp.lt.s32.totalorder %s57_s23, %s57_s23 }
   0x5   :  { %p1852_p2 = scmp.lt.s32.totalorder %s1846_s27, %s1846_s27 }
   0x7   :  { %p1853_p3 = por %p1852_p2, %p1851_p1 }
   0x9   :  { %p1854_p4 = pnand %p1853_p3, %p1847_p0 }
   0xb   :  { %1857 = shalt.err (!%p1854_p4)
}
   0xc   :  { %s1874_s28 = smov [#allocation3]   ;;  %s1858_s29 = scalar_lea.vmem %s67_s26, 16 }
   0xd   :  { %59 = dma.vmem_to_smem %s57_s23, 16, %s1874_s28, [#allocation4]  }
   0xe   :  { %p1859_p5 = scmp.ne.s32.totalorder %s67_s26, %s1858_s29  ;;  %p1863_p6 = scmp.lt.s32.totalorder %s67_s26, %s67_s26 }
   0xf   :  { %p1864_p7 = scmp.lt.s32.totalorder %s1858_s29, %s1858_s29 }
  0x11   :  { %p1865_p8 = por %p1864_p7, %p1863_p6 }
  0x13   :  { %p1866_p9 = pnand %p1865_p8, %p1859_p5 }
  0x15   :  { %1869 = shalt.err (!%p1866_p9)
}
  0x16   :  { %s1875_s13 = smov [#allocation5]  }
  0x17   :  { %69 = dma.vmem_to_smem %s67_s26, 16, %s1875_s13, [#allocation6]  }
  0x18   :  { %1870 = dma.done.wait [#allocation4], 16  }
  0x19   :  { %1871 = vsyncadd [#allocation4], 4294967280 }
  0x1a   :  { %1872 = dma.done.wait [#allocation6], 16  }
  0x1b   :  { %1873 = vsyncadd [#allocation6], 4294967280 }
  0x1c   :  { %78 = sfence }
  0x1d   :  { %v80_v0 = vlaneseq  ;;  %v1171_v1 = vld [vmem:[%s3239_s7 + $0x18] sm:$0x7]  ;;  %vm1176_vm0 = vcmask 1042432   ;;  %v3249_v2 = vmov 0.0   ;;  %v1170_v3 = vld [vmem:[%s3239_s7 + $0x10] sm:$0xff]  ;;  %vm1259_vm1 = vcmask 1046528  }
  0x1e   :  { %1715 = vmatprep.subr.mxu0 %v3249_v2  ;;  %1726 = vmatprep.subr.mxu1 %v3249_v2  ;;  %vm1877_vm2 = vmmov 0   ;;  %v1254_v5 = vld [vmem:[%s3240_s8 + $0x18] sm:$0x7f]  ;;  %v1995_v6 = vld [vmem:[%s3235_s3] sm:$0xff]  ;;  %v1169_v7 = vld [vmem:[%s3239_s7 + $0x8] sm:$0xff]  ;;  %vm1172_vm3 = vcmask 220160  }
  0x1f   :  { %v1984_v4 = vshrl.u32 %v80_v0, 7  ;;  %1716 = vmatpush3.msk.msra.mxu0 %vm1176_vm0, %v1171_v1  ;;  %1723 = vmatprep.mubr.msk.f32.mxu0 %vm1877_vm2, %v3249_v2  ;;  %v1253_v8 = vld [vmem:[%s3240_s8 + $0x10] sm:$0xff]  ;;  %v1168_v15 = vld [vmem:[%s3239_s7] sm:$0xff]  ;;  %v1252_v22 = vld [vmem:[%s3240_s8 + $0x8] sm:$0xff]  ;;  %vm1255_vm4 = vcmask 252928   ;;  %vm1339_vm5 = vcmask 285696  }
  0x20   :  { %1717 = vmatprep.subr.mxu0 %v3249_v2  ;;  %1727 = vmatpush3.msk.msra.mxu1 %vm1259_vm1, %v1254_v5  ;;  %v1167_v16 = vld [vmem:[%s3236_s4] sm:$0xff]  ;;  %v1337_v23 = vld [vmem:[%s3241_s9 + $0x18] sm:$0xff]  ;;  %v1336_v28 = vld [vmem:[%s3241_s9 + $0x10] sm:$0xff]  ;;  %v81_v59 = vand.u32 127, %v80_v0  ;;  %s3002_s26 = sld [smem:[#allocation3 + $0x1]] }
  0x21   :  { %v2005_v9 = vsub.s32 2, %v1984_v4  ;;  %v2008_v10 = vsub.s32 0, %v1984_v4  ;;  %v2011_v11 = vsub.s32 3, %v1984_v4  ;;  %v2014_v12 = vsub.s32 1, %v1984_v4  ;;  %1718 = vmatpush3.msra.mxu0 %v1170_v3  ;;  %1728 = vmatprep.subr.mxu1 %v3249_v2  ;;  %v1338_v21 = vld [vmem:[%s3241_s9 + $0x20] sm:$0x7] }
  0x22   :  { %1719 = vmatprep.subr.mxu0 %v3249_v2  ;;  %1729 = vmatpush3.msra.mxu1 %v1253_v8  ;;  %v2034_v19 = vsub.s32 5, %v1984_v4  ;;  %v2037_v20 = vsub.s32 4, %v1984_v4  ;;  %v1251_v26 = vld [vmem:[%s3240_s8] sm:$0xff]  ;;  %v128_v32 = vsub.s32 6, %v1984_v4  ;;  %v1335_v33 = vld [vmem:[%s3241_s9 + $0x8] sm:$0xff]  ;;  %v135_v37 = vsub.s32 7, %v1984_v4 }
  0x23   :  { %v101_v13 = vrot.slane %v1995_v6, %v2005_v9  ;;  %v87_v14 = vrot.slane %v1995_v6, %v2008_v10  ;;  %1720 = vmatpush3.msra.mxu0 %v1169_v7  ;;  %v108_v17 = vrot.slane %v1995_v6, %v2011_v11  ;;  %v94_v18 = vrot.slane %v1995_v6, %v2014_v12  ;;  %v156_v27 = vld [vmem:[%s3234_s2] sm:$0xff]  ;;  %s3015_s27 = sld [smem:[#allocation5]] }
  0x24   :  { %1721 = vmatprep.subr.mxu0 %v3249_v2  ;;  %1730 = vmatprep.subr.mxu1 %v3249_v2  ;;  %v122_v24 = vrot.slane %v1995_v6, %v2034_v19  ;;  %v115_v25 = vrot.slane %v1995_v6, %v2037_v20  ;;  %v1250_v29 = vld [vmem:[%s3237_s5] sm:$0xff]  ;;  %v167_v30 = vrot.slane %v156_v27, %v2014_v12  ;;  %v2108_v61 = vcvt.s32.f32 %v81_v59  ;;  %s3018_s28 = sld [smem:[#allocation5 + $0x1]] }
  0x25   :  { %103 = vbcast.lane.b32.xlu1 %v101_v13, 256  ;;  %89 = vbcast.lane.b32.xlu0 %v87_v14, 256  ;;  %v160_v31 = vrot.slane %v156_v27, %v2008_v10  ;;  %v1334_v34 = vld [vmem:[%s3241_s9] sm:$0xff]  ;;  %v174_v35 = vrot.slane %v156_v27, %v2005_v9  ;;  %v129_v36 = vrot.slane %v1995_v6, %v128_v32  ;;  %s3030_s7 = sld [smem:[#allocation3 + $0x2]] }
  0x26   :  { %1722 = vmatpush3.msra.mxu0 %v1168_v15  ;;  %1731 = vmatpush3.msra.mxu1 %v1252_v22  ;;  %v1333_v38 = vld [vmem:[%s3238_s6] sm:$0xff]  ;;  %v181_v39 = vrot.slane %v156_v27, %v2011_v11  ;;  %v136_v40 = vrot.slane %v1995_v6, %v135_v37  ;;  %v195_v41 = vrot.slane %v156_v27, %v2034_v19  ;;  %s3326_s13 = sld [smem:[#allocation19_spill]] }
  0x27   :  { %1737 = vmatprep.subr.mxu0 %v3249_v2  ;;  %1724 = vmatmul.mubr.msk.f32.vlgmr.msra.gmra.mxu0 %vm1172_vm3, %v1167_v16  ;;  %v188_v42 = vrot.slane %v156_v27, %v2037_v20  ;;  %v209_v43 = vrot.slane %v156_v27, %v135_v37  ;;  %v202_v44 = vrot.slane %v156_v27, %v128_v32  ;;  %v221_v45 = vld [vmem:[%s3233_s1] sm:$0xff]  ;;  %s2998_s1 = sld [smem:[#allocation3]] }
  0x28   :  { %1738 = vmatpush3.msk.msra.mxu0 %vm1176_vm0, %v1338_v21  ;;  %1732 = vmatprep.subr.mxu1 %v3249_v2  ;;  %v232_v46 = vrot.slane %v221_v45, %v2014_v12  ;;  %v225_v47 = vrot.slane %v221_v45, %v2008_v10  ;;  %v239_v48 = vrot.slane %v221_v45, %v2005_v9  ;;  %s3065_s14 = sld [smem:[#allocation5 + $0x2]] }
  0x29   :  { %110 = vbcast.lane.b32.xlu1 %v108_v17, 256  ;;  %96 = vbcast.lane.b32.xlu0 %v94_v18, 256  ;;  %v246_v49 = vrot.slane %v221_v45, %v2011_v11  ;;  %v260_v50 = vrot.slane %v221_v45, %v2034_v19  ;;  %v253_v51 = vrot.slane %v221_v45, %v2037_v20 }
  0x2a   :  { %1739 = vmatprep.subr.mxu0 %v3249_v2  ;;  %1733 = vmatpush3.msra.mxu1 %v1251_v26  ;;  %v274_v52 = vrot.slane %v221_v45, %v135_v37  ;;  %v267_v53 = vrot.slane %v221_v45, %v128_v32  ;;  %v3260_v45 = vmov 2475754826  }
  0x2b   :  { %1740 = vmatpush3.msra.mxu0 %v1337_v23  ;;  %1734 = vmatprep.mubr.msk.f32.mxu1 %vm1877_vm2, %v3249_v2 }
  0x2c   :  { %1741 = vmatprep.subr.mxu0 %v3249_v2  ;;  %1735 = vmatmul.mubr.msk.f32.vlgmr.msra.gmra.mxu1 %vm1255_vm4, %v1250_v29 }
  0x2d   :  { %124 = vbcast.lane.b32.xlu1 %v122_v24, 256  ;;  %117 = vbcast.lane.b32.xlu0 %v115_v25, 256 }
  0x2e   :  { %1742 = vmatpush3.msra.mxu0 %v1336_v28  ;;  %1747 = vmatprep.mubr.msk.f32.mxu0 %vm1877_vm2, %v3249_v2 }
  0x2f   :  { %1743 = vmatprep.subr.mxu0 %v3249_v2  ;;  %1750 = vmatprep.subr.mxu1 %v3249_v2 }
  0x30   :  { %1744 = vmatpush3.msra.mxu0 %v1335_v33  ;;  %1752 = vmatprep.mubr.msk.f32.mxu1 %vm1877_vm2, %v3249_v2 }
  0x31   :  { %169 = vbcast.lane.b32.xlu1 %v167_v30, 256  ;;  %162 = vbcast.lane.b32.xlu0 %v160_v31, 256  ;;  %v1878_v31 = vmov 920167782  }
  0x32   :  { %1745 = vmatprep.subr.mxu0 %v3249_v2 }
  0x33   :  { %1746 = vmatpush3.msra.mxu0 %v1334_v34 }
  0x34   :  { %1748 = vmatmul.mubr.msk.f32.vlgmr.msra.gmra.mxu0 %vm1339_vm5, %v1333_v38  ;;  %v3269_v38 = vmov 2102212464  }
  0x35   :  { %176 = vbcast.lane.b32.xlu1 %v174_v35, 256  ;;  %131 = vbcast.lane.b32.xlu0 %v129_v36, 256 }
  0x39   :  { %183 = vbcast.lane.b32.xlu1 %v181_v39, 256  ;;  %138 = vbcast.lane.b32.xlu0 %v136_v40, 256  ;;  %v3262_v40 = vmov 1326507024  }
  0x3d   :  { %197 = vbcast.lane.b32.xlu1 %v195_v41, 256  ;;  %190 = vbcast.lane.b32.xlu0 %v188_v42, 256 }
  0x41   :  { %211 = vbcast.lane.b32.xlu1 %v209_v43, 256  ;;  %204 = vbcast.lane.b32.xlu0 %v202_v44, 256 }
  0x45   :  { %234 = vbcast.lane.b32.xlu1 %v232_v46, 256  ;;  %227 = vbcast.lane.b32.xlu0 %v225_v47, 256  ;;  %v3258_v47 = vmov 2131351028  }
  0x49   :  { %241 = vbcast.lane.b32.xlu0 %v239_v48, 256  ;;  %248 = vbcast.lane.b32.xlu1 %v246_v49, 256 }
  0x4d   :  { %262 = vbcast.lane.b32.xlu1 %v260_v50, 256  ;;  %255 = vbcast.lane.b32.xlu0 %v253_v51, 256 }
  0x51   :  { %276 = vbcast.lane.b32.xlu1 %v274_v52, 256  ;;  %269 = vbcast.lane.b32.xlu0 %v267_v53, 256 }
  0x97   :  { %v104_v54 = vpop.permute.xlu1 %103  ;;  %v90_v55 = vpop.permute.xlu0 %89 }
  0x98   :  { %v140_v5 = vmul.f32 6.2831855, %v90_v55  ;;  %v142_v0 = vmul.f32 6.2831855, %v104_v54  ;;  %v3256_v55 = vmov 683565275  }
  0x9a   :  { %v148_v8 = vmul.f32 %v140_v5, %v2108_v61  ;;  %v150_v15 = vmul.f32 %v142_v0, %v2108_v61 }
  0x9b   :  { %v111_v56 = vpop.permute.xlu1 %110  ;;  %v97_v57 = vpop.permute.xlu0 %96 }
  0x9c   :  { %v141_v60 = vmul.f32 6.2831855, %v97_v57  ;;  %v143_v23 = vmul.f32 6.2831855, %v111_v56 }
  0x9e   :  { %v149_v63 = vmul.f32 %v141_v60, %v2108_v61  ;;  %v151_v34 = vmul.f32 %v143_v23, %v2108_v61 }
  0x9f   :  { %v125_v58 = vpop.permute.xlu1 %124  ;;  %v118_v3 = vpop.permute.xlu0 %117 }
  0xa0   :  { %v145_v30 = vmul.f32 6.2831855, %v125_v58  ;;  %v144_v35 = vmul.f32 6.2831855, %v118_v3 }
  0xa2   :  { %v152_v3 = vmul.f32 %v144_v35, %v2108_v61 }
  0xa3   :  { %v170_v62 = vpop.permute.xlu1 %169  ;;  %v163_v7 = vpop.permute.xlu0 %162 }
  0xa4   :  { %v2111_v1 = vadd.f32 %v170_v62, %v149_v63  ;;  %v2115_v10 = vadd.f32 %v163_v7, %v148_v8  ;;  %v153_v63 = vmul.f32 %v145_v30, %v2108_v61 }
  0xa6   :  { %v384_v4 = vand.u32 2139095040, %v2111_v1  ;;  %v281_v12 = vand.u32 2139095040, %v2115_v10  ;;  %v3255_v22 = vand.u32 2147483647, %v2111_v1  ;;  %v3254_v29 = vand.u32 2147483647, %v2115_v10 }
  0xa7   :  { %v177_v13 = vpop.permute.xlu1 %176  ;;  %v132_v26 = vpop.permute.xlu0 %131 }
  0xa8   :  { %v385_v6 = vshrl.u32 %v384_v4, 23  ;;  %v282_v14 = vshrl.u32 %v281_v12, 23  ;;  %v2119_v16 = vadd.f32 %v177_v13, %v150_v15  ;;  %v388_v27 = vand.u32 8388607, %v3255_v22 }
  0xa9   :  { %v146_v37 = vmul.f32 6.2831855, %v132_v26  ;;  %v2144_v49 = vand.u32 8388607, %v3254_v29 }
  0xaa   :  { %v1652_v9 = vadd.s32 4294967169, %v385_v6  ;;  %v1648_v18 = vadd.s32 4294967169, %v282_v14  ;;  %v487_v20 = vand.u32 2139095040, %v2119_v16  ;;  %v389_v43 = vor.u32 8388608, %v388_v27 }
  0xab   :  { %v184_v28 = vpop.permute.xlu1 %183  ;;  %v139_v54 = vpop.permute.xlu0 %138  ;;  %v286_v13 = vor.u32 8388608, %v2144_v49  ;;  %v3253_v14 = vand.u32 2147483647, %v2119_v16 }
  0xac   :  { %v391_v11 = vadd.s32 1, %v1652_v9  ;;  %v288_v21 = vadd.s32 1, %v1648_v18  ;;  %v488_v25 = vshrl.u32 %v487_v20, 23  ;;  %v2134_v42 = vadd.f32 %v184_v28, %v151_v34 }
  0xad   :  { %v147_v9 = vmul.f32 6.2831855, %v139_v54  ;;  %v2167_v12 = vshll.u32 %v389_v43, 8 }
  0xae   :  { %vm392_vm6 = vcmp.gt.s32.totalorder %v391_v11, 0  ;;  %vm289_vm7 = vcmp.gt.s32.totalorder %v288_v21, 0  ;;  %v1656_v33 = vadd.s32 4294967169, %v488_v25  ;;  %3283 = vst [vmem:[#allocation9_spill] sm:$0xff] %v2134_v42  ;;  %v590_v62 = vand.u32 2139095040, %v2134_v42 }
  0xaf   :  { %v393_v17 = vsel %vm392_vm6, %v391_v11, 0  ;;  %v290_v36 = vsel %vm289_vm7, %v288_v21, 0  ;;  %v198_v0 = vpop.permute.xlu1 %197  ;;  %v2165_v11 = vmul.f32 %v146_v37, %v2108_v61  ;;  %v2190_v27 = vmul.f32 %v147_v9, %v2108_v61 }
  0xb0   :  { %v395_v19 = vand.u32 31, %v393_v17  ;;  %v2136_v44 = vshrl.u32 %v393_v17, 5  ;;  %v292_v52 = vand.u32 31, %v290_v36  ;;  %v494_v53 = vadd.s32 1, %v1656_v33 }
  0xb1   :  { %v591_v17 = vshrl.u32 %v590_v62, 23  ;;  %v2183_v23 = vshrl.u32 %v290_v36, 5 }
  0xb2   :  { %v2123_v24 = vsub.s32 32, %v395_v19  ;;  %v407_v39 = vshll.u32 %v3269_v38, %v395_v19  ;;  %v410_v51 = vshll.u32 %v1878_v31, %v395_v19  ;;  %v398_v56 = vshll.u32 %v3256_v55, %v395_v19 }
  0xb3   :  { %v401_v57 = vshll.u32 %v3260_v45, %v395_v19  ;;  %v404_v58 = vshll.u32 %v3258_v47, %v395_v19  ;;  %vm416_vm8 = vcmp.lt.s32.totalorder %v2136_v44, 4  ;;  %v2162_v8 = vsub.s32 32, %v292_v52 }
  0xb4   :  { %v408_v32 = vshrl.u32 %v1878_v31, %v2123_v24  ;;  %v411_v41 = vshrl.u32 %v3262_v40, %v2123_v24  ;;  %v399_v46 = vshrl.u32 %v3260_v45, %v2123_v24  ;;  %v402_v48 = vshrl.u32 %v3258_v47, %v2123_v24 }
  0xb5   :  { %v405_v59 = vshrl.u32 %v3269_v38, %v2123_v24  ;;  %vm495_vm9 = vcmp.gt.s32.totalorder %v494_v53, 0  ;;  %vm413_vm10 = vcmp.lt.s32.totalorder %v2136_v44, 1  ;;  %vm415_vm11 = vcmp.lt.s32.totalorder %v2136_v44, 3 }
  0xb6   :  { %v409_v50 = vor.u32 %v408_v32, %v407_v39  ;;  %v412_v60 = vor.u32 %v411_v41, %v410_v51  ;;  %v2156_v4 = vor.u32 %v399_v46, %v398_v56  ;;  %v2158_v5 = vor.u32 %v402_v48, %v401_v57 }
  0xb7   :  { %v406_v6 = vor.u32 %v405_v59, %v404_v58  ;;  %v496_v18 = vsel %vm495_vm9, %v494_v53, 0  ;;  %v2175_v19 = vadd.f32 %v198_v0, %v153_v63  ;;  %v305_v25 = vshrl.u32 %v1878_v31, %v2162_v8 }
  0xb8   :  { %v422_v7 = vsel %vm416_vm8, %v409_v50, 920167782  ;;  %v426_v15 = vsel %vm416_vm8, %v412_v60, 1326507024  ;;  %v421_v20 = vsel %vm413_vm10, %v2156_v4, %v2158_v5  ;;  %v308_v26 = vshrl.u32 %v3262_v40, %v2162_v8 }
  0xb9   :  { %3284 = vst [vmem:[#allocation10_spill] sm:$0xff] %v2175_v19  ;;  %v423_v21 = vsel %vm415_vm11, %v406_v6, %v422_v7  ;;  %v304_v28 = vshll.u32 %v3269_v38, %v292_v52  ;;  %vm414_vm12 = vcmp.lt.s32.totalorder %v2136_v44, 2  ;;  %v425_v30 = vsel %vm413_vm10, %v2158_v5, %v406_v6 }
  0xba   :  { %v427_v32 = vsel %vm415_vm11, %v409_v50, %v426_v15  ;;  %v307_v33 = vshll.u32 %v1878_v31, %v292_v52  ;;  %v498_v34 = vand.u32 31, %v496_v18  ;;  %v424_v35 = vsel %vm414_vm12, %v421_v20, %v423_v21  ;;  %v191_v50 = vpop.permute.xlu0 %190 }
  0xbb   :  { %v296_v61 = vshrl.u32 %v3260_v45, %v2162_v8  ;;  %v1660_v36 = vadd.s32 4294967169, %v591_v17  ;;  %v796_v37 = vand.u32 2139095040, %v2175_v19  ;;  %v299_v39 = vshrl.u32 %v3258_v47, %v2162_v8 }
  0xbc   :  { %v302_v41 = vshrl.u32 %v3269_v38, %v2162_v8  ;;  %v306_v43 = vor.u32 %v305_v25, %v304_v28  ;;  %v309_v46 = vor.u32 %v308_v26, %v307_v33  ;;  %v428_v48 = vsel %vm414_vm12, %v425_v30, %v427_v32 }
  0xbd   :  { %v295_v49 = vshll.u32 %v3256_v55, %v292_v52  ;;  %v2213_v51 = vmul.u32.u64.low %v2167_v12, %v424_v35  ;;  %v2214_v53 = vmul.u32.u64.high %v2167_v12, %v424_v35, %v2213_v51  ;;  %v298_v54 = vshll.u32 %v3260_v45, %v292_v52 }
  0xbe   :  { %v301_v56 = vshll.u32 %v3258_v47, %v292_v52  ;;  %vm313_vm13 = vcmp.lt.s32.totalorder %v2183_v23, 4  ;;  %v2220_v57 = vsub.s32 32, %v498_v34  ;;  %v2224_v59 = vshll.u32 %v286_v13, 8 }
  0xbf   :  { %v2222_v58 = vor.u32 %v296_v61, %v295_v49  ;;  %v2227_v60 = vmul.u32.u64.low %v2167_v12, %v428_v48  ;;  %v2228_v62 = vmul.u32.u64.high %v2167_v12, %v428_v48, %v2227_v60  ;;  %v2230_v63 = vor.u32 %v299_v39, %v298_v54 }
  0xc0   :  { %v303_v7 = vor.u32 %v302_v41, %v301_v56  ;;  %v319_v9 = vsel %vm313_vm13, %v306_v43, 920167782  ;;  %v2234_v0 = vshrl.u32 %v496_v18, 5  ;;  %v597_v52 = vadd.s32 1, %v1660_v36  ;;  %v212_v60 = vpop.permute.xlu1 %211 }
  0xc1   :  { %v2236_v15 = vadd.f32 %v191_v50, %v152_v3  ;;  %v323_v17 = vsel %vm313_vm13, %v309_v46, 1326507024  ;;  %v510_v13 = vshll.u32 %v3269_v38, %v498_v34  ;;  %v797_v20 = vshrl.u32 %v796_v37, 23 }
  0xc2   :  { %v418_v21 = vsel %vm416_vm8, %v406_v6, 2102212464  ;;  %v513_v25 = vshll.u32 %v1878_v31, %v498_v34  ;;  %v397_v26 = vshrl.u32 %v3256_v55, %v2123_v24  ;;  %vm310_vm14 = vcmp.lt.s32.totalorder %v2183_v23, 1 }
  0xc3   :  { %vm312_vm15 = vcmp.lt.s32.totalorder %v2183_v23, 3  ;;  %v511_v3 = vshrl.u32 %v1878_v31, %v2220_v57  ;;  %v514_v18 = vshrl.u32 %v3262_v40, %v2220_v57  ;;  %v318_v6 = vsel %vm310_vm14, %v2222_v58, %v2230_v63 }
  0xc4   :  { %v320_v28 = vsel %vm312_vm15, %v303_v7, %v319_v9  ;;  %vm519_vm0 = vcmp.lt.s32.totalorder %v2234_v0, 4  ;;  %vm598_vm1 = vcmp.gt.s32.totalorder %v597_v52, 0  ;;  %v417_v24 = vsel %vm413_vm10, %v397_v26, %v2156_v4 }
  0xc5   :  { %v419_v30 = vsel %vm415_vm11, %v2158_v5, %v418_v21  ;;  %v439_v32 = vadd.s32 1, %v2214_v53  ;;  %vm311_vm3 = vcmp.lt.s32.totalorder %v2183_v23, 2  ;;  %v322_v33 = vsel %vm310_vm14, %v2230_v63, %v303_v7 }
  0xc6   :  { %v324_v35 = vsel %vm312_vm15, %v306_v43, %v323_v17  ;;  %v321_v61 = vsel %vm311_vm3, %v318_v6, %v320_v28  ;;  %v502_v4 = vshrl.u32 %v3260_v45, %v2220_v57  ;;  %v505_v5 = vshrl.u32 %v3258_v47, %v2220_v57  ;;  %v205_v28 = vpop.permute.xlu0 %204 }
  0xc7   :  { %v508_v36 = vshrl.u32 %v3269_v38, %v2220_v57  ;;  %v512_v37 = vor.u32 %v511_v3, %v510_v13  ;;  %v515_v39 = vor.u32 %v514_v18, %v513_v25  ;;  %v420_v41 = vsel %vm414_vm12, %v417_v24, %v419_v30 }
  0xc8   :  { %vm438_vm4 = vc.u32 %v2228_v62, %v2213_v51  ;;  %v325_v43 = vsel %vm311_vm3, %v322_v33, %v324_v35  ;;  %v501_v46 = vshll.u32 %v3256_v55, %v498_v34  ;;  %v504_v48 = vshll.u32 %v3260_v45, %v498_v34 }
  0xc9   :  { %v507_v49 = vshll.u32 %v3258_v47, %v498_v34  ;;  %v599_v50 = vsel %vm598_vm1, %v597_v52, 0  ;;  %v2291_v54 = vmul.u32.u64.low %v2224_v59, %v321_v61  ;;  %v2292_v56 = vmul.u32.u64.high %v2224_v59, %v321_v61, %v2291_v54 }
  0xca   :  { %v491_v44 = vand.u32 8388607, %v3253_v14  ;;  %v440_v9 = vsel %vm438_vm4, %v439_v32, %v2214_v53  ;;  %v2298_v17 = vor.u32 %v502_v4, %v501_v46  ;;  %v2300_v13 = vor.u32 %v505_v5, %v504_v48 }
  0xcb   :  { %v509_v21 = vor.u32 %v508_v36, %v507_v49  ;;  %v525_v34 = vsel %vm519_vm0, %v512_v37, 920167782  ;;  %v436_v52 = vmul.u32 %v2167_v12, %v420_v41  ;;  %v529_v3 = vsel %vm519_vm0, %v515_v39, 1326507024 }
  0xcc   :  { %v2306_v25 = vmul.u32.u64.low %v2224_v59, %v325_v43  ;;  %v2307_v26 = vmul.u32.u64.high %v2224_v59, %v325_v43, %v2306_v25  ;;  %v601_v18 = vand.u32 31, %v599_v50  ;;  %v1668_v6 = vadd.s32 4294967169, %v797_v20 }
  0xcd   :  { %v693_v53 = vand.u32 2139095040, %v2236_v15  ;;  %v2313_v24 = vadd.f32 %v212_v60, %v2190_v27  ;;  %v2315_v30 = vadd.s32 %v440_v9, %v436_v52  ;;  %vm516_vm5 = vcmp.lt.s32.totalorder %v2234_v0, 1 }
  0xce   :  { %vm518_vm6 = vcmp.lt.s32.totalorder %v2234_v0, 3  ;;  %v315_v12 = vsel %vm313_vm13, %v303_v7, 2102212464  ;;  %v492_v32 = vor.u32 8388608, %v491_v44  ;;  %v524_v20 = vsel %vm516_vm5, %v2298_v17, %v2300_v13 }
  0xcf   :  { %v526_v33 = vsel %vm518_vm6, %v509_v21, %v525_v34  ;;  %v2328_v27 = vadd.f32 %v205_v28, %v2165_v11  ;;  %v294_v35 = vshrl.u32 %v3256_v55, %v2162_v8  ;;  %v528_v61 = vsel %vm516_vm5, %v2300_v13, %v509_v21 }
  0xd0   :  { %v530_v7 = vsel %vm518_vm6, %v512_v37, %v529_v3  ;;  %v2337_v4 = vshrl.u32 %v599_v50, 5  ;;  %v2339_v5 = vsub.s32 32, %v601_v18  ;;  %vm517_vm7 = vcmp.lt.s32.totalorder %v2234_v0, 2 }
  0xd1   :  { %3285 = vst [vmem:[#allocation11_spill] sm:$0xff] %v2328_v27  ;;  %v442_v36 = vadd.s32 536870912, %v2315_v30  ;;  %v314_v11 = vsel %vm310_vm14, %v294_v35, %v2222_v58  ;;  %v316_v8 = vsel %vm312_vm15, %v2230_v63, %v315_v12  ;;  %v527_v39 = vsel %vm517_vm7, %v524_v20, %v526_v33 }
  0xd2   :  { %v803_v37 = vadd.s32 1, %v1668_v6  ;;  %v336_v41 = vadd.s32 1, %v2292_v56  ;;  %v531_v43 = vsel %vm517_vm7, %v528_v61, %v530_v7  ;;  %v2354_v46 = vshll.u32 %v492_v32, 8 }
  0xd3   :  { %v694_v48 = vshrl.u32 %v693_v53, 23  ;;  %v1002_v49 = vand.u32 2139095040, %v2313_v24  ;;  %v899_v58 = vand.u32 2139095040, %v2328_v27  ;;  %vm335_vm8 = vc.u32 %v2307_v26, %v2291_v54 }
  0xd4   :  { %v614_v63 = vshrl.u32 %v1878_v31, %v2339_v5  ;;  %v317_v50 = vsel %vm311_vm3, %v314_v11, %v316_v8  ;;  %v2365_v44 = vmul.u32.u64.low %v2354_v46, %v527_v39  ;;  %v2366_v60 = vmul.u32.u64.high %v2354_v46, %v527_v39, %v2365_v44 }
  0xd5   :  { %v617_v9 = vshrl.u32 %v3262_v40, %v2339_v5  ;;  %v2371_v34 = vshrl.u32 %v442_v36, 30  ;;  %v2374_v52 = vmul.u32.u64.low %v2354_v46, %v531_v43  ;;  %v2375_v25 = vmul.u32.u64.high %v2354_v46, %v531_v43, %v2374_v52 }
  0xd6   :  { %v613_v3 = vshll.u32 %v3269_v38, %v601_v18  ;;  %v616_v6 = vshll.u32 %v1878_v31, %v601_v18  ;;  %vm804_vm9 = vcmp.gt.s32.totalorder %v803_v37, 0  ;;  %v337_v23 = vsel %vm335_vm8, %v336_v41, %v2292_v56 }
  0xd7   :  { %v333_v53 = vmul.u32 %v2224_v59, %v317_v50  ;;  %v500_v28 = vshrl.u32 %v3256_v55, %v2220_v57  ;;  %v521_v12 = vsel %vm519_vm0, %v509_v21, 2102212464  ;;  %v3252_v32 = vand.u32 2147483647, %v2134_v42 }
  0xd8   :  { %v615_v20 = vor.u32 %v614_v63, %v613_v3  ;;  %v605_v33 = vshrl.u32 %v3260_v45, %v2339_v5  ;;  %v608_v35 = vshrl.u32 %v3258_v47, %v2339_v5  ;;  %v611_v56 = vshrl.u32 %v3269_v38, %v2339_v5 }
  0xd9   :  { %v618_v61 = vor.u32 %v617_v9, %v616_v6  ;;  %v444_v59 = vshll.u32 %v2371_v34, 30  ;;  %v338_v7 = vadd.s32 %v337_v23, %v333_v53  ;;  %v520_v57 = vsel %vm516_vm5, %v500_v28, %v2298_v17 }
  0xda   :  { %v522_v21 = vsel %vm518_vm6, %v2300_v13, %v521_v12  ;;  %v604_v36 = vshll.u32 %v3256_v55, %v601_v18  ;;  %v607_v11 = vshll.u32 %v3260_v45, %v601_v18  ;;  %v610_v8 = vshll.u32 %v3258_v47, %v601_v18 }
  0xdb   :  { %vm622_vm10 = vcmp.lt.s32.totalorder %v2337_v4, 4  ;;  %v805_v39 = vsel %vm804_vm9, %v803_v37, 0  ;;  %v1664_v41 = vadd.s32 4294967169, %v694_v48  ;;  %v594_v43 = vand.u32 8388607, %v3252_v32 }
  0xdc   :  { %v542_v17 = vadd.s32 1, %v2366_v60  ;;  %v606_v63 = vor.u32 %v605_v33, %v604_v36  ;;  %v609_v50 = vor.u32 %v608_v35, %v607_v11  ;;  %v612_v9 = vor.u32 %v611_v56, %v610_v8 }
  0xdd   :  { %v628_v13 = vsel %vm622_vm10, %v615_v20, 920167782  ;;  %v339_v52 = vadd.s32 536870912, %v338_v7  ;;  %v523_v18 = vsel %vm517_vm7, %v520_v57, %v522_v21  ;;  %vm541_vm11 = vc.u32 %v2375_v25, %v2365_v44 }
  0xde   :  { %v632_v37 = vsel %vm622_vm10, %v618_v61, 1326507024  ;;  %v2415_v48 = vand.u32 31, %v805_v39  ;;  %v1003_v3 = vshrl.u32 %v1002_v49, 23  ;;  %v2418_v6 = vsub.s32 %v2315_v30, %v444_v59 }
  0xdf   :  { %v700_v23 = vadd.s32 1, %v1664_v41  ;;  %v595_v53 = vor.u32 8388608, %v594_v43  ;;  %vm619_vm12 = vcmp.lt.s32.totalorder %v2337_v4, 1  ;;  %vm621_vm13 = vcmp.lt.s32.totalorder %v2337_v4, 3 }
  0xe0   :  { %v539_v0 = vmul.u32 %v2354_v46, %v523_v18  ;;  %v543_v28 = vsel %vm541_vm11, %v542_v17, %v2366_v60  ;;  %v627_v12 = vsel %vm619_vm12, %v606_v63, %v609_v50  ;;  %v629_v33 = vsel %vm621_vm13, %v612_v9, %v628_v13 }
  0xe1   :  { %v2428_v49 = vshrl.u32 %v339_v52, 30  ;;  %vm620_vm14 = vcmp.lt.s32.totalorder %v2337_v4, 2  ;;  %v631_v30 = vsel %vm619_vm12, %v609_v50, %v612_v9  ;;  %v633_v35 = vsel %vm621_vm13, %v615_v20, %v632_v37 }
  0xe2   :  { %v2436_v46 = vsub.s32 32, %v2415_v48  ;;  %v447_v60 = vsub.s32 0, %v2418_v6  ;;  %v634_v56 = vsel %vm620_vm14, %v631_v30, %v633_v35  ;;  %v2441_v61 = vadd.s32 %v543_v28, %v539_v0 }
  0xe3   :  { %v624_v59 = vsel %vm622_vm10, %v612_v9, 2102212464  ;;  %v630_v57 = vsel %vm620_vm14, %v627_v12, %v629_v33  ;;  %v635_v21 = vshll.u32 %v595_v53, 8  ;;  %v2447_v36 = vshrl.u32 %v805_v39, 5 }
  0xe4   :  { %v1676_v20 = vadd.s32 4294967169, %v1003_v3  ;;  %v900_v11 = vshrl.u32 %v899_v58, 23  ;;  %v603_v8 = vshrl.u32 %v3256_v55, %v2339_v5  ;;  %vm701_vm15 = vcmp.gt.s32.totalorder %v700_v23, 0 }
  0xe5   :  { %v341_v41 = vshll.u32 %v2428_v49, 30  ;;  %v2454_v43 = vmul.u32.u64.low %v635_v21, %v634_v56  ;;  %v2455_v17 = vmul.u32.u64.high %v635_v21, %v634_v56, %v2454_v43  ;;  %v625_v39 = vsel %vm621_vm13, %v609_v50, %v624_v59 }
  0xe6   :  { %v623_v9 = vsel %vm619_vm12, %v603_v8, %v606_v63  ;;  %v2461_v13 = vmul.u32.u64.low %v635_v21, %v630_v57  ;;  %v2462_v52 = vmul.u32.u64.high %v635_v21, %v630_v57, %v2461_v13  ;;  %v820_v58 = vshrl.u32 %v1878_v31, %v2436_v46 }
  0xe7   :  { %v823_v5 = vshrl.u32 %v3262_v40, %v2436_v46  ;;  %v1653_v18 = vmin.u32 %v447_v60, %v2418_v6  ;;  %v545_v37 = vadd.s32 536870912, %v2441_v61  ;;  %v819_v63 = vshll.u32 %v3269_v38, %v2415_v48 }
  0xe8   :  { %v822_v50 = vshll.u32 %v1878_v31, %v2415_v48  ;;  %v1009_v3 = vadd.s32 1, %v1676_v20  ;;  %v2475_v53 = vsub.s32 %v338_v7, %v341_v41  ;;  %v626_v0 = vsel %vm620_vm14, %v623_v9, %v625_v39 }
  0xe9   :  { %vm644_vm0 = vc.u32 %v2455_v17, %v2461_v13  ;;  %v3251_v28 = vand.u32 2147483647, %v2175_v19  ;;  %vm828_vm1 = vcmp.lt.s32.totalorder %v2447_v36, 4  ;;  %v702_v12 = vsel %vm701_vm15, %v700_v23, 0  ;;  %v2673_v19 = vpop.f32.mrf.mxu0 }
  0xea   :  { %v1672_v33 = vadd.s32 4294967169, %v900_v11  ;;  %v645_v30 = vadd.s32 1, %v2462_v52  ;;  %v821_v35 = vor.u32 %v820_v58, %v819_v63  ;;  %v824_v60 = vor.u32 %v823_v5, %v822_v50 }
  0xeb   :  { %v449_v56 = vclz %v1653_v18  ;;  %v2485_v7 = vshrl.u32 %v545_v37, 30  ;;  %v642_v59 = vmul.u32 %v635_v21, %v626_v0  ;;  %v813_v57 = vshll.u32 %v3260_v45, %v2415_v48 }
  0xec   :  { %v646_v4 = vsel %vm644_vm0, %v645_v30, %v2462_v52  ;;  %v814_v20 = vshrl.u32 %v3258_v47, %v2436_v46  ;;  %vm1010_vm3 = vcmp.gt.s32.totalorder %v1009_v3, 0  ;;  %v344_v23 = vsub.s32 0, %v2475_v53 }
  0xed   :  { %v800_v11 = vand.u32 8388607, %v3251_v28  ;;  %v811_v8 = vshrl.u32 %v3260_v45, %v2436_v46  ;;  %v2497_v41 = vadd.s32 %v646_v4, %v642_v59  ;;  %v816_v43 = vshll.u32 %v3258_v47, %v2415_v48 }
  0xee   :  { %v815_v21 = vor.u32 %v814_v20, %v813_v57  ;;  %v817_v9 = vshrl.u32 %v3269_v38, %v2436_v46  ;;  %v838_v39 = vsel %vm828_vm1, %v824_v60, 1326507024  ;;  %v1654_v52 = vadd.s32 4294967294, %v449_v56 }
  0xef   :  { %v547_v58 = vshll.u32 %v2485_v7, 30  ;;  %v810_v5 = vshll.u32 %v3256_v55, %v2415_v48  ;;  %v834_v18 = vsel %vm828_vm1, %v821_v35, 920167782  ;;  %v1011_v37 = vsel %vm1010_vm3, %v1009_v3, 0 }
  0xf0   :  { %v906_v63 = vadd.s32 1, %v1672_v33  ;;  %v818_v50 = vor.u32 %v817_v9, %v816_v43  ;;  %v1649_v0 = vmin.u32 %v344_v23, %v2475_v53  ;;  %vm825_vm4 = vcmp.lt.s32.totalorder %v2447_v36, 1 }
  0xf1   :  { %v812_v30 = vor.u32 %v811_v8, %v810_v5  ;;  %vm827_vm5 = vcmp.lt.s32.totalorder %v2447_v36, 3  ;;  %v648_v60 = vadd.s32 536870912, %v2497_v41  ;;  %v801_v56 = vor.u32 8388608, %v800_v11 }
  0xf2   :  { %v837_v59 = vsel %vm825_vm4, %v815_v21, %v818_v50  ;;  %v839_v48 = vsel %vm827_vm5, %v821_v35, %v838_v39  ;;  %v2518_v4 = vand.u32 31, %v702_v12  ;;  %vm1655_vm6 = vcmp.lt.s32.totalorder %v1654_v52, 0 }
  0xf3   :  { %v2521_v3 = vsub.s32 %v2441_v61, %v547_v58  ;;  %v2523_v33 = vshrl.u32 %v702_v12, 5  ;;  %vm907_vm7 = vcmp.gt.s32.totalorder %v906_v63, 0  ;;  %vm826_vm8 = vcmp.lt.s32.totalorder %v2447_v36, 2 }
  0xf4   :  { %v2526_v57 = vand.u32 31, %v1011_v37  ;;  %v833_v20 = vsel %vm825_vm4, %v812_v30, %v815_v21  ;;  %v835_v23 = vsel %vm827_vm5, %v818_v50, %v834_v18  ;;  %v840_v35 = vsel %vm826_vm8, %v837_v59, %v839_v48 }
  0xf5   :  { %v2534_v11 = vsel %vm1655_vm6, 0, %v1654_v52  ;;  %v346_v61 = vclz %v1649_v0  ;;  %v2536_v8 = vshrl.u32 %v648_v60, 30  ;;  %v841_v12 = vshll.u32 %v801_v56, 8 }
  0xf6   :  { %v2539_v43 = vsub.s32 32, %v2518_v4  ;;  %v908_v9 = vsel %vm907_vm7, %v906_v63, 0  ;;  %v550_v39 = vsub.s32 0, %v2521_v3  ;;  %v830_v58 = vsel %vm828_vm1, %v818_v50, 2102212464 }
  0xf7   :  { %3286 = vst [vmem:[#allocation12_spill] sm:$0xff] %v2536_v8  ;;  %v809_v5 = vshrl.u32 %v3256_v55, %v2436_v46  ;;  %v836_v52 = vsel %vm826_vm8, %v833_v20, %v835_v23  ;;  %v2548_v18 = vmul.u32.u64.low %v841_v12, %v840_v35  ;;  %v2549_v0 = vmul.u32.u64.high %v841_v12, %v840_v35, %v2548_v18 }
  0xf8   :  { %v716_v60 = vshll.u32 %v3269_v38, %v2518_v4  ;;  %v719_v63 = vshll.u32 %v1878_v31, %v2518_v4  ;;  %v2556_v56 = vsub.s32 32, %v2526_v57  ;;  %v457_v50 = vsub.s32 4294967266, %v2534_v11 }
  0xf9   :  { %3287 = vst [vmem:[#allocation13_spill] sm:$0xff] %v2549_v0  ;;  %v1650_v59 = vadd.s32 4294967294, %v346_v61  ;;  %v650_v46 = vshll.u32 %v2536_v8, 30  ;;  %v829_v48 = vsel %vm825_vm4, %v809_v5, %v812_v30  ;;  %v831_v20 = vsel %vm827_vm5, %v815_v21, %v830_v58 }
  0xfa   :  { %v717_v23 = vshrl.u32 %v1878_v31, %v2539_v43  ;;  %v2566_v35 = vand.u32 31, %v908_v9  ;;  %v2568_v18 = vmul.u32.u64.low %v841_v12, %v836_v52  ;;  %v2569_v2 = vmul.u32.u64.high %v841_v12, %v836_v52, %v2568_v18 }
  0xfb   :  { %v720_v61 = vshrl.u32 %v3262_v40, %v2539_v43  ;;  %vm725_vm9 = vcmp.lt.s32.totalorder %v2523_v33, 4  ;;  %v2575_v28 = vshrl.u32 %v1011_v37, 5  ;;  %v1657_v30 = vmin.u32 %v550_v39, %v2521_v3 }
  0xfc   :  { %3288 = vst [vmem:[#allocation14_spill] sm:$0xff] %v2566_v35  ;;  %3289 = vst [vmem:[#allocation15_spill] sm:$0xff] %v2568_v18  ;;  %v1025_v21 = vshll.u32 %v3269_v38, %v2526_v57  ;;  %v1026_v58 = vshrl.u32 %v1878_v31, %v2556_v56  ;;  %v1028_v5 = vshll.u32 %v1878_v31, %v2526_v57  ;;  %v458_v32 = vadd.s32 127, %v457_v50 }
  0xfd   :  { %v832_v52 = vsel %vm826_vm8, %v829_v48, %v831_v20  ;;  %vm1651_vm10 = vcmp.lt.s32.totalorder %v1650_v59, 0  ;;  %v2587_v14 = vsub.s32 %v2497_v41, %v650_v46  ;;  %vm850_vm11 = vc.u32 %v2549_v0, %v2568_v18 }
  0xfe   :  { %v2591_v37 = vor.u32 %v717_v23, %v716_v60  ;;  %v1029_v39 = vshrl.u32 %v3262_v40, %v2556_v56  ;;  %v2596_v29 = vsub.s32 32, %v2566_v35  ;;  %v851_v22 = vadd.s32 1, %v2569_v2 }
  0xff   :  { %v721_v36 = vor.u32 %v720_v61, %v719_v63  ;;  %v453_v50 = vsub.s32 32, %v2534_v11  ;;  %v552_v48 = vclz %v1657_v30  ;;  %v848_v20 = vmul.u32 %v841_v12, %v832_v52 }
 0x100   :  { %3290 = vst [vmem:[#allocation16_spill] sm:$0xff] %v2596_v29  ;;  %v2600_v41 = vor.u32 %v1026_v58, %v1025_v21  ;;  %v2602_v46 = vshrl.u32 %v908_v9, 5  ;;  %v2604_v55 = vsel %vm1651_vm10, 0, %v1650_v59  ;;  %v852_v60 = vsel %vm850_vm11, %v851_v22, %v2569_v2 }
 0x101   :  { %v437_v23 = vadd.s32 %v2213_v51, %v2228_v62  ;;  %v459_v47 = vshll.u32 %v458_v32, 23  ;;  %v653_v45 = vsub.s32 0, %v2587_v14  ;;  %v853_v40 = vadd.s32 %v852_v60, %v848_v20 }
 0x102   :  { %3291 = vst [vmem:[#allocation17_spill] sm:$0xff] %v2600_v41  ;;  %v2613_v63 = vsel %vm725_vm9, %v2591_v37, 920167782  ;;  %v1030_v12 = vor.u32 %v1029_v39, %v1028_v5  ;;  %vm1034_vm12 = vcmp.lt.s32.totalorder %v2575_v28, 4  ;;  %v923_v9 = vshrl.u32 %v1878_v31, %v2596_v29 }
 0x103   :  { %v455_v59 = vshrl.u32 %v437_v23, %v453_v50  ;;  %v354_v2 = vsub.s32 4294967266, %v2604_v55  ;;  %v1658_v22 = vadd.s32 4294967294, %v552_v48  ;;  %v854_v51 = vadd.s32 536870912, %v853_v40 }
 0x104   :  { %v2621_v62 = vsel %vm725_vm9, %v721_v36, 1326507024  ;;  %v2626_v32 = vsel %vm1034_vm12, %v2600_v41, 920167782  ;;  %v922_v61 = vshll.u32 %v3269_v38, %v2566_v35  ;;  %v2632_v30 = vshll.u32 %v1878_v31, %v2566_v35  ;;  %v1725_v41 = vpop.f32.mrf.mxu0 }
 0x105   :  { %vm931_vm13 = vcmp.lt.s32.totalorder %v2602_v46, 4  ;;  %vm383_vm14 = vcmp.lt.s32.totalorder %v2111_v1, 0  ;;  %v454_v21 = vshll.u32 %v2418_v6, %v2534_v11  ;;  %v460_v58 = vor.u32 4788187, %v459_v47 }
 0x106   :  { %v1661_v5 = vmin.u32 %v653_v45, %v2587_v14  ;;  %v2639_v52 = vshrl.u32 %v854_v51, 30  ;;  %v2643_v39 = vsel %vm1034_vm12, %v1030_v12, 1326507024  ;;  %v2645_v36 = vor.u32 %v923_v9, %v922_v61 }
 0x107   :  { %v3293_v31 = vmov 1326507024   ;;  %v334_v48 = vadd.s32 %v2291_v54, %v2307_v26  ;;  %v456_v20 = vor.u32 %v455_v59, %v454_v21  ;;  %v350_v47 = vsub.s32 32, %v2604_v55 }
 0x108   :  { %3292 = vst [vmem:[#allocation18_spill] sm:$0xff] %v2639_v52  ;;  %v2649_v50 = vshrl.u32 %v3293_v31, %v2596_v29  ;;  %v355_v6 = vadd.s32 127, %v354_v2  ;;  %vm1659_vm15 = vcmp.lt.s32.totalorder %v1658_v22, 0  ;;  %v467_v45 = vsub.s32 4, %v2371_v34 }
 0x109   :  { %v3294_v60 = vmov 2475754826   ;;  %v3295_v12 = vmov 2131351028   ;;  %v461_v51 = vand.u32 2147483647, %v460_v58  ;;  %v655_v61 = vclz %v1661_v5 }
 0x10a   :  { %v708_v23 = vshrl.u32 %v3294_v60, %v2539_v43  ;;  %v711_v9 = vshrl.u32 %v3295_v12, %v2539_v43  ;;  %v856_v31 = vshll.u32 %v2639_v52, 30  ;;  %v714_v54 = vshrl.u32 %v3269_v38, %v2539_v43  ;;  %v2675_v38 = vpop.f32.mrf.mxu1 }
 0x10b   :  { %v2663_v26 = vsel %vm1659_vm15, 0, %v1658_v22  ;;  %v3296_v59 = vmov 683565275   ;;  %v710_v21 = vshll.u32 %v3294_v60, %v2518_v4  ;;  %v713_v11 = vshll.u32 %v3295_v12, %v2518_v4 }
 0x10c   :  { %v707_v2 = vshll.u32 %v3296_v59, %v2518_v4  ;;  %v463_v8 = vcvt.s32.f32 %v456_v20  ;;  %v351_v58 = vshll.u32 %v2475_v53, %v2604_v55  ;;  %v352_v5 = vshrl.u32 %v334_v48, %v350_v47  ;;  %v1736_v55 = vpop.f32.mrf.mxu1 }
 0x10d   :  { %v356_v52 = vshll.u32 %v355_v6, 23  ;;  %v3297_v22 = vand.u32 2147483647, %v2236_v15  ;;  %v712_v29 = vor.u32 %v711_v9, %v710_v21  ;;  %v715_v27 = vor.u32 %v714_v54, %v713_v11 }
 0x10e   :  { %v709_v35 = vor.u32 %v708_v23, %v707_v2  ;;  %v464_v18 = vmul.f32 %v463_v8, %v461_v51  ;;  %v560_v0 = vsub.s32 4294967266, %v2663_v26  ;;  %v1662_v4 = vadd.s32 4294967294, %v655_v61  ;;  %v2704_v23 = vpop.f32.mrf.mxu0 }
 0x10f   :  { %v697_v42 = vand.u32 8388607, %v3297_v22  ;;  %v2680_v20 = vsub.s32 %v853_v40, %v856_v31  ;;  %v927_v53 = vor.u32 %v2649_v50, %v2632_v30  ;;  %v2687_v48 = vsel %vm931_vm13, %v2645_v36, 920167782 }
 0x110   :  { %v3298_v47 = vand.u32 2147483647, %v2111_v1  ;;  %v2698_v40 = vsel %vm383_vm14, %v467_v45, %v2371_v34  ;;  %v540_v8 = vadd.s32 %v2365_v44, %v2375_v25  ;;  %v353_v41 = vor.u32 %v352_v5, %v351_v58 }
 0x111   :  { %v357_v11 = vor.u32 4788187, %v356_v52  ;;  %vm722_vm1 = vcmp.lt.s32.totalorder %v2523_v33, 1  ;;  %vm724_vm3 = vcmp.lt.s32.totalorder %v2523_v33, 3  ;;  %v556_v9 = vsub.s32 32, %v2663_v26  ;;  %v1749_v52 = vpop.f32.mrf.mxu0 }
 0x112   :  { %vm2691_vm0 = vcmp.le.f32.partialorder %v3298_v47, 0.7853982  ;;  %v698_v51 = vor.u32 8388608, %v697_v42  ;;  %v730_v61 = vsel %vm722_vm1, %v709_v35, %v712_v29  ;;  %v732_v34 = vsel %vm724_vm3, %v715_v27, %v2613_v63 }
 0x113   :  { %v465_v45 = vxor.u32 2147483648, %v464_v18  ;;  %v561_v44 = vadd.s32 127, %v560_v0  ;;  %vm1663_vm4 = vcmp.lt.s32.totalorder %v1662_v4, 0  ;;  %v859_v25 = vsub.s32 0, %v2680_v20 }
 0x114   :  { %vm723_vm5 = vcmp.lt.s32.totalorder %v2523_v33, 2  ;;  %v727_v31 = vsel %vm725_vm9, %v715_v27, 2102212464  ;;  %v734_v42 = vsel %vm722_vm1, %v712_v29, %v715_v27  ;;  %v736_v54 = vsel %vm724_vm3, %v2591_v37, %v2621_v62 }
 0x115   :  { %v360_v63 = vcvt.s32.f32 %v353_v41  ;;  %v706_v0 = vshrl.u32 %v3296_v59, %v2539_v43  ;;  %v733_v2 = vsel %vm723_vm5, %v730_v61, %v732_v34  ;;  %v737_v21 = vsel %vm723_vm5, %v734_v42, %v736_v54 }
 0x116   :  { %vm280_vm6 = vcmp.lt.s32.totalorder %v2115_v10, 0  ;;  %v358_v58 = vand.u32 2147483647, %v357_v11  ;;  %v558_v5 = vshrl.u32 %v540_v8, %v556_v9  ;;  %v2729_v27 = vsel %vm1663_vm4, 0, %v1662_v4 }
 0x117   :  { %v738_v22 = vshll.u32 %v698_v51, 8  ;;  %v562_v55 = vshll.u32 %v561_v44, 23  ;;  %v1669_v37 = vmin.u32 %v859_v25, %v2680_v20  ;;  %v726_v62 = vsel %vm722_vm1, %v706_v0, %v709_v35 }
 0x118   :  { %v728_v43 = vsel %vm724_vm3, %v712_v29, %v727_v31  ;;  %vm486_vm7 = vcmp.lt.s32.totalorder %v2119_v16, 0  ;;  %v470_v4 = vsel %vm2691_vm0, 0, %v2698_v40  ;;  %v364_v8 = vsub.s32 4, %v2428_v49 }
 0x119   :  { %v2737_v47 = vmul.u32.u64.low %v738_v22, %v737_v21  ;;  %v2738_v41 = vmul.u32.u64.high %v738_v22, %v737_v21, %v2737_v47  ;;  %v2740_v61 = vmul.u32.u64.low %v738_v22, %v733_v2  ;;  %v2741_v11 = vmul.u32.u64.high %v738_v22, %v733_v2, %v2740_v61 }
 0x11a   :  { %v557_v35 = vshll.u32 %v2521_v3, %v2663_v26  ;;  %v663_v29 = vsub.s32 4294967266, %v2729_v27  ;;  %v466_v9 = vsel %vm383_vm14, %v465_v45, %v464_v18  ;;  %v361_v51 = vmul.f32 %v360_v63, %v358_v58 }
 0x11b   :  { %v570_v34 = vsub.s32 4, %v2485_v7  ;;  %v729_v44 = vsel %vm723_vm5, %v726_v62, %v728_v43  ;;  %v563_v52 = vor.u32 4788187, %v562_v55  ;;  %v659_v31 = vsub.s32 32, %v2729_v27 }
 0x11c   :  { %v559_v25 = vor.u32 %v558_v5, %v557_v35  ;;  %v861_v42 = vclz %v1669_v37  ;;  %vm747_vm8 = vc.u32 %v2738_v41, %v2740_v61  ;;  %v748_v3 = vadd.s32 1, %v2741_v11 }
 0x11d   :  { %v999_v26 = vand.u32 2147483647, %v2313_v24  ;;  %v1017_v18 = vshrl.u32 %v3294_v60, %v2556_v56  ;;  %v664_v45 = vadd.s32 127, %v663_v29  ;;  %v745_v54 = vmul.u32 %v738_v22, %v729_v44 }
 0x11e   :  { %v1016_v33 = vshll.u32 %v3296_v59, %v2526_v57  ;;  %v1019_v63 = vshll.u32 %v3294_v60, %v2526_v57  ;;  %v749_v0 = vsel %vm747_vm8, %v748_v3, %v2741_v11  ;;  %v1020_v2 = vshrl.u32 %v3295_v12, %v2556_v56 }
 0x11f   :  { %v1022_v21 = vshll.u32 %v3295_v12, %v2526_v57  ;;  %v3301_v58 = vmov 2102212464   ;;  %v2777_v22 = vsel %vm280_vm6, %v364_v8, %v2428_v49  ;;  %v643_v55 = vadd.s32 %v2461_v13, %v2455_v17 }
 0x120   :  { %v1023_v5 = vshrl.u32 %v3301_v58, %v2556_v56  ;;  %v1670_v37 = vadd.s32 4294967294, %v861_v42  ;;  %v750_v62 = vadd.s32 %v749_v0, %v745_v54  ;;  %v1006_v43 = vand.u32 8388607, %v999_v26 }
 0x121   :  { %v1018_v47 = vor.u32 %v1017_v18, %v1016_v33  ;;  %v1021_v11 = vor.u32 %v1020_v2, %v1019_v63  ;;  %v469_v57 = vsel %vm2691_vm0, %v2111_v1, %v466_v9  ;;  %v564_v29 = vand.u32 2147483647, %v563_v52 }
 0x122   :  { %v1024_v35 = vor.u32 %v1023_v5, %v1022_v21  ;;  %v2789_v49 = vsel %vm486_vm7, %v570_v34, %v2485_v7  ;;  %v751_v8 = vadd.s32 536870912, %v750_v62  ;;  %v3302_v17 = vand.u32 2147483647, %v2115_v10  ;;  %v3308_v21 = vld [vmem:[#allocation17_spill] sm:$0xff] }
 0x123   :  { %v362_v44 = vxor.u32 2147483648, %v361_v51  ;;  %v566_v42 = vcvt.s32.f32 %v559_v25  ;;  %v661_v3 = vshrl.u32 %v643_v55, %v659_v31  ;;  %v665_v18 = vshll.u32 %v664_v45, 23 }
 0x124   :  { %vm2793_vm9 = vcmp.le.f32.partialorder %v3302_v17, 0.7853982  ;;  %vm1671_vm10 = vcmp.lt.s32.totalorder %v1670_v37, 0  ;;  %v2797_v54 = vshrl.u32 %v751_v8, 30  ;;  %vm1031_vm11 = vcmp.lt.s32.totalorder %v2575_v28, 1 }
 0x125   :  { %vm1033_vm14 = vcmp.lt.s32.totalorder %v2575_v28, 3  ;;  %v3305_v7 = vand.u32 2147483647, %v2119_v16  ;;  %v1007_v34 = vor.u32 8388608, %v1006_v43  ;;  %v1039_v52 = vsel %vm1031_vm11, %v1018_v47, %v1021_v11 }
 0x126   :  { %v1041_v25 = vsel %vm1033_vm14, %v1024_v35, %v2626_v32  ;;  %v1043_v31 = vsel %vm1031_vm11, %v1021_v11, %v1024_v35  ;;  %1806 = vcosq.f32 %v469_v57  ;;  %v567_v45 = vmul.f32 %v566_v42, %v564_v29 }
 0x127   :  { %vm2803_vm15 = vcmp.le.f32.partialorder %v3305_v7, 0.7853982  ;;  %v660_v33 = vshll.u32 %v2587_v14, %v2729_v27  ;;  %v753_v63 = vshll.u32 %v2797_v54, 30  ;;  %v2817_v0 = vsel %vm1671_vm10, 0, %v1670_v37 }
 0x128   :  { %vm1032_vm1 = vcmp.lt.s32.totalorder %v2575_v28, 2  ;;  %v1036_v2 = vsel %vm1034_vm12, %v1024_v35, 2102212464  ;;  %v1045_v32 = vsel %vm1033_vm14, %v3308_v21, %v2643_v39  ;;  %v1015_v55 = vshrl.u32 %v3296_v59, %v2556_v56 }
 0x129   :  { %v2826_v5 = vsub.s32 %v750_v62, %v753_v63  ;;  %v1042_v14 = vsel %vm1032_vm1, %v1039_v52, %v1041_v25  ;;  %v1046_v27 = vsel %vm1032_vm1, %v1043_v31, %v1045_v32  ;;  %v363_v37 = vsel %vm280_vm6, %v362_v44, %v361_v51  ;;  %v3310_v63 = vld [vmem:[#allocation15_spill] sm:$0xff] }
 0x12a   :  { %v662_v43 = vor.u32 %v661_v3, %v660_v33  ;;  %v666_v35 = vor.u32 4788187, %v665_v18  ;;  %v1047_v29 = vshll.u32 %v1007_v34, 8  ;;  %v869_v8 = vsub.s32 4294967266, %v2817_v0  ;;  %v3309_v33 = vld [vmem:[#allocation13_spill] sm:$0xff]  ;;  %v3311_v32 = vld [vmem:[#allocation11_spill] sm:$0xff] }
 0x12b   :  { %v756_v39 = vsub.s32 0, %v2826_v5  ;;  %v1035_v62 = vsel %vm1031_vm11, %v1015_v55, %v1018_v47  ;;  %v1037_v56 = vsel %vm1033_vm14, %v1021_v11, %v1036_v2  ;;  %v2854_v51 = vsel %vm931_vm13, %v927_v53, 1326507024 }
 0x12c   :  { %v2842_v17 = vmul.u32.u64.low %v1047_v29, %v1046_v27  ;;  %v2843_v42 = vmul.u32.u64.high %v1047_v29, %v1046_v27, %v2842_v17  ;;  %v2845_v7 = vmul.u32.u64.low %v1047_v29, %v1042_v14  ;;  %v2846_v52 = vmul.u32.u64.high %v1047_v29, %v1042_v14, %v2845_v7 }
 0x12d   :  { %v366_v47 = vsel %vm2793_vm9, %v2115_v10, %v363_v37  ;;  %v568_v44 = vxor.u32 2147483648, %v567_v45  ;;  %v1665_v11 = vmin.u32 %v756_v39, %v2826_v5  ;;  %v2864_v3 = vand.u32 3, %v470_v4 }
 0x12e   :  { %v367_v30 = vsel %vm2793_vm9, 0, %v2777_v22  ;;  %v667_v50 = vand.u32 2147483647, %v666_v35  ;;  %v1038_v53 = vsel %vm1032_vm1, %v1035_v62, %v1037_v56  ;;  %1808 = vsinq.f32 %v469_v57  ;;  %v3318_v22 = vld [vmem:[#allocation10_spill] sm:$0xff] }
 0x12f   :  { %v573_v18 = vsel %vm2803_vm15, 0, %v2789_v49  ;;  %v870_v34 = vadd.s32 127, %v869_v8  ;;  %v758_v25 = vclz %v1665_v11  ;;  %1810 = vcosq.f32 %v366_v47 }
 0x130   :  { %v669_v6 = vcvt.s32.f32 %v662_v43  ;;  %vm1056_vm12 = vc.u32 %v2843_v42, %v2845_v7  ;;  %v1057_v40 = vadd.s32 1, %v2846_v52  ;;  %1812 = vsinq.f32 %v366_v47 }
 0x131   :  { %v569_v4 = vsel %vm486_vm7, %v568_v44, %v567_v45  ;;  %v1666_v28 = vadd.s32 4294967294, %v758_v25  ;;  %v1054_v31 = vmul.u32 %v1047_v29, %v1038_v53  ;;  %v849_v2 = vadd.s32 %v3310_v63, %v3309_v33  ;;  %v3312_v45 = vld [vmem:[#allocation16_spill] sm:$0xff] }
 0x132   :  { %v2879_v57 = vmul.f32 %v669_v6, %v667_v50  ;;  %v1058_v21 = vsel %vm1056_vm12, %v1057_v40, %v2846_v52  ;;  %v896_v55 = vand.u32 2147483647, %v3311_v32  ;;  %v865_v14 = vsub.s32 32, %v2817_v0  ;;  %v3313_v52 = vld [vmem:[#allocation14_spill] sm:$0xff] }
 0x133   :  { %v871_v27 = vshll.u32 %v870_v34, 23  ;;  %vm1667_vm0 = vcmp.lt.s32.totalorder %v1666_v28, 0  ;;  %v1059_v37 = vadd.s32 %v1058_v21, %v1054_v31  ;;  %v2886_v43 = vpop.eup %1806  ;;  %v914_v29 = vshrl.u32 %v3294_v60, %v3312_v45  ;;  %v3314_v21 = vld [vmem:[#allocation9_spill] sm:$0xff] }
 0x134   :  { %v761_v35 = vsel %vm1667_vm0, 0, %v1666_v28  ;;  %v917_v8 = vshrl.u32 %v3295_v12, %v3312_v45  ;;  %v920_v39 = vshrl.u32 %v3301_v58, %v3312_v45  ;;  %v746_v62 = vadd.s32 %v2740_v61, %v2738_v41 }
 0x135   :  { %v762_v56 = vsub.s32 32, %v761_v35  ;;  %v766_v17 = vsub.s32 4294967266, %v761_v35  ;;  %v913_v47 = vshll.u32 %v3296_v59, %v3313_v52  ;;  %v1060_v44 = vadd.s32 536870912, %v1059_v37 }
 0x136   :  { %v903_v11 = vand.u32 8388607, %v896_v55  ;;  %v916_v50 = vshll.u32 %v3294_v60, %v3313_v52  ;;  %v919_v53 = vshll.u32 %v3295_v12, %v3313_v52  ;;  %v480_v58 = vxor.u32 2147483648, %v2886_v43 }
 0x137   :  { %v867_v34 = vshrl.u32 %v849_v2, %v865_v14  ;;  %v764_v25 = vshrl.u32 %v746_v62, %v762_v56  ;;  %v767_v41 = vadd.s32 127, %v766_v17  ;;  %v2905_v61 = vshrl.u32 %v1060_v44, 30 }
 0x138   :  { %v915_v6 = vor.u32 %v914_v29, %v913_v47  ;;  %v918_v40 = vor.u32 %v917_v8, %v916_v50  ;;  %v921_v28 = vor.u32 %v920_v39, %v919_v53  ;;  %v572_v31 = vsel %vm2803_vm15, %v2119_v16, %v569_v4 }
 0x139   :  { %v872_v33 = vor.u32 4788187, %v871_v27  ;;  %v763_v60 = vshll.u32 %v2826_v5, %v761_v35  ;;  %v768_v63 = vshll.u32 %v767_v41, 23  ;;  %vm589_vm3 = vcmp.lt.s32.totalorder %v3314_v21, 0 }
 0x13a   :  { %v671_v12 = vxor.u32 2147483648, %v2879_v57  ;;  %v866_v2 = vshll.u32 %v2680_v20, %v2817_v0  ;;  %v1062_v14 = vshll.u32 %v2905_v61, 30  ;;  %v904_v29 = vor.u32 8388608, %v903_v11 }
 0x13b   :  { %v765_v8 = vor.u32 %v764_v25, %v763_v60  ;;  %v769_v39 = vor.u32 4788187, %v768_v63  ;;  %vm928_vm4 = vcmp.lt.s32.totalorder %v2602_v46, 1  ;;  %vm930_vm5 = vcmp.lt.s32.totalorder %v2602_v46, 3  ;;  %v1809_v4 = vpop.eup %1808 }
 0x13c   :  { %vm476_vm6 = vcmp.eq.s32.totalorder %v2864_v3, 0  ;;  %vm479_vm7 = vcmp.eq.s32.totalorder %v2864_v3, 2  ;;  %v868_v5 = vor.u32 %v867_v34, %v866_v2  ;;  %v2920_v27 = vsub.s32 %v1059_v37, %v1062_v14  ;;  %v2927_v35 = vpop.eup %1810 }
 0x13d   :  { %v936_v20 = vsel %vm928_vm4, %v915_v6, %v918_v40  ;;  %v938_v0 = vsel %vm930_vm5, %v921_v28, %v2687_v48  ;;  %v873_v62 = vand.u32 2147483647, %v872_v33  ;;  %v770_v56 = vand.u32 2147483647, %v769_v39  ;;  %v2932_v52 = vpop.eup %1812 }
 0x13e   :  { %v912_v17 = vshrl.u32 %v3296_v59, %v3312_v45  ;;  %vm929_vm8 = vcmp.lt.s32.totalorder %v2602_v46, 2  ;;  %v1065_v37 = vsub.s32 0, %v2920_v27  ;;  %v933_v47 = vsel %vm931_vm13, %v921_v28, 2102212464 }
 0x13f   :  { %v940_v44 = vsel %vm928_vm4, %v918_v40, %v921_v28  ;;  %v942_v48 = vsel %vm930_vm5, %v2645_v36, %v2854_v51  ;;  %v772_v11 = vcvt.s32.f32 %v765_v8  ;;  %v939_v59 = vsel %vm929_vm8, %v936_v20, %v938_v0 }
 0x140   :  { %v943_v45 = vsel %vm929_vm8, %v940_v44, %v942_v48  ;;  %v944_v50 = vshll.u32 %v904_v29, 8  ;;  %vm475_vm10 = vcmp.lt.s32.totalorder %v2864_v3, 2  ;;  %v477_v53 = vxor.u32 2147483648, %v1809_v4 }
 0x141   :  { %1814 = vcosq.f32 %v572_v31  ;;  %v875_v34 = vcvt.s32.f32 %v868_v5  ;;  %v1677_v25 = vmin.u32 %v1065_v37, %v2920_v27  ;;  %v773_v41 = vmul.f32 %v772_v11, %v770_v56 }
 0x142   :  { %v932_v28 = vsel %vm928_vm4, %v912_v17, %v915_v6  ;;  %v2951_v36 = vmul.u32.u64.low %v944_v50, %v943_v45  ;;  %v2952_v51 = vmul.u32.u64.high %v944_v50, %v943_v45, %v2951_v36  ;;  %v934_v60 = vsel %vm930_vm5, %v918_v40, %v933_v47 }
 0x143   :  { %v1067_v33 = vclz %v1677_v25  ;;  %v2956_v63 = vmul.u32.u64.low %v944_v50, %v939_v59  ;;  %v2957_v2 = vmul.u32.u64.high %v944_v50, %v939_v59, %v2956_v63  ;;  %v2964_v14 = vand.u32 3, %v367_v30 }
 0x144   :  { %v3315_v29 = vand.u32 2147483647, %v3314_v21  ;;  %v672_v40 = vsel %vm589_vm3, %v671_v12, %v2879_v57  ;;  %v876_v8 = vmul.f32 %v875_v34, %v873_v62  ;;  %1816 = vsinq.f32 %v572_v31 }
 0x145   :  { %v2979_v13 = vand.u32 3, %v573_v18  ;;  %vm795_vm9 = vcmp.lt.s32.totalorder %v3318_v22, 0  ;;  %v1678_v30 = vadd.s32 4294967294, %v1067_v33  ;;  %vm473_vm11 = vweird.f32 %v2111_v1 }
 0x146   :  { %vm2968_vm13 = vcmp.le.f32.partialorder %v3315_v29, 0.7853982  ;;  %v478_v39 = vsel %vm476_vm6, %v2886_v43, %v477_v53  ;;  %v481_v57 = vsel %vm479_vm7, %v480_v58, %v1809_v4  ;;  %v774_v31 = vxor.u32 2147483648, %v773_v41  ;;  %v3319_v43 = vld [vmem:[#allocation12_spill] sm:$0xff] }
 0x147   :  { %v935_v49 = vsel %vm929_vm8, %v932_v28, %v934_v60  ;;  %v675_v9 = vsel %vm2968_vm13, %v3314_v21, %v672_v40  ;;  %vm1679_vm14 = vcmp.lt.s32.totalorder %v1678_v30, 0  ;;  %vm953_vm15 = vc.u32 %v2952_v51, %v2956_v63 }
 0x148   :  { %v954_v18 = vadd.s32 1, %v2957_v2  ;;  %v673_v12 = vsub.s32 4, %v3319_v43  ;;  %v877_v5 = vxor.u32 2147483648, %v876_v8  ;;  %vm692_vm1 = vcmp.lt.s32.totalorder %v2236_v15, 0 }
 0x149   :  { %v1070_v58 = vsel %vm1679_vm14, 0, %v1678_v30  ;;  %vm373_vm12 = vcmp.eq.s32.totalorder %v2964_v14, 0  ;;  %v1055_v46 = vadd.s32 %v2845_v7, %v2843_v42  ;;  %v951_v0 = vmul.u32 %v944_v50, %v935_v49 }
 0x14a   :  { %v1071_v4 = vsub.s32 32, %v1070_v58  ;;  %v1075_v20 = vsub.s32 4294967266, %v1070_v58  ;;  %v482_v62 = vsel %vm475_vm10, %v478_v39, %v481_v57  ;;  %1818 = vcosq.f32 %v675_v9 }
 0x14b   :  { %v775_v56 = vsel %vm692_vm1, %v774_v31, %v773_v41  ;;  %v955_v17 = vsel %vm953_vm15, %v954_v18, %v2957_v2  ;;  %v1072_v37 = vshll.u32 %v2920_v27, %v1070_v58  ;;  %v377_v3 = vxor.u32 2147483648, %v2927_v35  ;;  %v3054_v2 = vld [vmem:[%s3326_s13] sm:$0xff]  ;;  %v3327_v58 = vld [vmem:[#allocation18_spill] sm:$0xff] }
 0x14c   :  { %v1073_v42 = vshrl.u32 %v1055_v46, %v1071_v4  ;;  %v1076_v7 = vadd.s32 127, %v1075_v20  ;;  %v956_v47 = vadd.s32 %v955_v17, %v951_v0  ;;  %v674_v44 = vsel %vm589_vm3, %v673_v12, %v3319_v43 }
 0x14d   :  { %1820 = vsinq.f32 %v675_v9  ;;  %v3320_v48 = vand.u32 2147483647, %v2236_v15  ;;  %v878_v27 = vsel %vm795_vm9, %v877_v5, %v876_v8  ;;  %v374_v34 = vxor.u32 2147483648, %v2932_v52 }
 0x14e   :  { %v1074_v59 = vor.u32 %v1073_v42, %v1072_v37  ;;  %v1077_v45 = vshll.u32 %v1076_v7, 23  ;;  %v957_v50 = vadd.s32 536870912, %v956_v47  ;;  %v3034_v53 = vpop.eup %1814  ;;  %vm376_vm3 = vcmp.eq.s32.totalorder %v2964_v14, 2 }
 0x14f   :  { %vm3026_vm0 = vcmp.le.f32.partialorder %v3320_v48, 0.7853982  ;;  %v3323_v25 = vand.u32 2147483647, %v3318_v22  ;;  %v483_v36 = vsel %vm473_vm11, nan, %v482_v62  ;;  %v1417_v29 = vstv %s2998_s1 }
 0x150   :  { %v778_v28 = vsel %vm3026_vm0, %v2236_v15, %v775_v56  ;;  %v1078_v33 = vor.u32 4788187, %v1077_v45  ;;  %v3049_v60 = vshrl.u32 %v957_v50, 30  ;;  %vm372_vm5 = vcmp.lt.s32.totalorder %v2964_v14, 2  ;;  %v235_v56 = vpop.permute.xlu1 %234 }
 0x151   :  { %vm3040_vm4 = vcmp.le.f32.partialorder %v3323_v25, 0.7853982  ;;  %v378_v40 = vsel %vm376_vm3, %v377_v3, %v2932_v52  ;;  %v676_v8 = vsel %vm2968_vm13, 0, %v674_v44  ;;  %v1423_v30 = vstv %s3002_s26  ;;  %v1817_v57 = vpop.eup %1816 }
 0x152   :  { %v881_v1 = vsel %vm3040_vm4, %v3318_v22, %v878_v27  ;;  %vm579_vm6 = vcmp.eq.s32.totalorder %v2979_v13, 0  ;;  %vm582_vm7 = vcmp.eq.s32.totalorder %v2979_v13, 2  ;;  %1822 = vcosq.f32 %v778_v28 }
 0x153   :  { %v1079_v39 = vand.u32 2147483647, %v1078_v33  ;;  %v1081_v52 = vcvt.s32.f32 %v1074_v59  ;;  %v959_v6 = vshll.u32 %v3049_v60, 30  ;;  %v375_v31 = vsel %vm373_vm12, %v2927_v35, %v374_v34 }
 0x154   :  { %v583_v49 = vxor.u32 2147483648, %v3034_v53  ;;  %1824 = vsinq.f32 %v778_v28  ;;  %v1418_v9 = vmul.f32 %v1417_v29, %v3054_v2  ;;  %v1420_v12 = vstv %s3015_s27 }
 0x155   :  { %v1082_v18 = vmul.f32 %v1081_v52, %v1079_v39  ;;  %v3075_v43 = vsub.s32 %v956_v47, %v959_v6  ;;  %v1424_v5 = vmul.f32 %v1423_v30, %v3054_v2  ;;  %vm370_vm8 = vweird.f32 %v2115_v10  ;;  %v228_v39 = vpop.permute.xlu0 %227 }
 0x156   :  { %v879_v46 = vsub.s32 4, %v3327_v58  ;;  %1826 = vcosq.f32 %v881_v1  ;;  %v1426_v4 = vstv %s3018_s28  ;;  %v1429_v20 = vstv %s3030_s7 }
 0x157   :  { %vm578_vm10 = vcmp.lt.s32.totalorder %v2979_v13, 2  ;;  %v580_v35 = vxor.u32 2147483648, %v1817_v57  ;;  %1828 = vsinq.f32 %v881_v1  ;;  %v1083_v0 = vxor.u32 2147483648, %v1082_v18  ;;  %v1819_v7 = vpop.eup %1818 }
 0x158   :  { %v962_v62 = vsub.s32 0, %v3075_v43  ;;  %v776_v17 = vsub.s32 4, %v2797_v54  ;;  %vm3088_vm13 = vcmp.le.f32.partialorder %v999_v26, 0.7853982  ;;  %vm1001_vm11 = vcmp.lt.s32.totalorder %v2313_v24, 0 }
 0x159   :  { %v3093_v42 = vadd.f32 %v1420_v12, %v1418_v9  ;;  %v1084_v47 = vsel %vm1001_vm11, %v1083_v0, %v1082_v18  ;;  %v3098_v44 = vadd.f32 %v1426_v4, %v1424_v5  ;;  %v1430_v48 = vmul.f32 %v1429_v20, %v3054_v2 }
 0x15a   :  { %v1673_v3 = vmin.u32 %v962_v62, %v3075_v43  ;;  %v680_v27 = vand.u32 3, %v676_v8  ;;  %v880_v26 = vsel %vm795_vm9, %v879_v46, %v3327_v58  ;;  %v1087_v59 = vsel %vm3088_vm13, %v2313_v24, %v1084_v47  ;;  %v1821_v50 = vpop.eup %1820 }
 0x15b   :  { %v1432_v45 = vstv %s3065_s14  ;;  %v3108_v34 = vmul.f32 %v483_v36, %v235_v56  ;;  %v379_v25 = vsel %vm372_vm5, %v375_v31, %v378_v40  ;;  %vm576_vm14 = vweird.f32 %v2119_v16 }
 0x15c   :  { %1830 = vcosq.f32 %v1087_v59  ;;  %v964_v28 = vclz %v1673_v3  ;;  %v581_v33 = vsel %vm579_vm6, %v3034_v53, %v580_v35  ;;  %v584_v29 = vsel %vm582_vm7, %v583_v49, %v1817_v57 }
 0x15d   :  { %v777_v8 = vsel %vm692_vm1, %v776_v17, %v2797_v54  ;;  %1832 = vsinq.f32 %v1087_v59  ;;  %v882_v14 = vsel %vm3040_vm4, 0, %v880_v26  ;;  %v3123_v40 = vadd.f32 %v1432_v45, %v1430_v48  ;;  %v249_v48 = vpop.permute.xlu1 %248 }
 0x15e   :  { %v1674_v36 = vadd.s32 4294967294, %v964_v28  ;;  %v1434_v1 = vmax.f32 %v3093_v42, %v3098_v44  ;;  %vm681_vm9 = vcmp.lt.s32.totalorder %v680_v27, 2  ;;  %vm682_vm15 = vcmp.eq.s32.totalorder %v680_v27, 0 }
 0x15f   :  { %v686_v53 = vxor.u32 2147483648, %v1819_v7  ;;  %v1085_v30 = vsub.s32 4, %v2905_v61  ;;  %v380_v52 = vsel %vm370_vm8, nan, %v379_v25  ;;  %v683_v54 = vxor.u32 2147483648, %v1821_v50  ;;  %v1823_v6 = vpop.eup %1822 }
 0x160   :  { %v779_v41 = vsel %vm3026_vm0, 0, %v777_v8  ;;  %vm1675_vm1 = vcmp.lt.s32.totalorder %v1674_v36, 0  ;;  %v585_v57 = vsel %vm578_vm10, %v581_v33, %v584_v29  ;;  %vm685_vm12 = vcmp.eq.s32.totalorder %v680_v27, 2 }
 0x161   :  { %v3134_v31 = vand.u32 3, %v882_v14  ;;  %v967_v49 = vsel %vm1675_vm1, 0, %v1674_v36  ;;  %v1825_v9 = vpop.eup %1824  ;;  %v952_v18 = vadd.s32 %v2956_v63, %v2952_v51  ;;  %v1435_v5 = vmax.f32 %v1434_v1, %v3123_v40  ;;  %v242_v36 = vpop.permute.xlu0 %241 }
 0x162   :  { %v968_v12 = vsub.s32 32, %v967_v49  ;;  %v972_v10 = vsub.s32 4294967266, %v967_v49  ;;  %v3139_v58 = vmul.f32 %v380_v52, %v228_v39  ;;  %v687_v11 = vsel %vm685_vm12, %v686_v53, %v1821_v50 }
 0x163   :  { %v783_v46 = vand.u32 3, %v779_v41  ;;  %v1086_v13 = vsel %vm1001_vm11, %v1085_v30, %v2905_v61  ;;  %v1827_v4 = vpop.eup %1826  ;;  %vm679_vm0 = vweird.f32 %v3314_v21  ;;  %v684_v20 = vsel %vm682_vm15, %v1819_v7, %v683_v54  ;;  %v263_v41 = vpop.permute.xlu1 %262 }
 0x164   :  { %v969_v35 = vshll.u32 %v3075_v43, %v967_v49  ;;  %v970_v51 = vshrl.u32 %v952_v18, %v968_v12  ;;  %v973_v63 = vadd.s32 127, %v972_v10  ;;  %v1829_v0 = vpop.eup %1828  ;;  %v586_v62 = vsel %vm576_vm14, nan, %v585_v57 }
 0x165   :  { %vm888_vm3 = vcmp.eq.s32.totalorder %v3134_v31, 0  ;;  %v786_v56 = vxor.u32 2147483648, %v1825_v9  ;;  %v789_v17 = vxor.u32 2147483648, %v1823_v6  ;;  %vm887_vm4 = vcmp.lt.s32.totalorder %v3134_v31, 2  ;;  %v256_v18 = vpop.permute.xlu0 %255 }
 0x166   :  { %v1088_v61 = vsel %vm3088_vm13, 0, %v1086_v13  ;;  %v971_v47 = vor.u32 %v970_v51, %v969_v35  ;;  %v974_v3 = vshll.u32 %v973_v63, 23  ;;  %v1436_v7 = vsub.f32 %v3093_v42, %v1435_v5 }
 0x167   :  { %vm1110_vm5 = vcmask 193536   ;;  %v688_v43 = vsel %vm681_vm9, %v684_v20, %v687_v11  ;;  %vm891_vm6 = vcmp.eq.s32.totalorder %v3134_v31, 2  ;;  %vm785_vm7 = vcmp.eq.s32.totalorder %v783_v46, 0  ;;  %v277_v51 = vpop.permute.xlu1 %276 }
 0x168   :  { %v1439_v16 = vsub.f32 %v3098_v44, %v1435_v5  ;;  %v889_v26 = vxor.u32 2147483648, %v1829_v0  ;;  %v892_v59 = vxor.u32 2147483648, %v1827_v4  ;;  %vm788_vm8 = vcmp.eq.s32.totalorder %v783_v46, 2 }
 0x169   :  { %v975_v45 = vor.u32 4788187, %v974_v3  ;;  %v1831_v50 = vpop.eup %1830  ;;  %vm885_vm10 = vweird.f32 %v3318_v22  ;;  %v787_v37 = vsel %vm785_vm7, %v1823_v6, %v786_v56  ;;  %v790_v25 = vsel %vm788_vm8, %v789_v17, %v1825_v9 }
 0x16a   :  { %v1092_v28 = vand.u32 3, %v1088_v61  ;;  %v1442_v42 = vsub.f32 %v3123_v40, %v1435_v5  ;;  %v1833_v27 = vpop.eup %1832  ;;  %v1098_v33 = vxor.u32 2147483648, %v1831_v50  ;;  %v978_v8 = vcvt.s32.f32 %v971_v47 }
 0x16b   :  { %v976_v29 = vand.u32 2147483647, %v975_v45  ;;  %v1437_v14 = vmul.f32 1.442695, %v1436_v7  ;;  %vm782_vm13 = vweird.f32 %v2236_v15  ;;  %vm784_vm11 = vcmp.lt.s32.totalorder %v783_v46, 2 }
 0x16c   :  { %v1095_v44 = vxor.u32 2147483648, %v1833_v27  ;;  %v1440_v1 = vmul.f32 1.442695, %v1439_v16  ;;  %v890_v53 = vsel %vm888_vm3, %v1827_v4, %v889_v26  ;;  %v893_v30 = vsel %vm891_vm6, %v892_v59, %v1829_v0 }
 0x16d   :  { %v791_v39 = vsel %vm784_vm11, %v787_v37, %v790_v25  ;;  %v979_v52 = vmul.f32 %v978_v8, %v976_v29  ;;  %v689_v40 = vsel %vm679_vm0, nan, %v688_v43  ;;  %vm1094_vm14 = vcmp.eq.s32.totalorder %v1092_v28, 0 }
 0x16e   :  { %vm1097_vm9 = vcmp.eq.s32.totalorder %v1092_v28, 2  ;;  %v1443_v54 = vmul.f32 1.442695, %v1442_v42  ;;  %v1096_v6 = vsel %vm1094_vm14, %v1831_v50, %v1095_v44  ;;  %1834 = vpow2.f32 %v1437_v14 }
 0x16f   :  { %v1099_v57 = vsel %vm1097_vm9, %v1098_v33, %v1833_v27  ;;  %v980_v49 = vxor.u32 2147483648, %v979_v52  ;;  %v894_v9 = vsel %vm887_vm4, %v890_v53, %v893_v30  ;;  %v792_v12 = vsel %vm782_vm13, nan, %v791_v39 }
 0x170   :  { %vm898_vm15 = vcmp.lt.s32.totalorder %v3311_v32, 0  ;;  %1836 = vpow2.f32 %v1440_v1  ;;  %v1104_v21 = vmul.f32 %v586_v62, %v242_v36  ;;  %vm1093_vm1 = vcmp.lt.s32.totalorder %v1092_v28, 2 }
 0x171   :  { %vm3173_vm12 = vcmp.le.f32.partialorder %v896_v55, 0.7853982  ;;  %v981_v5 = vsel %vm898_vm15, %v980_v49, %v979_v52  ;;  %v1105_v31 = vmul.f32 %v689_v40, %v249_v48  ;;  %v1100_v11 = vsel %vm1093_vm1, %v1096_v6, %v1099_v57  ;;  %v270_v57 = vpop.permute.xlu0 %269 }
 0x172   :  { %v984_v15 = vsel %vm3173_vm12, %v3311_v32, %v981_v5  ;;  %1838 = vpow2.f32 %v1443_v54  ;;  %v1118_v46 = vsel %vm1110_vm5, %v3108_v34, 0.0  ;;  %v895_v13 = vsel %vm885_vm10, nan, %v894_v9 }
 0x173   :  { %v1106_v55 = vmul.f32 %v792_v12, %v256_v18  ;;  %1840 = vcosq.f32 %v984_v15  ;;  %v1111_v4 = vsel %vm1110_vm5, %v3139_v58, 0.0  ;;  %vm1091_vm0 = vweird.f32 %v2313_v24 }
 0x174   :  { %v982_v20 = vsub.s32 4, %v3049_v60  ;;  %1842 = vsinq.f32 %v984_v15  ;;  %v1125_v35 = vsel %vm1110_vm5, %v1104_v21, 0.0  ;;  %v1101_v63 = vsel %vm1091_vm0, nan, %v1100_v11 }
 0x175   :  { %v1119_v0 = vrot.slane %v1118_v46, 4  ;;  %v1132_v34 = vsel %vm1110_vm5, %v1105_v31, 0.0  ;;  %v1107_v62 = vmul.f32 %v895_v13, %v263_v41  ;;  %v1112_v22 = vrot.slane %v1111_v4, 4 }
 0x176   :  { %v1139_v56 = vsel %vm1110_vm5, %v1106_v55, 0.0  ;;  %v1126_v17 = vrot.slane %v1125_v35, 4  ;;  %v1109_v61 = vmul.f32 %v1101_v63, %v277_v51  ;;  %v983_v24 = vsel %vm898_vm15, %v982_v20, %v3049_v60 }
 0x177   :  { %v1133_v58 = vrot.slane %v1132_v34, 4  ;;  %v1120_v47 = vadd.f32 %v1119_v0, %v1118_v46  ;;  %v1146_v3 = vsel %vm1110_vm5, %v1107_v62, 0.0  ;;  %v1140_v7 = vrot.slane %v1139_v56, 4 }
 0x178   :  { %v1113_v43 = vadd.f32 %v1112_v22, %v1111_v4  ;;  %v985_v16 = vsel %vm3173_vm12, 0, %v983_v24  ;;  %v1127_v26 = vadd.f32 %v1126_v17, %v1125_v35  ;;  %v1160_v59 = vsel %vm1110_vm5, %v1109_v61, 0.0 }
 0x179   :  { %v1134_v50 = vadd.f32 %v1133_v58, %v1132_v34  ;;  %v1147_v37 = vrot.slane %v1146_v3, 4  ;;  %v1121_v25 = vrot.slane %v1120_v47, 2  ;;  %v1141_v28 = vadd.f32 %v1140_v7, %v1139_v56 }
 0x17a   :  { %v989_v42 = vand.u32 3, %v985_v16  ;;  %v1114_v27 = vrot.slane %v1113_v43, 2  ;;  %v1161_v33 = vrot.slane %v1160_v59, 4  ;;  %v1128_v8 = vrot.slane %v1127_v26, 2 }
 0x17b   :  { %v1835_v48 = vpop.eup %1834  ;;  %v1135_v44 = vrot.slane %v1134_v50, 2  ;;  %v1148_v1 = vadd.f32 %v1147_v37, %v1146_v3  ;;  %v1122_v30 = vadd.f32 %v1121_v25, %v1120_v47  ;;  %v1142_v39 = vrot.slane %v1141_v28, 2 }
 0x17c   :  { %vm994_vm3 = vcmp.eq.s32.totalorder %v989_v42, 2  ;;  %v1115_v40 = vadd.f32 %v1114_v27, %v1113_v43  ;;  %v1162_v54 = vadd.f32 %v1161_v33, %v1160_v59  ;;  %vm991_vm4 = vcmp.eq.s32.totalorder %v989_v42, 0 }
 0x17d   :  { %v1837_v45 = vpop.eup %1836  ;;  %v1129_v6 = vadd.f32 %v1128_v8, %v1127_v26  ;;  %vm990_vm6 = vcmp.lt.s32.totalorder %v989_v42, 2  ;;  %v1136_v18 = vadd.f32 %v1135_v44, %v1134_v50  ;;  %v1149_v12 = vrot.slane %v1148_v1, 2 }
 0x17e   :  { %v1445_v14 = vadd.f32 %v1837_v45, %v1835_v48  ;;  %vm988_vm7 = vweird.f32 %v3311_v32  ;;  %v1143_v10 = vadd.f32 %v1142_v39, %v1141_v28  ;;  %v1123_v31 = vrot.slane %v1122_v30, 1  ;;  %v1691_v39 = vld [vmem:[%s3244_s12] ss:$0 sm:$0xff] }
 0x17f   :  { %v1839_v60 = vpop.eup %1838  ;;  %v1116_v11 = vrot.slane %v1115_v40, 1  ;;  %v1163_v15 = vrot.slane %v1162_v54, 2  ;;  %v1130_v13 = vrot.slane %v1129_v6, 1  ;;  %v1137_v55 = vrot.slane %v1136_v18, 1 }
 0x180   :  { %v1841_v29 = vpop.eup %1840  ;;  %v1446_v9 = vadd.f32 %v1839_v60, %v1445_v14  ;;  %v1150_v4 = vadd.f32 %v1149_v12, %v1148_v1  ;;  %v1144_v35 = vrot.slane %v1143_v10, 1  ;;  %v1124_v63 = vadd.f32 %v1123_v31, %v1122_v30 }
 0x181   :  { %v1843_v36 = vpop.eup %1842  ;;  %v995_v53 = vxor.u32 2147483648, %v1841_v29  ;;  %vm1462_vm8 = vcmask 1041409   ;;  %v1117_v0 = vadd.f32 %v1116_v11, %v1115_v40  ;;  %v1164_v34 = vadd.f32 %v1163_v15, %v1162_v54 }
 0x182   :  { %v992_v52 = vxor.u32 2147483648, %v1843_v36  ;;  %1844 = vrcp.f32 %v1446_v9  ;;  %v1131_v32 = vadd.f32 %v1130_v13, %v1129_v6  ;;  %v1448_v22 = vmul.f32 %v1835_v48, %v2673_v19 }
 0x183   :  { %v996_v41 = vsel %vm994_vm3, %v995_v53, %v1843_v36  ;;  %v1449_v56 = vmul.f32 %v1837_v45, %v2675_v38  ;;  %vm1464_vm10 = vcmask 1042434   ;;  %v1138_v17 = vadd.f32 %v1137_v55, %v1136_v18  ;;  %v1556_v36 = vld [vmem:[%s3243_s11] sm:$0xff] }
 0x184   :  { %v993_v49 = vsel %vm991_vm4, %v1841_v29, %v992_v52  ;;  %v1151_v61 = vrot.slane %v1150_v4, 1  ;;  %vm1466_vm13 = vcmask 1043459   ;;  %v1145_v24 = vadd.f32 %v1144_v35, %v1143_v10 }
 0x185   :  { %v997_v21 = vsel %vm990_vm6, %v993_v49, %v996_v41  ;;  %v1463_v47 = vsel %vm1462_vm8, %v1124_v63, %v1117_v0  ;;  %v1165_v3 = vrot.slane %v1164_v34, 1  ;;  %v1450_v16 = vadd.f32 %v1449_v56, %v1448_v22 }
 0x186   :  { %v998_v5 = vsel %vm988_vm7, nan, %v997_v21  ;;  %v1465_v7 = vsel %vm1464_vm10, %v1131_v32, %v1463_v47  ;;  %v1451_v26 = vmul.f32 %v1839_v60, %v2704_v23  ;;  %v1152_v50 = vadd.f32 %v1151_v61, %v1150_v4  ;;  %v1479_v23 = vld [vmem:[%s3242_s10] sm:$0x3]  ;;  %v1558_v60 = vld [vmem:[%s3243_s11 + $0x10] sm:$0xff] }
 0x187   :  { %v1108_v46 = vmul.f32 %v998_v5, %v270_v57  ;;  %v1467_v59 = vsel %vm1466_vm13, %v1138_v17, %v1465_v7  ;;  %vm1470_vm11 = vcmask 1045509   ;;  %v1166_v38 = vadd.f32 %v1165_v3, %v1164_v34 }
 0x188   :  { %vm1472_vm14 = vcmask 1046534   ;;  %v1452_v45 = vadd.f32 %v1451_v26, %v1450_v16  ;;  %vm1474_vm9 = vcmask 1047559   ;;  %vm1482_vm15 = vcmask 64512  }
 0x189   :  { %v1153_v20 = vsel %vm1110_vm5, %v1108_v46, 0.0  ;;  %vm1468_vm5 = vcmask 1044484   ;;  %v3332_v14 = vmov 0.0   ;;  %v1481_v44 = vstv %s3247_s15 }
 0x18a   :  { %v1154_v51 = vrot.slane %v1153_v20, 4  ;;  %v1469_v37 = vsel %vm1468_vm5, %v1145_v24, %v1467_v59  ;;  %vm1640_vm1 = vcmask 25600  }
 0x18b   :  { %v1471_v28 = vsel %vm1470_vm11, %v1152_v50, %v1469_v37 }
 0x18c   :  { %v1155_v62 = vadd.f32 %v1154_v51, %v1153_v20 }
 0x18e   :  { %v1156_v58 = vrot.slane %v1155_v62, 2 }
 0x18f   :  { %v1845_v25 = vpop.eup %1844 }
 0x190   :  { %v1157_v43 = vadd.f32 %v1156_v58, %v1155_v62  ;;  %v1453_v33 = vmul.f32 %v1845_v25, %v1452_v45 }
 0x192   :  { %v1158_v19 = vrot.slane %v1157_v43, 1 }
 0x194   :  { %v1159_v48 = vadd.f32 %v1158_v19, %v1157_v43 }
 0x196   :  { %v1473_v42 = vsel %vm1472_vm14, %v1159_v48, %v1471_v28 }
 0x197   :  { %v1475_v27 = vsel %vm1474_vm9, %v1166_v38, %v1473_v42 }
 0x198   :  { %v1477_v29 = vadd.f32 %v1475_v27, %v3054_v2  ;;  %v1557_v2 = vld [vmem:[%s3243_s11 + $0x8] sm:$0xff] }
 0x19a   :  { %v1478_v8 = vadd.f32 %v1477_v29, %v1453_v33 }
 0x19c   :  { %1751 = vmatpush3.msra.mxu1 %v1478_v8 }
 0x19d   :  { %1753 = vmatmul.mubr.msk.f32.vlgmr.msra.gmra.mxu1 %vm1482_vm15, %v1479_v23  ;;  %1755 = vmatprep.subr.mxu1 %v3332_v14 }
 0x19e   :  { %1756 = vmatpush3.msra.mxu1 %v1558_v60  ;;  %1761 = vmatprep.mubr.msk.f32.mxu1 %vm1877_vm2, %v3332_v14  ;;  %vm1566_vm2 = vcmask 195584  }
 0x19f   :  { %1757 = vmatprep.subr.mxu1 %v3332_v14 }
 0x1a0   :  { %1758 = vmatpush3.msra.mxu1 %v1557_v2 }
 0x1a1   :  { %1759 = vmatprep.subr.mxu1 %v3332_v14 }
 0x1a2   :  { %1760 = vmatpush3.msra.mxu1 %v1556_v36 }
 0x25d   :  { %v1552_v1 = vpop.f32.mrf.mxu1 }
 0x25e   :  { %v1553_v53 = vadd.f32 %v1552_v1, %v1481_v44 }
 0x25f   :  { %v1754_v30 = vpop.f32.mrf.mxu1 }
 0x260   :  { %1762 = vmatmul.mubr.msk.f32.vlgmr.msra.gmra.mxu1 %vm1566_vm2, %v1553_v53 }
 0x320   :  { %v1636_v52 = vpop.f32.mrf.mxu1 }
 0x321   :  { %v1637_v40 = vadd.f32 %v1691_v39, %v1636_v52 }
 0x322   :  { %v1763_v54 = vpop.f32.mrf.mxu1 }
 0x323   :  { %1641 = vst.msk [vmem:[%s3248_s16] sm:$0x3] %vm1640_vm1, %v1637_v40 }
 0x324   :  { %1646 = vsyncpa [#allocation4], 1 }
 0x325   :  { %1647 = vsyncpa [#allocation6], 1 }

// kernel: _lambda_.3
= control target key start
LH: loop header
LB: loop body
LE: loop exit
PB: predicated region body
PF: predicated region fallthrough
CT: control target
= control target key end

     0   :  { %s4809_s3 = smov 1   ;;  %s4810_s10 = smov 3   ;;  %vm417_vm0 = vcmask 261120   ;;  %vm549_vm1 = vcmask 195584   ;;  %vm596_vm2 = vcmask 1043456   ;;  %vm771_vm3 = vcmask 523264   ;;  %s5771_s0 = inlined_call_operand.smem [shape: u32[52], index: -1, kind: input, shape index: {}] }
   0x1   :  { %s4873_s6 = sld [smem:[%s5771_s0 + %s4809_s3]]   ;;  %s4811_s14 = smov 2   ;;  %vm4832_vm4 = vmmov 0   ;;  %vm2033_vm5 = vcmask 392192   ;;  %vm2984_vm6 = vcmask 785408  }
   0x2   :  { %s4885_s9 = sld [smem:[%s5771_s0]]   ;;  %s4812_s18 = smov 96  }
   0x3   :  { %s3778_s13 = sld [smem:[%s5771_s0 + %s4810_s10]]   ;;  %s4813_s19 = smov 10  }
   0x4   :  { %s3777_s17 = sld [smem:[%s5771_s0 + %s4811_s14]]   ;;  %s4814_s23 = smov 64  }
   0x5   :  { %s3785_s22 = sld [smem:[%s5771_s0 + %s4813_s19]]   ;;  %s4815_s24 = smov 4  }
   0x6   :  { %s3779_s27 = sld [smem:[%s5771_s0 + %s4815_s24]]   ;;  %s4816_s28 = smov 6  }
   0x7   :  { %v4621_v0 = vld [vmem:[%s4873_s6 + $0x78] sm:$0xff]   ;;  %v4623_v2 = vld [vmem:[%s4873_s6 + $0x70] sm:$0xff]   ;;  %v4625_v4 = vld [vmem:[%s4873_s6 + $0x68] sm:$0xff]   ;;  %s3781_s1 = sld [smem:[%s5771_s0 + %s4816_s28]]   ;;  %s4817_s2 = smov 13  }
   0x8   :  { %v4622_v1 = vld [vmem:[%s4873_s6 + $0x38] sm:$0xff]   ;;  %4011 = vmatprep.subr.bf16.mxu0 %v4621_v0  ;;  %v4624_v3 = vld [vmem:[%s4873_s6 + $0x30] sm:$0xff]   ;;  %v4626_v5 = vld [vmem:[%s4873_s6 + $0x28] sm:$0xff]   ;;  %s4952_s5 = sld [smem:[%s5771_s0 + %s4817_s2]]   ;;  %s4820_s10 = smov 12  }
   0x9   :  { %4012 = vmatpush3.bf16.msra.mxu0 %v4622_v1  ;;  %v4627_v6 = vld [vmem:[%s4873_s6 + $0x60] sm:$0xff]   ;;  %v4629_v8 = vld [vmem:[%s4873_s6 + $0x58] sm:$0xff]   ;;  %v4631_v10 = vld [vmem:[%s4873_s6 + $0x50] sm:$0xff]   ;;  %s4821_s14 = smov 8   ;;  %s4822_s19 = smov 15  }
   0xa   :  { %4013 = vmatprep.subr.bf16.mxu0 %v4623_v2  ;;  %v4628_v7 = vld [vmem:[%s4873_s6 + $0x20] sm:$0xff]   ;;  %v4630_v9 = vld [vmem:[%s4873_s6 + $0x18] sm:$0xff]   ;;  %v207_v11 = vld [vmem:[%s4885_s9 + $0x8] sm:$0xff]  ;;  %s4823_s24 = smov 7   ;;  %s4824_s28 = smov 14  }
   0xb   :  { %v209_v12 = vld [vmem:[%s4885_s9 + $0x18] sm:$0xff]  ;;  %v4632_v14 = vld [vmem:[%s4873_s6 + $0x10] sm:$0xff]   ;;  %v4633_v15 = vld [vmem:[%s4873_s6 + $0x48] sm:$0xff]   ;;  %s4825_s2 = smov 22   ;;  %s4852_s16 = smov 9  }
   0xc   :  { %v213_v13 = vpack.c.bf16 %v209_v12, %v207_v11  ;;  %v4634_v16 = vld [vmem:[%s4873_s6 + $0x8] sm:$0xff]   ;;  %v4635_v17 = vld [vmem:[%s4873_s6 + $0x40] sm:$0xff]   ;;  %v208_v20 = vld [vmem:[%s4885_s9 + $0x10] sm:$0xff]  ;;  %s3784_s20 = sld [smem:[%s5771_s0 + %s4852_s16]]   ;;  %s4853_s21 = smov 21  }
   0xd   :  { %4014 = vmatpush3.bf16.msra.mxu0 %v4624_v3  ;;  %v4636_v18 = vld [vmem:[%s4873_s6] sm:$0xff]   ;;  %v211_v21 = vld [vmem:[%s4885_s9 + $0x28] sm:$0xff]  ;;  %v545_v56 = vld [vmem:[%s3785_s22 + $0x10] sm:$0xff]  ;;  %s4819_s6 = smov 5   ;;  %s3796_s25 = sld [smem:[%s5771_s0 + %s4853_s21]]  }
   0xe   :  { %4015 = vmatprep.subr.bf16.mxu0 %v4625_v4  ;;  %383 = vmatprep.mubr.bf16.mxu0 %v213_v13  ;;  %v206_v19 = vld [vmem:[%s4885_s9] sm:$0xff]  ;;  %v215_v23 = vpack.c.bf16 %v211_v21, %v211_v21  ;;  %v4637_v26 = vld [vmem:[%s3778_s13 + $0x8] sm:$0xff]   ;;  %s4854_s26 = smov 48   ;;  %s4855_s29 = smov 49  }
   0xf   :  { %v212_v22 = vpack.c.bf16 %v208_v20, %v206_v19  ;;  %v210_v24 = vld [vmem:[%s4885_s9 + $0x20] sm:$0xff]  ;;  %4196 = vmatprep.subr.bf16.mxu1 %v4637_v26  ;;  %v544_v2 = vld [vmem:[%s3785_s22 + $0x8] sm:$0xff]  ;;  %s3780_s9 = sld [smem:[%s5771_s0 + %s4819_s6]]   ;;  %s4826_s6 = smov 16  }
  0x10   :  { %v214_v25 = vpack.c.bf16 %v210_v24, %v210_v24  ;;  %4197 = vmatpush3.bf16.msra.mxu1 %v4637_v26  ;;  %v4638_v27 = vld [vmem:[%s3778_s13] sm:$0xff]   ;;  %s4964_s13 = sld [smem:[%s5771_s0 + %s4820_s10]]   ;;  %s4827_s10 = smov 18  }
  0x11   :  { %4016 = vmatpush3.bf16.msra.mxu0 %v4626_v5  ;;  %4198 = vmatprep.subr.bf16.mxu1 %v4638_v27  ;;  %v3827_v32 = vld [vmem:[%s3777_s17] ss:$0 sm:$0xff]  ;;  %s3783_s17 = sld [smem:[%s5771_s0 + %s4821_s14]]   ;;  %s4828_s14 = smov 17  }
  0x12   :  { %4017 = vmatprep.subr.bf16.mxu0 %v4627_v6  ;;  %v543_v59 = vld [vmem:[%s3785_s22] sm:$0xff]  ;;  %s3790_s22 = sld [smem:[%s5771_s0 + %s4822_s19]]   ;;  %s4829_s19 = smov 20  }
  0x13   :  { %s4856_s3 = smov 33   ;;  %s4857_s7 = smov 50  }
  0x14   :  { %4199 = vmatpush3.bf16.msra.mxu1 %v4638_v27  ;;  %s4858_s11 = smov 42  }
  0x15   :  { %4018 = vmatpush3.bf16.msra.mxu0 %v4628_v7 }
  0x16   :  { %4019 = vmatprep.subr.bf16.mxu0 %v4629_v8 }
  0x19   :  { %4020 = vmatpush3.bf16.msra.mxu0 %v4630_v9 }
  0x1a   :  { %4021 = vmatprep.subr.bf16.mxu0 %v4631_v10 }
  0x1d   :  { %4022 = vmatpush3.bf16.msra.mxu0 %v4632_v14 }
  0x1e   :  { %4023 = vmatprep.subr.bf16.mxu0 %v4633_v15 }
  0x21   :  { %4024 = vmatpush3.bf16.msra.mxu0 %v4634_v16 }
  0x22   :  { %4025 = vmatprep.subr.bf16.mxu0 %v4635_v17 }
  0x25   :  { %4026 = vmatpush3.bf16.msra.mxu0 %v4636_v18 }
  0x28   :  { %384 = vmatmul.mubr.bf16.vlgmr.msra.gmra.mxu0 %v212_v22 }
  0x29   :  { %391 = vmatprep.mubr.bf16.mxu0 %v215_v23 }
  0x30   :  { %392 = vmatmul.mubr.bf16.gmra.mxu0 %v214_v25 }
  0xe8   :  { %v4027_v28 = vpop.f32.mrf.mxu0 }
  0xea   :  { %v4028_v29 = vpop.f32.mrf.mxu0 }
  0xeb   :  { %v4029_v31 = vadd.f32 %v4028_v29, %v4027_v28 }
  0xec   :  { %v4030_v30 = vpop.f32.mrf.mxu0 }
  0xed   :  { %v386_v36 = vadd.f32 %v4029_v31, %v3827_v32 }
  0xee   :  { %v4031_v33 = vpop.f32.mrf.mxu0 }
  0xef   :  { %v4032_v34 = vadd.f32 %v4031_v33, %v4030_v30 }
  0xf0   :  { %v4033_v35 = vpop.f32.mrf.mxu0 }
  0xf1   :  { %v389_v37 = vadd.f32 %v4032_v34, %v3827_v32 }
  0xf2   :  { %v4034_v38 = vpop.f32.mrf.mxu0 }
  0xf3   :  { %v4035_v39 = vadd.f32 %v4034_v38, %v4033_v35  ;;  %v399_v40 = vpack.c.bf16 %v389_v37, %v386_v36  ;;  %v4639_v36 = vld [vmem:[%s3779_s27 + $0x8] sm:$0xff]   ;;  %v4640_v37 = vld [vmem:[%s3779_s27] sm:$0xff]   ;;  %v4641_v38 = vld [vmem:[%s3781_s1 + $0x18] sm:$0xff]   ;;  %s3782_s27 = sld [smem:[%s5771_s0 + %s4823_s24]]   ;;  %s4830_s24 = smov 25  }
  0xf4   :  { %v4036_v41 = vpop.f32.mrf.mxu0  ;;  %4228 = vmatprep.subr.bf16.mxu0 %v4641_v38 }
  0xf5   :  { %v394_v42 = vadd.f32 %v4035_v39, %v3827_v32  ;;  %4200 = vmatprep.mubr.msk.bf16.mxu1 %vm417_vm0, %v399_v40  ;;  %4229 = vmatpush3.bf16.msra.mxu0 %v4641_v38  ;;  %v4664_v38 = vld [vmem:[%s3790_s22] sm:$0xff]  }
  0xf6   :  { %v4037_v43 = vpop.f32.mrf.mxu0 }
  0xf7   :  { %v400_v44 = vpack.c.bf16 %v394_v42, %v394_v42 }
  0xf9   :  { %4201 = vmatmul.mubr.msk.bf16.vlgmr.msra.gmra.mxu1 %vm417_vm0, %v400_v44 }
 0x1b9   :  { %v4202_v45 = vpop.f32.mrf.mxu1 }
 0x1ba   :  { %v473_v46 = vpack.c.bf16 %v4202_v45, %v4202_v45  ;;  %v4642_v45 = vld [vmem:[%s3781_s1 + $0x10] sm:$0xff]  }
 0x1bb   :  { %v458_v47 = vpop.f32.mrf.mxu1  ;;  %4230 = vmatprep.subr.bf16.mxu0 %v4642_v45 }
 0x1bc   :  { %478 = vrot.lane.b32.xlu0 %v473_v46, %s4812_s18  ;;  %4231 = vmatpush3.bf16.msra.mxu0 %v4642_v45 }
 0x1bd   :  { %v4203_v48 = vpop.f32.mrf.mxu1 }
 0x1be   :  { %v4818_v48 = vmov 0  }
 0x1bf   :  { %v461_v49 = vpop.f32.mrf.mxu1  ;;  %4619 = vset.pattern.permute.xlu1 %v4818_v48  ;;  %4620 = vset.pattern.permute.xlu0 %v4818_v48 }
 0x1c0   :  { %v472_v50 = vpack.c.bf16 %v461_v49, %v458_v47  ;;  %v4644_v47 = vld [vmem:[%s3781_s1] sm:$0xff]  }
 0x1c2   :  { %476 = vrot.lane.b32.xlu0 %v472_v50, %s4812_s18  ;;  %4208 = vmatprep.mubr.msk.bf16.mxu1 %vm417_vm0, %v472_v50 }
 0x22e   :  { %v479_v51 = vpop.permute.xlu0 %478 }
 0x22f   :  { %v490_v52 = vsel %vm417_vm0, %v479_v51, 0  ;;  %4552 = vmatprep.subr.msk.bf16.mxu1 %vm417_vm0, %v479_v51 }
 0x230   :  { %4205 = vmatpush3.bf16.xpose.msra.mxu1 %v490_v52 }
 0x234   :  { %v477_v53 = vpop.permute.xlu0 %476 }
 0x235   :  { %4553 = vmatprep.subr.msk.bf16.mxu1 %vm417_vm0, %v477_v53  ;;  %v487_v54 = vsel %vm417_vm0, %v477_v53, 0 }
 0x238   :  { %4207 = vmatpush3.bf16.xpose.msra.mxu1 %v487_v54 }
 0x23f   :  { %4209 = vmatmul.mubr.msk.bf16.vlgmr.msra.gmra.mxu1 %vm417_vm0, %v473_v46 }
 0x2ff   :  { %v4210_v55 = vpop.f32.mrf.mxu1 }
 0x300   :  { %v542_v57 = vmul.f32 0.17677669, %v4210_v55 }
 0x301   :  { %v526_v58 = vpop.f32.mrf.mxu1 }
 0x302   :  { %v540_v60 = vmul.f32 0.17677669, %v526_v58  ;;  %v548_v61 = vadd.f32 %v545_v56, %v542_v57  ;;  %v955_v58 = vld [vmem:[%s4964_s13 + $0x8] sm:$0xff] }
 0x303   :  { %v4211_v62 = vpop.f32.mrf.mxu1 }
 0x304   :  { %v556_v63 = vsel %vm549_vm1, %v548_v61, -inf  ;;  %v546_v0 = vadd.f32 %v543_v59, %v540_v60  ;;  %v957_v59 = vld [vmem:[%s4964_s13 + $0x18] sm:$0xff] }
 0x305   :  { %557 = vmax.xlane.f32.xlu0 %v556_v63  ;;  %v529_v1 = vpop.f32.mrf.mxu1  ;;  %v4645_v63 = vld [vmem:[%s4952_s5 + $0x38] sm:$0xff]  }
 0x306   :  { %v541_v3 = vmul.f32 0.17677669, %v529_v1  ;;  %v550_v4 = vsel %vm549_vm1, %v546_v0, -inf }
 0x307   :  { %551 = vmax.xlane.f32.xlu1 %v550_v4  ;;  %v4648_v4 = vld [vmem:[%s4952_s5 + $0x20] sm:$0xff]  }
 0x308   :  { %v547_v5 = vadd.f32 %v544_v2, %v541_v3  ;;  %v4646_v2 = vld [vmem:[%s4952_s5 + $0x30] sm:$0xff]   ;;  %v4647_v3 = vld [vmem:[%s4952_s5 + $0x28] sm:$0xff]  }
 0x30a   :  { %v553_v6 = vsel %vm549_vm1, %v547_v5, -inf }
 0x30b   :  { %554 = vmax.xlane.f32.xlu1 %v553_v6  ;;  %v4650_v6 = vld [vmem:[%s4952_s5 + $0x10] sm:$0xff]  }
 0x31c   :  { %587 = vrot.lane.b32.xlu1 %v473_v46, %s4814_s23  ;;  %v4643_v46 = vld [vmem:[%s3781_s1 + $0x8] sm:$0xff]   ;;  %s3789_s1 = sld [smem:[%s5771_s0 + %s4824_s28]]   ;;  %s4833_s28 = smov 19  }
 0x31d   :  { %4232 = vmatprep.subr.bf16.mxu0 %v4643_v46 }
 0x31e   :  { %4233 = vmatpush3.bf16.msra.mxu0 %v4643_v46 }
 0x31f   :  { %4234 = vmatprep.subr.bf16.mxu0 %v4644_v47 }
 0x322   :  { %4235 = vmatpush3.bf16.msra.mxu0 %v4644_v47 }
 0x323   :  { %1075 = vmatprep.subr.bf16.mxu0 %v4818_v48 }
 0x38e   :  { %v558_v7 = vpop.xlane.xlu0 %557 }
 0x38f   :  { %v561_v8 = vsub.f32 %v548_v61, %v558_v7  ;;  %v4651_v7 = vld [vmem:[%s4952_s5 + $0x8] sm:$0xff]  }
 0x390   :  { %v552_v9 = vpop.xlane.xlu1 %551 }
 0x391   :  { %v566_v10 = vmul.f32 1.442695, %v561_v8  ;;  %v559_v11 = vsub.f32 %v546_v0, %v552_v9  ;;  %v963_v0 = vpack.c.bf16 %v957_v59, %v955_v58  ;;  %v4652_v8 = vld [vmem:[%s4952_s5] sm:$0xff]   ;;  %v4653_v9 = vld [vmem:[%s4952_s5 + $0x58] sm:$0xff]  }
 0x393   :  { %4709 = vpow2.f32 %v566_v10  ;;  %v562_v12 = vmul.f32 1.442695, %v559_v11  ;;  %v4654_v10 = vld [vmem:[%s4952_s5 + $0x50] sm:$0xff]   ;;  %v4655_v11 = vld [vmem:[%s4952_s5 + $0x48] sm:$0xff]  }
 0x394   :  { %v555_v13 = vpop.xlane.xlu1 %554 }
 0x395   :  { %4711 = vpow2.f32 %v562_v12  ;;  %v560_v14 = vsub.f32 %v547_v5, %v555_v13  ;;  %v4649_v5 = vld [vmem:[%s4952_s5 + $0x18] sm:$0xff]   ;;  %v4656_v12 = vld [vmem:[%s4952_s5 + $0x40] sm:$0xff]   ;;  %s3797_s5 = sld [smem:[%s5771_s0 + %s4825_s2]]   ;;  %s4834_s2 = smov 24  }
 0x396   :  { %v954_v13 = vld [vmem:[%s4964_s13] sm:$0xff] }
 0x397   :  { %v564_v15 = vmul.f32 1.442695, %v560_v14  ;;  %v956_v14 = vld [vmem:[%s4964_s13 + $0x10] sm:$0xff] }
 0x398   :  { %v588_v16 = vpop.permute.xlu1 %587 }
 0x399   :  { %4713 = vpow2.f32 %v564_v15  ;;  %4554 = vmatprep.subr.msk.bf16.mxu1 %vm596_vm2, %v588_v16  ;;  %v598_v17 = vsel %vm596_vm2, %v588_v16, 0  ;;  %v959_v15 = vld [vmem:[%s4964_s13 + $0x28] sm:$0xff]  ;;  %v961_v16 = vld [vmem:[%s4964_s13 + $0x38] sm:$0xff] }
 0x39a   :  { %4213 = vmatpush3.bf16.msra.mxu1 %v598_v17  ;;  %v962_v17 = vpack.c.bf16 %v956_v14, %v954_v13 }
 0x39b   :  { %v1270_v13 = vld [vmem:[%s3797_s5] sm:$0xff] }
 0x3a0   :  { %v4710_v18 = vpop.eup %4709 }
 0x3a1   :  { %v574_v19 = vsel %vm549_vm1, %v4710_v18, 0.0 }
 0x3a2   :  { %v4712_v20 = vpop.eup %4711  ;;  %575 = vadd.xlane.f32.xlu1 %v574_v19  ;;  %v958_v19 = vld [vmem:[%s4964_s13 + $0x20] sm:$0xff] }
 0x3a3   :  { %v568_v21 = vsel %vm549_vm1, %v4712_v20, 0.0 }
 0x3a6   :  { %v4714_v22 = vpop.eup %4713  ;;  %569 = vadd.xlane.f32.xlu1 %v568_v21 }
 0x3a7   :  { %v571_v23 = vsel %vm549_vm1, %v4714_v22, 0.0 }
 0x3aa   :  { %572 = vadd.xlane.f32.xlu1 %v571_v23  ;;  %v4657_v23 = vld [vmem:[%s3783_s17 + $0x10] ss:$8 sps:$4 sm:$0xff]  }
 0x3bb   :  { %585 = vrot.lane.b32.xlu1 %v472_v50, %s4814_s23  ;;  %v3852_v50 = vld [vmem:[%s3780_s9] ss:$0 sm:$0xff]  ;;  %s3791_s9 = sld [smem:[%s5771_s0 + %s4826_s6]]   ;;  %s4835_s6 = smov 27  }
 0x42b   :  { %v576_v24 = vpop.xlane.xlu1 %575 }
 0x42c   :  { %4715 = vrcp.f32 %v576_v24  ;;  %v4662_v24 = vld [vmem:[%s3783_s17 + $0x4] ss:$8 sps:$4 sm:$0xff]  }
 0x42f   :  { %v570_v25 = vpop.xlane.xlu1 %569 }
 0x430   :  { %4717 = vrcp.f32 %v570_v25  ;;  %v4660_v25 = vld [vmem:[%s3783_s17] ss:$8 sps:$4 sm:$0xff]  }
 0x433   :  { %v573_v26 = vpop.xlane.xlu1 %572 }
 0x434   :  { %4719 = vrcp.f32 %v573_v26  ;;  %v4663_v26 = vld [vmem:[%s3790_s22 + $0x8] sm:$0xff]   ;;  %s3795_s22 = sld [smem:[%s5771_s0 + %s4829_s19]]   ;;  %s4838_s19 = smov 28  }
 0x437   :  { %v586_v27 = vpop.permute.xlu1 %585 }
 0x438   :  { %4214 = vmatprep.subr.bf16.mxu1 %v586_v27 }
 0x439   :  { %4215 = vmatpush3.bf16.msra.mxu1 %v586_v27  ;;  %v4716_v28 = vpop.eup %4715 }
 0x43a   :  { %v582_v31 = vmul.f32 %v4716_v28, %v4710_v18  ;;  %4220 = vmatprep.subr.bf16.mxu1 %v4639_v36  ;;  %v965_v18 = vpack.c.bf16 %v961_v16, %v959_v15 }
 0x43c   :  { %v584_v35 = vpack.c.bf16 %v582_v31, %v582_v31 }
 0x43d   :  { %v4718_v29 = vpop.eup %4717 }
 0x43e   :  { %v580_v32 = vmul.f32 %v4718_v29, %v4712_v20  ;;  %v960_v20 = vld [vmem:[%s4964_s13 + $0x30] sm:$0xff]  ;;  %v3857_v29 = vld [vmem:[%s3782_s27] ss:$0 sm:$0xff]  ;;  %s3793_s13 = sld [smem:[%s5771_s0 + %s4827_s10]]   ;;  %s4836_s10 = smov 26  }
 0x43f   :  { %v964_v21 = vpack.c.bf16 %v960_v20, %v958_v19  ;;  %v1271_v20 = vld [vmem:[%s3797_s5 + $0x8] sm:$0xff]  ;;  %s5092_s27 = sld [smem:[%s5771_s0 + %s4830_s24]]   ;;  %s4839_s24 = smov 30  }
 0x441   :  { %v4720_v30 = vpop.eup %4719 }
 0x442   :  { %v581_v33 = vmul.f32 %v4720_v30, %v4714_v22  ;;  %v4659_v22 = vld [vmem:[%s3783_s17 + $0x14] ss:$8 sps:$4 sm:$0xff]   ;;  %s3792_s17 = sld [smem:[%s5771_s0 + %s4828_s14]]   ;;  %s4837_s14 = smov 34  }
 0x444   :  { %v583_v34 = vpack.c.bf16 %v581_v33, %v580_v32 }
 0x446   :  { %4216 = vmatprep.mubr.msk.bf16.mxu1 %vm549_vm1, %v583_v34 }
 0x447   :  { %4217 = vmatmul.mubr.msk.bf16.vlgmr.msra.gmra.mxu1 %vm549_vm1, %v584_v35 }
 0x448   :  { %4221 = vmatpush3.bf16.msra.mxu1 %v4639_v36 }
 0x449   :  { %4222 = vmatprep.subr.bf16.mxu1 %v4640_v37 }
 0x44c   :  { %4223 = vmatpush3.bf16.msra.mxu1 %v4640_v37 }
 0x44d   :  { %885 = vmatprep.subr.bf16.mxu1 %v4659_v22 }
 0x507   :  { %v4937_v39 = vpop.f32.mrf.mxu1 }
 0x508   :  { %v649_v44 = vpack.c.bf16 %v4937_v39, %v4937_v39 }
 0x509   :  { %v4939_v40 = vpop.f32.mrf.mxu1 }
 0x50b   :  { %v4219_v41 = vpop.f32.mrf.mxu1 }
 0x50d   :  { %v4941_v42 = vpop.f32.mrf.mxu1 }
 0x50e   :  { %v648_v43 = vpack.c.bf16 %v4941_v42, %v4939_v40 }
 0x510   :  { %4224 = vmatprep.mubr.msk.bf16.mxu1 %vm417_vm0, %v648_v43 }
 0x511   :  { %4225 = vmatmul.mubr.msk.bf16.vlgmr.msra.gmra.mxu1 %vm417_vm0, %v649_v44 }
 0x512   :  { %905 = vmatprep.mubr.bf16.mxu1 %v4818_v48  ;;  %886 = vmatpush1.bf16.msra.mxu1 %v4657_v23 }
 0x513   :  { %887 = vmatprep.subr.bf16.mxu1 %v4662_v24 }
 0x516   :  { %888 = vmatpush1.bf16.msra.mxu1 %v4660_v25  ;;  %v1273_v25 = vld [vmem:[%s3797_s5 + $0x18] sm:$0xff] }
 0x517   :  { %4240 = vmatprep.subr.bf16.mxu1 %v4663_v26 }
 0x5d1   :  { %v4226_v49 = vpop.f32.mrf.mxu1 }
 0x5d2   :  { %v722_v52 = vadd.f32 %v4226_v49, %v3852_v50 }
 0x5d3   :  { %v713_v51 = vpop.f32.mrf.mxu1 }
 0x5d4   :  { %v714_v54 = vadd.f32 %v3852_v50, %v713_v51  ;;  %v729_v57 = vmax.f32 %v722_v52, 0.0 }
 0x5d5   :  { %v4227_v53 = vpop.f32.mrf.mxu1 }
 0x5d6   :  { %v727_v60 = vmax.f32 %v714_v54, 0.0  ;;  %v731_v1 = vpack.c.bf16 %v729_v57, %v729_v57 }
 0x5d7   :  { %v716_v55 = vpop.f32.mrf.mxu1 }
 0x5d8   :  { %v717_v56 = vadd.f32 %v3852_v50, %v716_v55 }
 0x5da   :  { %v728_v61 = vmax.f32 %v717_v56, 0.0 }
 0x5dc   :  { %v730_v62 = vpack.c.bf16 %v728_v61, %v727_v60 }
 0x5de   :  { %4236 = vmatprep.mubr.msk.bf16.mxu0 %vm771_vm3, %v730_v62 }
 0x5df   :  { %4237 = vmatmul.mubr.msk.bf16.vlgmr.msra.gmra.mxu0 %vm771_vm3, %v731_v1 }
 0x5e0   :  { %1076 = vmatpush1.bf16.msra.mxu0 %v4645_v63  ;;  %3883 = vmatprep.mubr.msk.bf16.mxu0 %vm771_vm3, %v963_v0 }
 0x5e1   :  { %1077 = vmatprep.subr.bf16.mxu0 %v4818_v48 }
 0x5e4   :  { %1078 = vmatpush1.bf16.msra.mxu0 %v4646_v2 }
 0x5e5   :  { %1079 = vmatprep.subr.bf16.mxu0 %v4818_v48 }
 0x5e8   :  { %1080 = vmatpush1.bf16.msra.mxu0 %v4647_v3 }
 0x5e9   :  { %1081 = vmatprep.subr.bf16.mxu0 %v4818_v48 }
 0x5ec   :  { %1082 = vmatpush1.bf16.msra.mxu0 %v4648_v4 }
 0x5ed   :  { %1083 = vmatprep.subr.bf16.mxu0 %v4818_v48 }
 0x5f0   :  { %1084 = vmatpush1.bf16.msra.mxu0 %v4649_v5 }
 0x5f1   :  { %1085 = vmatprep.subr.bf16.mxu0 %v4818_v48 }
 0x5f4   :  { %1086 = vmatpush1.bf16.msra.mxu0 %v4650_v6 }
 0x5f5   :  { %1087 = vmatprep.subr.bf16.mxu0 %v4818_v48 }
 0x5f8   :  { %1088 = vmatpush1.bf16.msra.mxu0 %v4651_v7 }
 0x5f9   :  { %1089 = vmatprep.subr.bf16.mxu0 %v4818_v48 }
 0x5fc   :  { %1090 = vmatpush1.bf16.msra.mxu0 %v4652_v8 }
 0x5fd   :  { %1099 = vmatprep.subr.bf16.mxu0 %v4818_v48 }
 0x600   :  { %1100 = vmatpush2.bf16.msra.mxu0 %v4653_v9 }
 0x601   :  { %1101 = vmatprep.subr.bf16.mxu0 %v4818_v48 }
 0x604   :  { %1102 = vmatpush2.bf16.msra.mxu0 %v4654_v10 }
 0x605   :  { %1103 = vmatprep.subr.bf16.mxu0 %v4818_v48 }
 0x608   :  { %1104 = vmatpush2.bf16.msra.mxu0 %v4655_v11 }
 0x609   :  { %1105 = vmatprep.subr.bf16.mxu0 %v4818_v48 }
 0x60c   :  { %1106 = vmatpush2.bf16.msra.mxu0 %v4656_v12 }
 0x60f   :  { %1108 = vmatmul.mubr.bf16.vlgmr.msra.gmra.mxu0 %v962_v17  ;;  %v1272_v17 = vld [vmem:[%s3797_s5 + $0x10] sm:$0xff]  ;;  %s3799_s5 = sld [smem:[%s5771_s0 + %s4834_s2]]   ;;  %s4841_s2 = smov 32  }
 0x610   :  { %3884 = vmatprep.mubr.msk.bf16.mxu0 %vm771_vm3, %v965_v18 }
 0x617   :  { %1116 = vmatmul.mubr.bf16.gmra.mxu0 %v964_v21 }
 0x69f   :  { %v4238_v27 = vpop.f32.mrf.mxu0 }
 0x6a0   :  { %v821_v36 = vadd.f32 %v4238_v27, %v3857_v29 }
 0x6a1   :  { %v812_v28 = vpop.f32.mrf.mxu0 }
 0x6a2   :  { %v813_v31 = vadd.f32 %v3857_v29, %v812_v28  ;;  %v828_v41 = vadd.f32 %v4937_v39, %v821_v36 }
 0x6a3   :  { %v4239_v30 = vpop.f32.mrf.mxu0 }
 0x6a4   :  { %v826_v34 = vadd.f32 %v813_v31, %v4939_v40  ;;  %v830_v43 = vpack.c.bf16 %v828_v41, %v828_v41 }
 0x6a5   :  { %v815_v32 = vpop.f32.mrf.mxu0 }
 0x6a6   :  { %v816_v33 = vadd.f32 %v3857_v29, %v815_v32 }
 0x6a8   :  { %v827_v35 = vadd.f32 %v816_v33, %v4941_v42  ;;  %v3870_v42 = vld [vmem:[%s3789_s1] ss:$0 sm:$0xff]  ;;  %s3794_s1 = sld [smem:[%s5771_s0 + %s4833_s28]]   ;;  %s4840_s28 = smov 37  }
 0x6aa   :  { %v829_v37 = vpack.c.bf16 %v827_v35, %v826_v34 }
 0x6ac   :  { %3868 = vmatmul.mubr.msk.bf16.vlgmr.msra.gmra.mxu1 %vm417_vm0, %v829_v37 }
 0x6ad   :  { %915 = vmatprep.mubr.bf16.mxu1 %v4818_v48  ;;  %4241 = vmatpush3.bf16.msra.mxu1 %v4663_v26 }
 0x6ae   :  { %4242 = vmatprep.subr.bf16.mxu1 %v4664_v38 }
 0x6b1   :  { %4243 = vmatpush3.bf16.msra.mxu1 %v4664_v38 }
 0x6b4   :  { %3869 = vmatmul.mubr.msk.bf16.gmra.mxu1 %vm417_vm0, %v830_v43 }
 0x6cf   :  { %v1109_v40 = vpop.f32.mrf.mxu0 }
 0x6d0   :  { %v1110_v46 = vadd.f32 %v3870_v42, %v1109_v40 }
 0x6d1   :  { %v1111_v44 = vpop.f32.mrf.mxu0 }
 0x6d3   :  { %v1112_v45 = vpop.f32.mrf.mxu0 }
 0x6d4   :  { %v1113_v47 = vadd.f32 %v3870_v42, %v1112_v45 }
 0x6d5   :  { %v1114_v49 = vpop.f32.mrf.mxu0 }
 0x6d6   :  { %v1124_v50 = vpack.c.bf16 %v1113_v47, %v1110_v46 }
 0x6d7   :  { %v1117_v51 = vpop.f32.mrf.mxu0 }
 0x6d8   :  { %4244 = vmatprep.mubr.msk.bf16.mxu1 %vm417_vm0, %v1124_v50  ;;  %v1118_v53 = vadd.f32 %v3870_v42, %v1117_v51 }
 0x6d9   :  { %v1119_v39 = vpop.f32.mrf.mxu0 }
 0x6db   :  { %v1120_v52 = vpop.f32.mrf.mxu0 }
 0x6dc   :  { %v1121_v54 = vadd.f32 %v3870_v42, %v1120_v52 }
 0x6dd   :  { %v1122_v55 = vpop.f32.mrf.mxu0 }
 0x6de   :  { %v1125_v56 = vpack.c.bf16 %v1121_v54, %v1118_v53 }
 0x6e0   :  { %4245 = vmatmul.mubr.msk.bf16.vlgmr.msra.gmra.mxu1 %vm417_vm0, %v1125_v56 }
 0x76c   :  { %v5021_v57 = vpop.f32.mrf.mxu1 }
 0x76e   :  { %v5023_v58 = vpop.f32.mrf.mxu1 }
 0x770   :  { %v5025_v59 = vpop.f32.mrf.mxu1 }
 0x772   :  { %v5027_v60 = vpop.f32.mrf.mxu1 }
 0x774   :  { %v5029_v61 = vpop.f32.mrf.mxu1 }
 0x776   :  { %v5031_v62 = vpop.f32.mrf.mxu1 }
 0x778   :  { %v921_v63 = vpop.f32.mrf.mxu1 }
 0x77a   :  { %v922_v0 = vpop.f32.mrf.mxu1 }
 0x7a0   :  { %v4246_v1 = vpop.f32.mrf.mxu1 }
 0x7a2   :  { %v1182_v2 = vpop.f32.mrf.mxu1 }
 0x7a4   :  { %v4247_v3 = vpop.f32.mrf.mxu1 }
 0x7a5   :  { %v5033_v4 = vpack.c.bf16 %v4247_v3, %v4246_v1 }
 0x7a6   :  { %v1185_v5 = vpop.f32.mrf.mxu1 }
 0x7a7   :  { %v5035_v6 = vpack.c.bf16 %v1185_v5, %v1182_v2  ;;  %1203 = vrot.lane.b32.xlu0 %v5033_v4, %s4812_s18 }
 0x7a9   :  { %1201 = vrot.lane.b32.xlu1 %v5035_v6, %s4812_s18  ;;  %4252 = vmatprep.mubr.msk.bf16.mxu1 %vm417_vm0, %v5035_v6 }
 0x819   :  { %v1204_v7 = vpop.permute.xlu0 %1203 }
 0x81a   :  { %v1215_v8 = vsel %vm417_vm0, %v1204_v7, 0  ;;  %4555 = vmatprep.subr.msk.bf16.mxu1 %vm417_vm0, %v1204_v7 }
 0x81b   :  { %4249 = vmatpush3.bf16.xpose.msra.mxu1 %v1215_v8  ;;  %v1202_v9 = vpop.permute.xlu1 %1201 }
 0x81c   :  { %4556 = vmatprep.subr.msk.bf16.mxu1 %vm417_vm0, %v1202_v9  ;;  %v1212_v10 = vsel %vm417_vm0, %v1202_v9, 0 }
 0x823   :  { %4251 = vmatpush3.bf16.xpose.msra.mxu1 %v1212_v10  ;;  %v4665_v10 = vld [vmem:[%s3791_s9 + $0x8] sm:$0xff]  }
 0x82a   :  { %4253 = vmatmul.mubr.msk.bf16.vlgmr.msra.gmra.mxu1 %vm417_vm0, %v5033_v4 }
 0x8ea   :  { %v4254_v11 = vpop.f32.mrf.mxu1 }
 0x8eb   :  { %v1268_v14 = vmul.f32 0.17677669, %v4254_v11  ;;  %v4666_v11 = vld [vmem:[%s3791_s9] sm:$0xff]   ;;  %s3802_s9 = sld [smem:[%s5771_s0 + %s4835_s6]]   ;;  %s4842_s6 = smov 29  }
 0x8ec   :  { %v1251_v12 = vpop.f32.mrf.mxu1 }
 0x8ed   :  { %v1266_v15 = vmul.f32 0.17677669, %v1251_v12  ;;  %v1276_v24 = vadd.f32 %v1272_v17, %v1268_v14  ;;  %v4667_v12 = vld [vmem:[%s3793_s13 + $0x18] sm:$0xff]  }
 0x8ee   :  { %v4255_v16 = vpop.f32.mrf.mxu1  ;;  %4272 = vmatprep.subr.bf16.mxu0 %v4667_v12 }
 0x8ef   :  { %v1274_v18 = vadd.f32 %v1270_v13, %v1266_v15  ;;  %v1269_v21 = vmul.f32 0.17677669, %v4255_v16  ;;  %v1284_v27 = vsel %vm417_vm0, %v1276_v24, -inf  ;;  %4273 = vmatpush3.bf16.msra.mxu0 %v4667_v12 }
 0x8f0   :  { %v1254_v19 = vpop.f32.mrf.mxu1 }
 0x8f1   :  { %v1267_v22 = vmul.f32 0.17677669, %v1254_v19  ;;  %v1278_v23 = vsel %vm417_vm0, %v1274_v18, -inf  ;;  %v1277_v29 = vadd.f32 %v1273_v25, %v1269_v21  ;;  %v4668_v19 = vld [vmem:[%s3793_s13 + $0x10] sm:$0xff]   ;;  %v4670_v21 = vld [vmem:[%s3793_s13] sm:$0xff]  }
 0x8f2   :  { %1279 = vmax.xlane.f32.xlu1 %v1278_v23  ;;  %4274 = vmatprep.subr.bf16.mxu0 %v4668_v19 }
 0x8f3   :  { %v1275_v26 = vadd.f32 %v1271_v20, %v1267_v22  ;;  %v1287_v30 = vsel %vm417_vm0, %v1277_v29, -inf  ;;  %4275 = vmatpush3.bf16.msra.mxu0 %v4668_v19  ;;  %v4669_v20 = vld [vmem:[%s3793_s13 + $0x8] sm:$0xff]   ;;  %s3801_s13 = sld [smem:[%s5771_s0 + %s4836_s10]]   ;;  %s4843_s10 = smov 36  }
 0x8f4   :  { %4276 = vmatprep.subr.bf16.mxu0 %v4669_v20 }
 0x8f5   :  { %v1281_v28 = vsel %vm417_vm0, %v1275_v26, -inf }
 0x8f6   :  { %1285 = vmax.xlane.f32.xlu1 %v1284_v27  ;;  %1282 = vmax.xlane.f32.xlu0 %v1281_v28 }
 0x8f7   :  { %4277 = vmatpush3.bf16.msra.mxu0 %v4669_v20 }
 0x8f8   :  { %4278 = vmatprep.subr.bf16.mxu0 %v4670_v21 }
 0x8fa   :  { %1288 = vmax.xlane.f32.xlu1 %v1287_v30 }
 0x8fb   :  { %4279 = vmatpush3.bf16.msra.mxu0 %v4670_v21 }
 0x97b   :  { %v1280_v31 = vpop.xlane.xlu1 %1279 }
 0x97c   :  { %v1290_v32 = vsub.f32 %v1274_v18, %v1280_v31 }
 0x97e   :  { %v1294_v36 = vmul.f32 1.442695, %v1290_v32 }
 0x97f   :  { %v1286_v33 = vpop.xlane.xlu1 %1285  ;;  %v1283_v34 = vpop.xlane.xlu0 %1282 }
 0x980   :  { %v1292_v35 = vsub.f32 %v1276_v24, %v1286_v33  ;;  %v1291_v38 = vsub.f32 %v1275_v26, %v1283_v34  ;;  %v3893_v24 = vld [vmem:[%s3792_s17] ss:$0 sm:$0xff]  ;;  %s5199_s17 = sld [smem:[%s5771_s0 + %s4837_s14]]   ;;  %s4844_s14 = smov 39  }
 0x982   :  { %v1298_v37 = vmul.f32 1.442695, %v1292_v35  ;;  %v1296_v40 = vmul.f32 1.442695, %v1291_v38  ;;  %v4671_v38 = vld [vmem:[%s3795_s22 + $0x10] ss:$8 sps:$4 sm:$0xff]  }
 0x983   :  { %v1289_v41 = vpop.xlane.xlu1 %1288 }
 0x984   :  { %4721 = vpow2.f32 %v1298_v37  ;;  %v1293_v43 = vsub.f32 %v1277_v29, %v1289_v41  ;;  %v4673_v37 = vld [vmem:[%s3795_s22 + $0x14] ss:$8 sps:$4 sm:$0xff]   ;;  %v4676_v41 = vld [vmem:[%s3795_s22 + $0x4] ss:$8 sps:$4 sm:$0xff]  }
 0x985   :  { %4723 = vpow2.f32 %v1294_v36 }
 0x986   :  { %v1300_v42 = vmul.f32 1.442695, %v1293_v43  ;;  %v4674_v43 = vld [vmem:[%s3795_s22] ss:$8 sps:$4 sm:$0xff]   ;;  %s5228_s22 = sld [smem:[%s5771_s0 + %s4838_s19]]   ;;  %s4845_s19 = smov 31  }
 0x988   :  { %4725 = vpow2.f32 %v1300_v42 }
 0x989   :  { %4727 = vpow2.f32 %v1296_v40  ;;  %v4831_v40 = vmov 0.0  }
 0x98a   :  { %4312 = vmatprep.subr.bf16.mxu0 %v4831_v40 }
 0x991   :  { %v4722_v44 = vpop.eup %4721 }
 0x992   :  { %v1308_v45 = vsel %vm417_vm0, %v4722_v44, 0.0  ;;  %v4724_v46 = vpop.eup %4723 }
 0x993   :  { %1309 = vadd.xlane.f32.xlu1 %v1308_v45  ;;  %v1302_v49 = vsel %vm417_vm0, %v4724_v46, 0.0  ;;  %v3898_v45 = vld [vmem:[%s3794_s1] ss:$0 sm:$0xff]  ;;  %s5288_s1 = sld [smem:[%s5771_s0 + %s4840_s28]]  }
 0x994   :  { %s5561_s28 = sld [smem:[%s5771_s0 + %s4854_s26]]  }
 0x995   :  { %v4726_v47 = vpop.eup %4725 }
 0x996   :  { %v1311_v50 = vsel %vm417_vm0, %v4726_v47, 0.0  ;;  %v4728_v51 = vpop.eup %4727 }
 0x997   :  { %1303 = vadd.xlane.f32.xlu1 %v1302_v49  ;;  %1312 = vadd.xlane.f32.xlu0 %v1311_v50  ;;  %v1305_v39 = vsel %vm417_vm0, %v4728_v51, 0.0 }
 0x99b   :  { %1306 = vadd.xlane.f32.xlu0 %v1305_v39 }
 0x9a8   :  { %1326 = vrot.lane.b32.xlu1 %v5033_v4, %s4814_s23 }
 0x9b1   :  { %1324 = vrot.lane.b32.xlu0 %v5035_v6, %s4814_s23 }
 0xa1c   :  { %v1310_v52 = vpop.xlane.xlu1 %1309 }
 0xa20   :  { %v1304_v53 = vpop.xlane.xlu1 %1303  ;;  %v1313_v54 = vpop.xlane.xlu0 %1312 }
 0xa21   :  { %4729 = vrcp.f32 %v1313_v54 }
 0xa22   :  { %4731 = vrcp.f32 %v1304_v53 }
 0xa23   :  { %4733 = vrcp.f32 %v1310_v52  ;;  %v4677_v52 = vld [vmem:[%s5092_s27 + $0x38] sm:$0xff]  }
 0xa24   :  { %v1327_v55 = vpop.permute.xlu1 %1326  ;;  %v1307_v56 = vpop.xlane.xlu0 %1306 }
 0xa25   :  { %4735 = vrcp.f32 %v1307_v56  ;;  %4256 = vmatprep.subr.bf16.mxu1 %v1327_v55  ;;  %v4678_v56 = vld [vmem:[%s5092_s27 + $0x30] sm:$0xff]  }
 0xa26   :  { %4257 = vmatpush3.bf16.msra.mxu1 %v1327_v55 }
 0xa28   :  { %v1325_v63 = vpop.permute.xlu0 %1324 }
 0xa29   :  { %4258 = vmatprep.subr.bf16.mxu1 %v1325_v63 }
 0xa2a   :  { %4259 = vmatpush3.bf16.msra.mxu1 %v1325_v63 }
 0xa2b   :  { %4264 = vmatprep.subr.bf16.mxu1 %v4665_v10 }
 0xa2e   :  { %v4730_v0 = vpop.eup %4729 }
 0xa2f   :  { %v4732_v1 = vpop.eup %4731  ;;  %v1321_v4 = vmul.f32 %v4730_v0, %v4726_v47 }
 0xa30   :  { %v4734_v2 = vpop.eup %4733  ;;  %v1318_v5 = vmul.f32 %v4732_v1, %v4724_v46  ;;  %v4679_v1 = vld [vmem:[%s5092_s27 + $0x28] sm:$0xff]  }
 0xa31   :  { %v1320_v7 = vmul.f32 %v4734_v2, %v4722_v44 }
 0xa32   :  { %v4736_v3 = vpop.eup %4735 }
 0xa33   :  { %v1319_v6 = vmul.f32 %v4736_v3, %v4728_v51  ;;  %v1323_v9 = vpack.c.bf16 %v1321_v4, %v1320_v7  ;;  %v4680_v3 = vld [vmem:[%s5092_s27 + $0x20] sm:$0xff]   ;;  %v4682_v4 = vld [vmem:[%s5092_s27 + $0x10] sm:$0xff]  }
 0xa34   :  { %v1706_v7 = vld [vmem:[%s3799_s5] sm:$0xff] }
 0xa35   :  { %v1322_v8 = vpack.c.bf16 %v1319_v6, %v1318_v5  ;;  %v4683_v5 = vld [vmem:[%s5092_s27 + $0x8] sm:$0xff]   ;;  %v4684_v6 = vld [vmem:[%s5092_s27] sm:$0xff]  }
 0xa37   :  { %4260 = vmatprep.mubr.msk.bf16.mxu1 %vm417_vm0, %v1322_v8  ;;  %v1707_v8 = vld [vmem:[%s3799_s5 + $0x8] sm:$0xff] }
 0xa38   :  { %4261 = vmatmul.mubr.msk.bf16.vlgmr.msra.gmra.mxu1 %vm417_vm0, %v1323_v9  ;;  %v1712_v9 = vpack.c.bf16 %v1707_v8, %v1706_v7 }
 0xa39   :  { %4265 = vmatpush3.bf16.msra.mxu1 %v4665_v10  ;;  %v1708_v10 = vld [vmem:[%s3799_s5 + $0x10] sm:$0xff] }
 0xa3a   :  { %4266 = vmatprep.subr.bf16.mxu1 %v4666_v11 }
 0xa3d   :  { %4267 = vmatpush3.bf16.msra.mxu1 %v4666_v11  ;;  %v1709_v11 = vld [vmem:[%s3799_s5 + $0x18] sm:$0xff] }
 0xa3e   :  { %1625 = vmatprep.subr.bf16.mxu1 %v4673_v37  ;;  %v1713_v12 = vpack.c.bf16 %v1709_v11, %v1708_v10 }
 0xaf8   :  { %v5072_v13 = vpop.f32.mrf.mxu1 }
 0xafa   :  { %v1370_v14 = vpop.f32.mrf.mxu1 }
 0xafc   :  { %v5074_v15 = vpop.f32.mrf.mxu1 }
 0xafd   :  { %v1386_v18 = vpack.c.bf16 %v5074_v15, %v5072_v13 }
 0xafe   :  { %v1373_v16 = vpop.f32.mrf.mxu1 }
 0xaff   :  { %v1385_v17 = vpack.c.bf16 %v1373_v16, %v1370_v14 }
 0xb01   :  { %4268 = vmatprep.mubr.msk.bf16.mxu1 %vm417_vm0, %v1385_v17  ;;  %v4686_v17 = vld [vmem:[%s3802_s9] sm:$0xff]  }
 0xb02   :  { %4269 = vmatmul.mubr.msk.bf16.vlgmr.msra.gmra.mxu1 %vm417_vm0, %v1386_v18 }
 0xb03   :  { %1645 = vmatprep.mubr.bf16.mxu1 %v4818_v48  ;;  %1626 = vmatpush1.bf16.msra.mxu1 %v4671_v38 }
 0xb04   :  { %1627 = vmatprep.subr.bf16.mxu1 %v4676_v41 }
 0xb07   :  { %1628 = vmatpush1.bf16.msra.mxu1 %v4674_v43 }
 0xb08   :  { %4284 = vmatprep.subr.bf16.mxu1 %v4831_v40 }
 0xbc2   :  { %v4270_v22 = vpop.f32.mrf.mxu1 }
 0xbc3   :  { %v1459_v28 = vadd.f32 %v4270_v22, %v3893_v24 }
 0xbc4   :  { %v1450_v23 = vpop.f32.mrf.mxu1 }
 0xbc5   :  { %v1451_v26 = vadd.f32 %v3893_v24, %v1450_v23  ;;  %v1467_v34 = vmax.f32 %v1459_v28, 0.0 }
 0xbc6   :  { %v4271_v25 = vpop.f32.mrf.mxu1 }
 0xbc7   :  { %v1462_v27 = vadd.f32 %v4271_v25, %v3893_v24  ;;  %v1465_v32 = vmax.f32 %v1451_v26, 0.0 }
 0xbc8   :  { %v1453_v29 = vpop.f32.mrf.mxu1 }
 0xbc9   :  { %v1454_v30 = vadd.f32 %v3893_v24, %v1453_v29  ;;  %v1468_v31 = vmax.f32 %v1462_v27, 0.0  ;;  %v3911_v27 = vld [vmem:[%s3801_s13] ss:$0 sm:$0xff]  ;;  %s5309_s13 = sld [smem:[%s5771_s0 + %s4843_s10]]  }
 0xbca   :  { %s5611_s10 = sld [smem:[%s5771_s0 + %s4857_s7]]  }
 0xbcb   :  { %v1466_v33 = vmax.f32 %v1454_v30, 0.0  ;;  %v1470_v36 = vpack.c.bf16 %v1468_v31, %v1467_v34 }
 0xbcd   :  { %v1469_v35 = vpack.c.bf16 %v1466_v33, %v1465_v32 }
 0xbcf   :  { %4280 = vmatprep.mubr.msk.bf16.mxu0 %vm771_vm3, %v1469_v35 }
 0xbd0   :  { %4281 = vmatmul.mubr.msk.bf16.vlgmr.msra.gmra.mxu0 %vm771_vm3, %v1470_v36 }
 0xbd1   :  { %4316 = vmatprep.mubr.msk.bf16.mxu0 %vm4832_vm4, %v4831_v40 }
 0xc90   :  { %v4282_v42 = vpop.f32.mrf.mxu0 }
 0xc91   :  { %v1559_v55 = vadd.f32 %v4282_v42, %v3898_v45 }
 0xc92   :  { %v1550_v44 = vpop.f32.mrf.mxu0 }
 0xc93   :  { %v1551_v47 = vadd.f32 %v3898_v45, %v1550_v44  ;;  %v1567_v0 = vadd.f32 %v5072_v13, %v1559_v55  ;;  %v1710_v13 = vld [vmem:[%s3799_s5 + $0x20] sm:$0xff] }
 0xc94   :  { %v4283_v46 = vpop.f32.mrf.mxu0 }
 0xc95   :  { %v1565_v51 = vadd.f32 %v1551_v47, %v1370_v14  ;;  %v1562_v53 = vadd.f32 %v4283_v46, %v3898_v45  ;;  %v1711_v14 = vld [vmem:[%s3799_s5 + $0x28] sm:$0xff]  ;;  %s5294_s5 = sld [smem:[%s5771_s0 + %s4841_s2]]  }
 0xc96   :  { %v1553_v49 = vpop.f32.mrf.mxu0  ;;  %s5575_s2 = sld [smem:[%s5771_s0 + %s4855_s29]]  }
 0xc97   :  { %v1554_v50 = vadd.f32 %v3898_v45, %v1553_v49  ;;  %v1568_v63 = vadd.f32 %v5074_v15, %v1562_v53  ;;  %v1714_v15 = vpack.c.bf16 %v1711_v14, %v1710_v13  ;;  %v2021_v13 = vld [vmem:[%s5199_s17] sm:$0xff] }
 0xc99   :  { %v1566_v39 = vadd.f32 %v1554_v50, %v1373_v16  ;;  %v1570_v2 = vpack.c.bf16 %v1568_v63, %v1567_v0  ;;  %v4685_v16 = vld [vmem:[%s3802_s9 + $0x8] sm:$0xff]   ;;  %s3804_s9 = sld [smem:[%s5771_s0 + %s4842_s6]]  }
 0xc9a   :  { %4313 = vmatpush3.bf16.msra.mxu0 %v4685_v16  ;;  %s5582_s6 = sld [smem:[%s5771_s0 + %s4856_s3]]  }
 0xc9b   :  { %v1569_v54 = vpack.c.bf16 %v1566_v39, %v1565_v51  ;;  %4314 = vmatprep.subr.bf16.mxu0 %v4831_v40 }
 0xc9d   :  { %3909 = vmatmul.mubr.msk.bf16.vlgmr.msra.gmra.mxu1 %vm417_vm0, %v1569_v54 }
 0xc9e   :  { %4285 = vmatpush3.bf16.msra.mxu1 %v4677_v52  ;;  %1655 = vmatprep.mubr.bf16.mxu1 %v4818_v48  ;;  %v4681_v48 = vld [vmem:[%s5092_s27 + $0x18] sm:$0xff]   ;;  %s5249_s27 = sld [smem:[%s5771_s0 + %s4839_s24]]   ;;  %s4846_s24 = smov 38  }
 0xc9f   :  { %4286 = vmatprep.subr.bf16.mxu1 %v4831_v40  ;;  %4315 = vmatpush3.bf16.msra.mxu0 %v4686_v17 }
 0xca0   :  { %4328 = vmatprep.subr.bf16.mxu0 %v4831_v40 }
 0xca2   :  { %4287 = vmatpush3.bf16.msra.mxu1 %v4678_v56 }
 0xca3   :  { %4288 = vmatprep.subr.bf16.mxu1 %v4831_v40 }
 0xca5   :  { %3910 = vmatmul.mubr.msk.bf16.gmra.mxu1 %vm417_vm0, %v1570_v2 }
 0xca6   :  { %4289 = vmatpush3.bf16.msra.mxu1 %v4679_v1  ;;  %4300 = vmatprep.mubr.msk.bf16.mxu1 %vm4832_vm4, %v4831_v40 }
 0xca7   :  { %4290 = vmatprep.subr.bf16.mxu1 %v4831_v40 }
 0xcaa   :  { %4291 = vmatpush3.bf16.msra.mxu1 %v4680_v3 }
 0xcab   :  { %4292 = vmatprep.subr.bf16.mxu1 %v4831_v40 }
 0xcae   :  { %4293 = vmatpush3.bf16.msra.mxu1 %v4681_v48 }
 0xcaf   :  { %4294 = vmatprep.subr.bf16.mxu1 %v4831_v40 }
 0xcb2   :  { %4295 = vmatpush3.bf16.msra.mxu1 %v4682_v4 }
 0xcb3   :  { %4296 = vmatprep.subr.bf16.mxu1 %v4831_v40 }
 0xcb6   :  { %4297 = vmatpush3.bf16.msra.mxu1 %v4683_v5 }
 0xcb7   :  { %4298 = vmatprep.subr.bf16.mxu1 %v4831_v40 }
 0xcba   :  { %4299 = vmatpush3.bf16.msra.mxu1 %v4684_v6 }
 0xcbb   :  { %4346 = vmatprep.subr.bf16.mxu1 %v4831_v40 }
 0xcbd   :  { %4301 = vmatmul.mubr.bf16.vlgmr.msra.gmra.mxu1 %v1712_v9 }
 0xcbe   :  { %4304 = vmatprep.mubr.msk.bf16.mxu1 %vm4832_vm4, %v4831_v40 }
 0xcc5   :  { %4305 = vmatmul.mubr.bf16.gmra.mxu1 %v1713_v12 }
 0xcc6   :  { %4308 = vmatprep.mubr.msk.bf16.mxu1 %vm4832_vm4, %v4831_v40 }
 0xccd   :  { %4309 = vmatmul.mubr.bf16.gmra.mxu1 %v1714_v15 }
 0xcce   :  { %4352 = vmatprep.mubr.msk.bf16.mxu1 %vm4832_vm4, %v4831_v40 }
 0xd5d   :  { %v5138_v18 = vpop.f32.mrf.mxu1 }
 0xd5f   :  { %v5140_v19 = vpop.f32.mrf.mxu1 }
 0xd61   :  { %v5142_v20 = vpop.f32.mrf.mxu1 }
 0xd63   :  { %v5144_v21 = vpop.f32.mrf.mxu1 }
 0xd65   :  { %v5146_v22 = vpop.f32.mrf.mxu1 }
 0xd67   :  { %v5148_v23 = vpop.f32.mrf.mxu1 }
 0xd69   :  { %v5150_v24 = vpop.f32.mrf.mxu1 }
 0xd6b   :  { %v5155_v25 = vpop.f32.mrf.mxu1 }
 0xd7d   :  { %v1820_v26 = vpop.f32.mrf.mxu1 }
 0xd7e   :  { %v1821_v30 = vadd.f32 %v3911_v27, %v1820_v26  ;;  %v2022_v26 = vld [vmem:[%s5199_s17 + $0x8] sm:$0xff] }
 0xd7f   :  { %v4302_v28 = vpop.f32.mrf.mxu1 }
 0xd81   :  { %v1823_v29 = vpop.f32.mrf.mxu1 }
 0xd82   :  { %v1824_v31 = vadd.f32 %v3911_v27, %v1823_v29 }
 0xd83   :  { %v4303_v32 = vpop.f32.mrf.mxu1 }
 0xd84   :  { %v1843_v33 = vpack.c.bf16 %v1824_v31, %v1821_v30  ;;  %v2023_v32 = vld [vmem:[%s5199_s17 + $0x10] sm:$0xff] }
 0xd85   :  { %v1828_v34 = vpop.f32.mrf.mxu1 }
 0xd86   :  { %4317 = vmatmul.mubr.msk.bf16.vlgmr.msra.gmra.mxu0 %vm417_vm0, %v1843_v33  ;;  %v1829_v37 = vadd.f32 %v3911_v27, %v1828_v34 }
 0xd87   :  { %v4306_v35 = vpop.f32.mrf.mxu1  ;;  %4320 = vmatprep.mubr.msk.bf16.mxu0 %vm4832_vm4, %v4831_v40 }
 0xd89   :  { %v1831_v36 = vpop.f32.mrf.mxu1 }
 0xd8a   :  { %v1832_v38 = vadd.f32 %v3911_v27, %v1831_v36 }
 0xd8b   :  { %v4307_v41 = vpop.f32.mrf.mxu1 }
 0xd8c   :  { %v1844_v43 = vpack.c.bf16 %v1832_v38, %v1829_v37  ;;  %v2024_v38 = vld [vmem:[%s5199_s17 + $0x18] sm:$0xff] }
 0xd8d   :  { %v1836_v42 = vpop.f32.mrf.mxu1 }
 0xd8e   :  { %4321 = vmatmul.mubr.msk.bf16.gmra.mxu0 %vm417_vm0, %v1844_v43  ;;  %v1837_v46 = vadd.f32 %v3911_v27, %v1836_v42 }
 0xd8f   :  { %v4310_v44 = vpop.f32.mrf.mxu1  ;;  %4324 = vmatprep.mubr.msk.bf16.mxu0 %vm4832_vm4, %v4831_v40 }
 0xd91   :  { %v1839_v45 = vpop.f32.mrf.mxu1 }
 0xd92   :  { %v1840_v47 = vadd.f32 %v3911_v27, %v1839_v45 }
 0xd93   :  { %v4311_v49 = vpop.f32.mrf.mxu1 }
 0xd94   :  { %v1845_v50 = vpack.c.bf16 %v1840_v47, %v1837_v46  ;;  %v2025_v46 = vld [vmem:[%s5199_s17 + $0x20] sm:$0xff] }
 0xd96   :  { %4325 = vmatmul.mubr.msk.bf16.gmra.mxu0 %vm417_vm0, %v1845_v50 }
 0xd97   :  { %4334 = vmatprep.mubr.msk.bf16.mxu0 %vm4832_vm4, %v4831_v40 }
 0xe46   :  { %v1905_v51 = vpop.f32.mrf.mxu0 }
 0xe48   :  { %v4318_v39 = vpop.f32.mrf.mxu0 }
 0xe4a   :  { %v1908_v52 = vpop.f32.mrf.mxu0 }
 0xe4b   :  { %v5166_v53 = vpack.c.bf16 %v1908_v52, %v1905_v51  ;;  %v2026_v52 = vld [vmem:[%s5199_s17 + $0x28] sm:$0xff]  ;;  %s3814_s17 = sld [smem:[%s5771_s0 + %s4844_s14]]   ;;  %s4859_s14 = smov 44  }
 0xe4c   :  { %v4319_v54 = vpop.f32.mrf.mxu0 }
 0xe4d   :  { %1934 = vrot.lane.b32.xlu0 %v5166_v53, %s4812_s18 }
 0xe4e   :  { %v1913_v55 = vpop.f32.mrf.mxu0 }
 0xe50   :  { %v4322_v56 = vpop.f32.mrf.mxu0 }
 0xe52   :  { %v1916_v63 = vpop.f32.mrf.mxu0 }
 0xe53   :  { %v5174_v5 = vpack.c.bf16 %v1916_v63, %v1913_v55 }
 0xe54   :  { %v4323_v0 = vpop.f32.mrf.mxu0 }
 0xe56   :  { %v1921_v1 = vpop.f32.mrf.mxu0 }
 0xe58   :  { %v4326_v2 = vpop.f32.mrf.mxu0 }
 0xe5a   :  { %v1924_v3 = vpop.f32.mrf.mxu0 }
 0xe5b   :  { %v5170_v48 = vpack.c.bf16 %v1924_v3, %v1921_v1 }
 0xe5c   :  { %v4327_v4 = vpop.f32.mrf.mxu0 }
 0xe5d   :  { %1938 = vrot.lane.b32.xlu1 %v5170_v48, %s4812_s18 }
 0xe61   :  { %1936 = vrot.lane.b32.xlu1 %v5174_v5, %s4812_s18 }
 0xebf   :  { %v1935_v10 = vpop.permute.xlu0 %1934 }
 0xec0   :  { %v1950_v11 = vsel %vm417_vm0, %v1935_v10, 0 }
 0xecf   :  { %v1939_v6 = vpop.permute.xlu1 %1938 }
 0xed0   :  { %v1956_v7 = vsel %vm417_vm0, %v1939_v6, 0 }
 0xed1   :  { %4329 = vmatpush3.bf16.xpose.msra.mxu0 %v1956_v7 }
 0xed2   :  { %4330 = vmatprep.subr.bf16.mxu0 %v4831_v40 }
 0xed3   :  { %v1937_v8 = vpop.permute.xlu1 %1936 }
 0xed4   :  { %v1953_v9 = vsel %vm417_vm0, %v1937_v8, 0 }
 0xed9   :  { %4331 = vmatpush3.bf16.xpose.msra.mxu0 %v1953_v9 }
 0xeda   :  { %4332 = vmatprep.subr.bf16.mxu0 %v4831_v40 }
 0xee1   :  { %4333 = vmatpush3.bf16.xpose.msra.mxu0 %v1950_v11 }
 0xee2   :  { %4364 = vmatprep.subr.bf16.mxu0 %v4831_v40 }
 0xee8   :  { %4335 = vmatmul.mubr.msk.bf16.vlgmr.msra.gmra.mxu0 %vm417_vm0, %v5166_v53 }
 0xee9   :  { %4338 = vmatprep.mubr.msk.bf16.mxu0 %vm4832_vm4, %v4831_v40 }
 0xef0   :  { %4339 = vmatmul.mubr.msk.bf16.gmra.mxu0 %vm417_vm0, %v5174_v5 }
 0xef1   :  { %4342 = vmatprep.mubr.msk.bf16.mxu0 %vm4832_vm4, %v4831_v40 }
 0xef8   :  { %4343 = vmatmul.mubr.msk.bf16.gmra.mxu0 %vm417_vm0, %v5170_v48 }
 0xef9   :  { %4368 = vmatprep.mubr.msk.bf16.mxu0 %vm4832_vm4, %v4831_v40 }
 0xfa8   :  { %v1992_v12 = vpop.f32.mrf.mxu0 }
 0xfa9   :  { %v2015_v14 = vmul.f32 0.17677669, %v1992_v12 }
 0xfaa   :  { %v4336_v15 = vpop.f32.mrf.mxu0 }
 0xfab   :  { %v2027_v16 = vadd.f32 %v2021_v13, %v2015_v14 }
 0xfac   :  { %v1995_v17 = vpop.f32.mrf.mxu0 }
 0xfad   :  { %v2016_v27 = vmul.f32 0.17677669, %v1995_v17  ;;  %v2034_v28 = vsel %vm2033_vm5, %v2027_v16, -inf }
 0xfae   :  { %2035 = vmax.xlane.f32.xlu1 %v2034_v28  ;;  %v4337_v29 = vpop.f32.mrf.mxu0 }
 0xfaf   :  { %v2028_v30 = vadd.f32 %v2022_v26, %v2016_v27 }
 0xfb0   :  { %v2000_v31 = vpop.f32.mrf.mxu0 }
 0xfb1   :  { %v2017_v33 = vmul.f32 0.17677669, %v2000_v31  ;;  %v2037_v34 = vsel %vm2033_vm5, %v2028_v30, -inf }
 0xfb2   :  { %2038 = vmax.xlane.f32.xlu0 %v2037_v34  ;;  %v4340_v35 = vpop.f32.mrf.mxu0 }
 0xfb3   :  { %v2029_v36 = vadd.f32 %v2023_v32, %v2017_v33 }
 0xfb4   :  { %v2003_v37 = vpop.f32.mrf.mxu0 }
 0xfb5   :  { %v2018_v41 = vmul.f32 0.17677669, %v2003_v37  ;;  %v2040_v43 = vsel %vm2033_vm5, %v2029_v36, -inf }
 0xfb6   :  { %2041 = vmax.xlane.f32.xlu0 %v2040_v43  ;;  %v4341_v42 = vpop.f32.mrf.mxu0 }
 0xfb7   :  { %v2030_v44 = vadd.f32 %v2024_v38, %v2018_v41 }
 0xfb8   :  { %v2008_v45 = vpop.f32.mrf.mxu0 }
 0xfb9   :  { %v2019_v47 = vmul.f32 0.17677669, %v2008_v45  ;;  %v2043_v49 = vsel %vm2033_vm5, %v2030_v44, -inf }
 0xfba   :  { %2044 = vmax.xlane.f32.xlu1 %v2043_v49  ;;  %v4344_v50 = vpop.f32.mrf.mxu0 }
 0xfbb   :  { %v2031_v51 = vadd.f32 %v2025_v46, %v2019_v47 }
 0xfbc   :  { %v2011_v39 = vpop.f32.mrf.mxu0 }
 0xfbd   :  { %v2020_v54 = vmul.f32 0.17677669, %v2011_v39  ;;  %v2046_v55 = vsel %vm2033_vm5, %v2031_v51, -inf }
 0xfbe   :  { %2047 = vmax.xlane.f32.xlu0 %v2046_v55  ;;  %v4345_v56 = vpop.f32.mrf.mxu0 }
 0xfbf   :  { %v2032_v63 = vadd.f32 %v2026_v52, %v2020_v54 }
 0xfc1   :  { %v2049_v0 = vsel %vm2033_vm5, %v2032_v63, -inf }
 0xfc2   :  { %2050 = vmax.xlane.f32.xlu1 %v2049_v0 }
0x1037   :  { %v2036_v1 = vpop.xlane.xlu1 %2035 }
0x1038   :  { %v2052_v2 = vsub.f32 %v2027_v16, %v2036_v1 }
0x103a   :  { %v2058_v3 = vmul.f32 1.442695, %v2052_v2 }
0x103b   :  { %v2039_v4 = vpop.xlane.xlu0 %2038 }
0x103c   :  { %4737 = vpow2.f32 %v2058_v3  ;;  %v2053_v6 = vsub.f32 %v2028_v30, %v2039_v4 }
0x103e   :  { %v2060_v7 = vmul.f32 1.442695, %v2053_v6 }
0x103f   :  { %v2042_v8 = vpop.xlane.xlu0 %2041 }
0x1040   :  { %4739 = vpow2.f32 %v2060_v7  ;;  %v2054_v9 = vsub.f32 %v2029_v36, %v2042_v8  ;;  %v4688_v8 = vld [vmem:[%s5228_s22] sm:$0xff]  }
0x1042   :  { %v2062_v10 = vmul.f32 1.442695, %v2054_v9  ;;  %v4689_v9 = vld [vmem:[%s5249_s27 + $0x18] sm:$0xff]  }
0x1043   :  { %v2045_v11 = vpop.xlane.xlu1 %2044 }
0x1044   :  { %4741 = vpow2.f32 %v2062_v10  ;;  %v2055_v12 = vsub.f32 %v2030_v44, %v2045_v11  ;;  %v4690_v10 = vld [vmem:[%s5249_s27 + $0x10] sm:$0xff]  }
0x1046   :  { %v2064_v13 = vmul.f32 1.442695, %v2055_v12 }
0x1047   :  { %v2048_v14 = vpop.xlane.xlu0 %2047 }
0x1048   :  { %4743 = vpow2.f32 %v2064_v13  ;;  %v2056_v15 = vsub.f32 %v2031_v51, %v2048_v14 }
0x1049   :  { %v4738_v17 = vpop.eup %4737 }
0x104a   :  { %v2066_v26 = vmul.f32 1.442695, %v2056_v15  ;;  %v2070_v16 = vsel %vm2033_vm5, %v4738_v17, 0.0 }
0x104b   :  { %2071 = vadd.xlane.f32.xlu0 %v2070_v16  ;;  %v2051_v35 = vpop.xlane.xlu1 %2050 }
0x104c   :  { %4745 = vpow2.f32 %v2066_v26  ;;  %v2057_v36 = vsub.f32 %v2032_v63, %v2051_v35  ;;  %v4692_v35 = vld [vmem:[%s5249_s27] sm:$0xff]  }
0x104d   :  { %v4740_v27 = vpop.eup %4739 }
0x104e   :  { %v2073_v28 = vsel %vm2033_vm5, %v4740_v27, 0.0  ;;  %v2068_v37 = vmul.f32 1.442695, %v2057_v36  ;;  %v4693_v36 = vld [vmem:[%s5288_s1 + $0x18] sm:$0xff]  }
0x104f   :  { %2074 = vadd.xlane.f32.xlu1 %v2073_v28 }
0x1050   :  { %4747 = vpow2.f32 %v2068_v37  ;;  %v4697_v37 = vld [vmem:[%s5294_s5 + $0x8] sm:$0xff]  }
0x1051   :  { %v4742_v29 = vpop.eup %4741 }
0x1052   :  { %v2076_v30 = vsel %vm2033_vm5, %v4742_v29, 0.0 }
0x1053   :  { %2077 = vadd.xlane.f32.xlu0 %v2076_v30 }
0x1055   :  { %v4744_v31 = vpop.eup %4743 }
0x1056   :  { %v2079_v32 = vsel %vm2033_vm5, %v4744_v31, 0.0 }
0x1057   :  { %2080 = vadd.xlane.f32.xlu1 %v2079_v32 }
0x1059   :  { %v4746_v33 = vpop.eup %4745 }
0x105a   :  { %v2082_v34 = vsel %vm2033_vm5, %v4746_v33, 0.0 }
0x105b   :  { %2083 = vadd.xlane.f32.xlu0 %v2082_v34  ;;  %v4691_v34 = vld [vmem:[%s5249_s27 + $0x8] sm:$0xff]   ;;  %s3813_s27 = sld [smem:[%s5771_s0 + %s4846_s24]]   ;;  %s4861_s24 = smov 47  }
0x105d   :  { %v4748_v38 = vpop.eup %4747 }
0x105e   :  { %v2085_v41 = vsel %vm2033_vm5, %v4748_v38, 0.0 }
0x1068   :  { %2105 = vrot.lane.b32.xlu1 %v5174_v5, %s4814_s23  ;;  %v4687_v5 = vld [vmem:[%s5228_s22 + $0x8] sm:$0xff]   ;;  %s3806_s22 = sld [smem:[%s5771_s0 + %s4845_s19]]   ;;  %s4860_s19 = smov 41  }
0x1069   :  { %4365 = vmatpush3.bf16.msra.mxu0 %v4687_v5 }
0x106a   :  { %4366 = vmatprep.subr.bf16.mxu0 %v4831_v40 }
0x106d   :  { %4367 = vmatpush3.bf16.msra.mxu0 %v4688_v8  ;;  %v2530_v8 = vld [vmem:[%s5309_s13] sm:$0xff] }
0x106e   :  { %4400 = vmatprep.subr.bf16.mxu0 %v4831_v40 }
0x1071   :  { %2107 = vrot.lane.b32.xlu0 %v5170_v48, %s4814_s23 }
0x108c   :  { %2086 = vadd.xlane.f32.xlu1 %v2085_v41 }
0x109d   :  { %2103 = vrot.lane.b32.xlu1 %v5166_v53, %s4814_s23 }
0x10d4   :  { %v2072_v48 = vpop.xlane.xlu0 %2071 }
0x10d8   :  { %v2075_v42 = vpop.xlane.xlu1 %2074 }
0x10d9   :  { %4749 = vrcp.f32 %v2075_v42 }
0x10da   :  { %4751 = vrcp.f32 %v2072_v48 }
0x10dc   :  { %v2078_v43 = vpop.xlane.xlu0 %2077 }
0x10e0   :  { %v2081_v45 = vpop.xlane.xlu1 %2080 }
0x10e1   :  { %4753 = vrcp.f32 %v2081_v45 }
0x10e2   :  { %4755 = vrcp.f32 %v2078_v43 }
0x10e4   :  { %v2084_v44 = vpop.xlane.xlu0 %2083  ;;  %v2106_v53 = vpop.permute.xlu1 %2105 }
0x10e6   :  { %v4750_v47 = vpop.eup %4749 }
0x10e7   :  { %v4752_v50 = vpop.eup %4751  ;;  %v2095_v51 = vmul.f32 %v4750_v47, %v4740_v27 }
0x10e8   :  { %v2108_v46 = vpop.permute.xlu0 %2107  ;;  %v2094_v39 = vmul.f32 %v4752_v50, %v4738_v17 }
0x10e9   :  { %4347 = vmatpush3.bf16.msra.mxu1 %v2108_v46 }
0x10ea   :  { %4348 = vmatprep.subr.bf16.mxu1 %v4831_v40  ;;  %v2100_v54 = vpack.c.bf16 %v2095_v51, %v2094_v39 }
0x10ed   :  { %4349 = vmatpush3.bf16.msra.mxu1 %v2106_v53 }
0x10ee   :  { %4350 = vmatprep.subr.bf16.mxu1 %v4831_v40  ;;  %v4754_v55 = vpop.eup %4753 }
0x10ef   :  { %v4756_v56 = vpop.eup %4755  ;;  %v2097_v63 = vmul.f32 %v4754_v55, %v4744_v31 }
0x10f0   :  { %v2096_v0 = vmul.f32 %v4756_v56, %v4742_v29 }
0x10f2   :  { %v2101_v1 = vpack.c.bf16 %v2097_v63, %v2096_v0 }
0x1115   :  { %v2087_v49 = vpop.xlane.xlu1 %2086 }
0x1116   :  { %4757 = vrcp.f32 %v2087_v49  ;;  %v4694_v49 = vld [vmem:[%s5288_s1 + $0x10] sm:$0xff]  }
0x1117   :  { %4759 = vrcp.f32 %v2084_v44 }
0x1119   :  { %v2104_v52 = vpop.permute.xlu1 %2103 }
0x111a   :  { %4351 = vmatpush3.bf16.msra.mxu1 %v2104_v52 }
0x111b   :  { %4380 = vmatprep.subr.bf16.mxu1 %v4831_v40 }
0x111d   :  { %4353 = vmatmul.mubr.msk.bf16.vlgmr.msra.gmra.mxu1 %vm2033_vm5, %v2100_v54  ;;  %v4695_v54 = vld [vmem:[%s5288_s1 + $0x8] sm:$0xff]  }
0x111e   :  { %4356 = vmatprep.mubr.msk.bf16.mxu1 %vm4832_vm4, %v4831_v40  ;;  %4381 = vmatpush3.bf16.msra.mxu1 %v4689_v9  ;;  %v2531_v9 = vld [vmem:[%s5309_s13 + $0x8] sm:$0xff] }
0x111f   :  { %4382 = vmatprep.subr.bf16.mxu1 %v4831_v40 }
0x1122   :  { %4383 = vmatpush3.bf16.msra.mxu1 %v4690_v10 }
0x1123   :  { %v4758_v2 = vpop.eup %4757  ;;  %4384 = vmatprep.subr.bf16.mxu1 %v4831_v40 }
0x1124   :  { %v4760_v3 = vpop.eup %4759  ;;  %v2099_v4 = vmul.f32 %v4758_v2, %v4748_v38  ;;  %v3931_v38 = vld [vmem:[%s3804_s9] ss:$0 sm:$0xff]  ;;  %s4850_s9 = smov 35  }
0x1125   :  { %4357 = vmatmul.mubr.msk.bf16.gmra.mxu1 %vm2033_vm5, %v2101_v1  ;;  %v2098_v6 = vmul.f32 %v4760_v3, %v4746_v33  ;;  %v4696_v2 = vld [vmem:[%s5288_s1] sm:$0xff]   ;;  %s4848_s1 = smov 11   ;;  %s3810_s12 = sld [smem:[%s5771_s0 + %s4850_s9]]  }
0x1126   :  { %4360 = vmatprep.mubr.msk.bf16.mxu1 %vm4832_vm4, %v4831_v40  ;;  %4385 = vmatpush3.bf16.msra.mxu1 %v4691_v34  ;;  %s3786_s4 = sld [smem:[%s5771_s0 + %s4848_s1]]   ;;  %s4863_s1 = smov 45  }
0x1127   :  { %v2102_v7 = vpack.c.bf16 %v2099_v4, %v2098_v6  ;;  %4386 = vmatprep.subr.bf16.mxu1 %v4831_v40 }
0x112a   :  { %4387 = vmatpush3.bf16.msra.mxu1 %v4692_v35  ;;  %v2536_v35 = vld [vmem:[%s5309_s13 + $0x30] sm:$0xff] }
0x112b   :  { %4416 = vmatprep.subr.bf16.mxu1 %v4693_v36 }
0x112d   :  { %4361 = vmatmul.mubr.msk.bf16.gmra.mxu1 %vm2033_vm5, %v2102_v7 }
0x112e   :  { %4388 = vmatprep.mubr.msk.bf16.mxu1 %vm4832_vm4, %v4831_v40 }
0x11dd   :  { %v5255_v11 = vpop.f32.mrf.mxu1 }
0x11df   :  { %v4354_v12 = vpop.f32.mrf.mxu1 }
0x11e1   :  { %v5257_v13 = vpop.f32.mrf.mxu1 }
0x11e2   :  { %v2178_v14 = vpack.c.bf16 %v5257_v13, %v5255_v11 }
0x11e3   :  { %v4355_v15 = vpop.f32.mrf.mxu1 }
0x11e4   :  { %4369 = vmatmul.mubr.msk.bf16.vlgmr.msra.gmra.mxu0 %vm417_vm0, %v2178_v14  ;;  %v2542_v15 = vpack.c.bf16 %v2531_v9, %v2530_v8 }
0x11e5   :  { %v5262_v17 = vpop.f32.mrf.mxu1  ;;  %4372 = vmatprep.mubr.msk.bf16.mxu0 %vm4832_vm4, %v4831_v40  ;;  %4401 = vmatpush3.bf16.msra.mxu0 %v4697_v37  ;;  %v2538_v37 = vld [vmem:[%s5309_s13 + $0x40] sm:$0xff] }
0x11e6   :  { %4402 = vmatprep.subr.bf16.mxu0 %v4831_v40 }
0x11e7   :  { %v4358_v26 = vpop.f32.mrf.mxu1 }
0x11e9   :  { %v5266_v16 = vpop.f32.mrf.mxu1 }
0x11ea   :  { %v2179_v27 = vpack.c.bf16 %v5266_v16, %v5262_v17 }
0x11eb   :  { %v4359_v28 = vpop.f32.mrf.mxu1 }
0x11ec   :  { %4373 = vmatmul.mubr.msk.bf16.gmra.mxu0 %vm417_vm0, %v2179_v27  ;;  %v2532_v27 = vld [vmem:[%s5309_s13 + $0x10] sm:$0xff]  ;;  %v2533_v28 = vld [vmem:[%s5309_s13 + $0x18] sm:$0xff] }
0x11ed   :  { %v5271_v29 = vpop.f32.mrf.mxu1  ;;  %4376 = vmatprep.mubr.msk.bf16.mxu0 %vm4832_vm4, %v4831_v40 }
0x11ef   :  { %v4362_v30 = vpop.f32.mrf.mxu1 }
0x11f0   :  { %v2534_v30 = vld [vmem:[%s5309_s13 + $0x20] sm:$0xff] }
0x11f1   :  { %v5275_v31 = vpop.f32.mrf.mxu1 }
0x11f2   :  { %v2180_v32 = vpack.c.bf16 %v5275_v31, %v5271_v29 }
0x11f3   :  { %v4363_v33 = vpop.f32.mrf.mxu1 }
0x11f4   :  { %4377 = vmatmul.mubr.msk.bf16.gmra.mxu0 %vm417_vm0, %v2180_v32  ;;  %v2535_v32 = vld [vmem:[%s5309_s13 + $0x28] sm:$0xff]  ;;  %v2543_v33 = vpack.c.bf16 %v2533_v28, %v2532_v27 }
0x11f5   :  { %4404 = vmatprep.mubr.msk.bf16.mxu0 %vm4832_vm4, %v4831_v40  ;;  %v2544_v34 = vpack.c.bf16 %v2535_v32, %v2534_v30  ;;  %v3951_v30 = vld [vmem:[%s3813_s27] ss:$0 sm:$0xff]  ;;  %s3822_s27 = sld [smem:[%s5771_s0 + %s4861_s24]]  }
0x12a4   :  { %v2247_v41 = vpop.f32.mrf.mxu0 }
0x12a5   :  { %v2248_v48 = vadd.f32 %v3931_v38, %v2247_v41 }
0x12a6   :  { %v4370_v5 = vpop.f32.mrf.mxu0 }
0x12a7   :  { %v2270_v45 = vmax.f32 %v2248_v48, 0.0  ;;  %v2540_v48 = vld [vmem:[%s5309_s13 + $0x50] sm:$0xff] }
0x12a8   :  { %v2250_v43 = vpop.f32.mrf.mxu0 }
0x12a9   :  { %v2251_v42 = vadd.f32 %v3931_v38, %v2250_v43  ;;  %v2541_v43 = vld [vmem:[%s5309_s13 + $0x58] sm:$0xff] }
0x12aa   :  { %v4371_v44 = vpop.f32.mrf.mxu0 }
0x12ab   :  { %v2271_v46 = vmax.f32 %v2251_v42, 0.0  ;;  %v2547_v42 = vpack.c.bf16 %v2541_v43, %v2540_v48  ;;  %v4698_v44 = vld [vmem:[%s5294_s5] sm:$0xff]   ;;  %s4849_s5 = smov 23  }
0x12ac   :  { %v2255_v53 = vpop.f32.mrf.mxu0  ;;  %4403 = vmatpush3.bf16.msra.mxu0 %v4698_v44  ;;  %s3798_s8 = sld [smem:[%s5771_s0 + %s4849_s5]]   ;;  %s4864_s5 = smov 51  }
0x12ad   :  { %v2276_v47 = vpack.c.bf16 %v2271_v46, %v2270_v45  ;;  %v2256_v51 = vadd.f32 %v3931_v38, %v2255_v53  ;;  %v4699_v45 = vld [vmem:[%s3814_s17 + $0x8] sm:$0xff]   ;;  %v3937_v46 = vld [vmem:[%s3806_s22] ss:$0 sm:$0xff]  ;;  %s3816_s22 = sld [smem:[%s5771_s0 + %s4860_s19]]  }
0x12ae   :  { %v4374_v50 = vpop.f32.mrf.mxu0  ;;  %4436 = vmatprep.subr.bf16.mxu0 %v4699_v45 }
0x12af   :  { %4389 = vmatmul.mubr.msk.bf16.vlgmr.msra.gmra.mxu1 %vm771_vm3, %v2276_v47  ;;  %v2272_v56 = vmax.f32 %v2256_v51, 0.0 }
0x12b0   :  { %v2258_v39 = vpop.f32.mrf.mxu0  ;;  %4417 = vmatpush3.bf16.msra.mxu1 %v4693_v36  ;;  %4392 = vmatprep.mubr.msk.bf16.mxu1 %vm4832_vm4, %v4831_v40  ;;  %v2537_v36 = vld [vmem:[%s5309_s13 + $0x38] sm:$0xff] }
0x12b1   :  { %v2259_v52 = vadd.f32 %v3931_v38, %v2258_v39  ;;  %4418 = vmatprep.subr.bf16.mxu1 %v4694_v49  ;;  %v2545_v41 = vpack.c.bf16 %v2537_v36, %v2536_v35 }
0x12b2   :  { %v4375_v55 = vpop.f32.mrf.mxu0 }
0x12b3   :  { %v2273_v63 = vmax.f32 %v2259_v52, 0.0 }
0x12b4   :  { %v2263_v0 = vpop.f32.mrf.mxu0  ;;  %4419 = vmatpush3.bf16.msra.mxu1 %v4694_v49 }
0x12b5   :  { %v2277_v1 = vpack.c.bf16 %v2273_v63, %v2272_v56  ;;  %4420 = vmatprep.subr.bf16.mxu1 %v4695_v54  ;;  %v2264_v4 = vadd.f32 %v3931_v38, %v2263_v0  ;;  %v4700_v63 = vld [vmem:[%s3814_s17] sm:$0xff]   ;;  %s5702_s17 = sld [smem:[%s5771_s0 + %s4859_s14]]  }
0x12b6   :  { %v4378_v3 = vpop.f32.mrf.mxu0 }
0x12b7   :  { %4393 = vmatmul.mubr.msk.bf16.gmra.mxu1 %vm771_vm3, %v2277_v1  ;;  %v2274_v12 = vmax.f32 %v2264_v4, 0.0 }
0x12b8   :  { %v2266_v6 = vpop.f32.mrf.mxu0  ;;  %4396 = vmatprep.mubr.msk.bf16.mxu1 %vm4832_vm4, %v4831_v40  ;;  %4421 = vmatpush3.bf16.msra.mxu1 %v4695_v54 }
0x12b9   :  { %v2267_v7 = vadd.f32 %v3931_v38, %v2266_v6  ;;  %4422 = vmatprep.subr.bf16.mxu1 %v4696_v2  ;;  %v2539_v38 = vld [vmem:[%s5309_s13 + $0x48] sm:$0xff]  ;;  %s5651_s13 = sld [smem:[%s5771_s0 + %s4858_s11]]  }
0x12ba   :  { %v4379_v10 = vpop.f32.mrf.mxu0  ;;  %v2546_v5 = vpack.c.bf16 %v2539_v38, %v2538_v37 }
0x12bb   :  { %v2275_v14 = vmax.f32 %v2267_v7, 0.0 }
0x12bc   :  { %4423 = vmatpush3.bf16.msra.mxu1 %v4696_v2 }
0x12bd   :  { %v2278_v26 = vpack.c.bf16 %v2275_v14, %v2274_v12 }
0x12bf   :  { %4397 = vmatmul.mubr.msk.bf16.gmra.mxu1 %vm771_vm3, %v2278_v26 }
0x12c0   :  { %4424 = vmatprep.mubr.msk.bf16.mxu1 %vm771_vm3, %v2542_v15 }
0x12c7   :  { %4425 = vmatmul.mubr.msk.bf16.vlgmr.msra.gmra.mxu1 %vm771_vm3, %v2543_v33 }
0x12c8   :  { %4428 = vmatprep.mubr.msk.bf16.mxu1 %vm771_vm3, %v2544_v34 }
0x12cf   :  { %4429 = vmatmul.mubr.msk.bf16.gmra.mxu1 %vm771_vm3, %v2545_v41 }
0x12d0   :  { %4432 = vmatprep.mubr.msk.bf16.mxu1 %vm771_vm3, %v2546_v5 }
0x12d7   :  { %4433 = vmatmul.mubr.msk.bf16.gmra.mxu1 %vm771_vm3, %v2547_v42 }
0x136f   :  { %v2361_v53 = vpop.f32.mrf.mxu1 }
0x1370   :  { %v2362_v49 = vadd.f32 %v3937_v46, %v2361_v53 }
0x1371   :  { %v4390_v47 = vpop.f32.mrf.mxu1 }
0x1372   :  { %v2384_v52 = vadd.f32 %v2362_v49, %v5255_v11 }
0x1373   :  { %v2364_v50 = vpop.f32.mrf.mxu1 }
0x1374   :  { %v2365_v51 = vadd.f32 %v3937_v46, %v2364_v50 }
0x1375   :  { %v4391_v39 = vpop.f32.mrf.mxu1 }
0x1376   :  { %v2385_v54 = vadd.f32 %v2365_v51, %v5257_v13 }
0x1377   :  { %v2369_v55 = vpop.f32.mrf.mxu1 }
0x1378   :  { %v2390_v56 = vpack.c.bf16 %v2385_v54, %v2384_v52  ;;  %v2370_v1 = vadd.f32 %v3937_v46, %v2369_v55 }
0x1379   :  { %v4394_v0 = vpop.f32.mrf.mxu1 }
0x137a   :  { %4405 = vmatmul.mubr.msk.bf16.vlgmr.msra.gmra.mxu0 %vm417_vm0, %v2390_v56  ;;  %v2386_v6 = vadd.f32 %v2370_v1, %v5262_v17 }
0x137b   :  { %v2372_v2 = vpop.f32.mrf.mxu1  ;;  %4437 = vmatpush3.bf16.msra.mxu0 %v4699_v45  ;;  %4408 = vmatprep.mubr.msk.bf16.mxu0 %vm4832_vm4, %v4831_v40 }
0x137c   :  { %v2373_v3 = vadd.f32 %v3937_v46, %v2372_v2  ;;  %4438 = vmatprep.subr.bf16.mxu0 %v4700_v63 }
0x137d   :  { %v4395_v4 = vpop.f32.mrf.mxu1 }
0x137e   :  { %v2387_v11 = vadd.f32 %v2373_v3, %v5266_v16 }
0x137f   :  { %v2377_v13 = vpop.f32.mrf.mxu1  ;;  %4439 = vmatpush3.bf16.msra.mxu0 %v4700_v63 }
0x1380   :  { %v2391_v7 = vpack.c.bf16 %v2387_v11, %v2386_v6  ;;  %v2378_v9 = vadd.f32 %v3937_v46, %v2377_v13 }
0x1381   :  { %v4398_v8 = vpop.f32.mrf.mxu1 }
0x1382   :  { %4409 = vmatmul.mubr.msk.bf16.gmra.mxu0 %vm417_vm0, %v2391_v7  ;;  %v2388_v16 = vadd.f32 %v2378_v9, %v5271_v29 }
0x1383   :  { %v2380_v10 = vpop.f32.mrf.mxu1  ;;  %4412 = vmatprep.mubr.msk.bf16.mxu0 %vm4832_vm4, %v4831_v40 }
0x1384   :  { %v2381_v12 = vadd.f32 %v3937_v46, %v2380_v10 }
0x1385   :  { %v4399_v17 = vpop.f32.mrf.mxu1 }
0x1386   :  { %v2389_v14 = vadd.f32 %v2381_v12, %v5275_v31 }
0x1387   :  { %v4426_v15 = vpop.f32.mrf.mxu1 }
0x1388   :  { %v2392_v26 = vpack.c.bf16 %v2389_v14, %v2388_v16  ;;  %v2648_v35 = vadd.f32 %v4426_v15, %v3951_v30 }
0x1389   :  { %v2639_v27 = vpop.f32.mrf.mxu1 }
0x138a   :  { %4413 = vmatmul.mubr.msk.bf16.gmra.mxu0 %vm417_vm0, %v2392_v26  ;;  %v2640_v33 = vadd.f32 %v3951_v30, %v2639_v27 }
0x138b   :  { %v4427_v28 = vpop.f32.mrf.mxu1 }
0x138c   :  { %v2651_v32 = vadd.f32 %v4427_v28, %v3951_v30 }
0x138d   :  { %v2642_v40 = vpop.f32.mrf.mxu1 }
0x138e   :  { %v2643_v34 = vadd.f32 %v3951_v30, %v2642_v40  ;;  %v2687_v38 = vpack.c.bf16 %v2651_v32, %v2648_v35 }
0x138f   :  { %v4430_v36 = vpop.f32.mrf.mxu1 }
0x1390   :  { %v2686_v37 = vpack.c.bf16 %v2643_v34, %v2640_v33  ;;  %v2664_v42 = vadd.f32 %v4430_v36, %v3951_v30 }
0x1391   :  { %v2655_v41 = vpop.f32.mrf.mxu1 }
0x1392   :  { %4440 = vmatprep.mubr.msk.bf16.mxu0 %vm417_vm0, %v2686_v37  ;;  %v2656_v48 = vadd.f32 %v3951_v30, %v2655_v41 }
0x1393   :  { %v4431_v29 = vpop.f32.mrf.mxu1  ;;  %4441 = vmatmul.mubr.msk.bf16.vlgmr.msra.gmra.mxu0 %vm417_vm0, %v2687_v38 }
0x1394   :  { %v2667_v31 = vadd.f32 %v4431_v29, %v3951_v30 }
0x1395   :  { %v2658_v5 = vpop.f32.mrf.mxu1 }
0x1396   :  { %v2659_v43 = vadd.f32 %v3951_v30, %v2658_v5  ;;  %v2689_v46 = vpack.c.bf16 %v2667_v31, %v2664_v42 }
0x1397   :  { %v4434_v44 = vpop.f32.mrf.mxu1 }
0x1398   :  { %v2688_v45 = vpack.c.bf16 %v2659_v43, %v2656_v48  ;;  %v2680_v52 = vadd.f32 %v4434_v44, %v3951_v30 }
0x1399   :  { %v2671_v53 = vpop.f32.mrf.mxu1 }
0x139a   :  { %4444 = vmatprep.mubr.msk.bf16.mxu0 %vm417_vm0, %v2688_v45  ;;  %v2672_v51 = vadd.f32 %v3951_v30, %v2671_v53 }
0x139b   :  { %v4435_v47 = vpop.f32.mrf.mxu1  ;;  %4445 = vmatmul.mubr.msk.bf16.gmra.mxu0 %vm417_vm0, %v2689_v46 }
0x139c   :  { %v2683_v49 = vadd.f32 %v4435_v47, %v3951_v30 }
0x139d   :  { %v2674_v50 = vpop.f32.mrf.mxu1 }
0x139e   :  { %v2675_v39 = vadd.f32 %v3951_v30, %v2674_v50  ;;  %v2691_v55 = vpack.c.bf16 %v2683_v49, %v2680_v52 }
0x13a0   :  { %v2690_v54 = vpack.c.bf16 %v2675_v39, %v2672_v51 }
0x13a2   :  { %4448 = vmatprep.mubr.msk.bf16.mxu0 %vm417_vm0, %v2690_v54 }
0x13a3   :  { %4449 = vmatmul.mubr.msk.bf16.gmra.mxu0 %vm417_vm0, %v2691_v55 }
0x143a   :  { %v5363_v56 = vpop.f32.mrf.mxu0 }
0x143c   :  { %v4406_v63 = vpop.f32.mrf.mxu0 }
0x143e   :  { %v5365_v0 = vpop.f32.mrf.mxu0 }
0x1440   :  { %v4407_v1 = vpop.f32.mrf.mxu0 }
0x1442   :  { %v5367_v2 = vpop.f32.mrf.mxu0 }
0x1444   :  { %v4410_v3 = vpop.f32.mrf.mxu0 }
0x1446   :  { %v5369_v4 = vpop.f32.mrf.mxu0 }
0x1448   :  { %v4411_v6 = vpop.f32.mrf.mxu0 }
0x144a   :  { %v5371_v11 = vpop.f32.mrf.mxu0 }
0x144c   :  { %v4414_v13 = vpop.f32.mrf.mxu0 }
0x144e   :  { %v5373_v7 = vpop.f32.mrf.mxu0 }
0x1450   :  { %v4415_v8 = vpop.f32.mrf.mxu0 }
0x1453   :  { %v4442_v9 = vpop.f32.mrf.mxu0 }
0x1455   :  { %v2760_v10 = vpop.f32.mrf.mxu0 }
0x1457   :  { %v4443_v12 = vpop.f32.mrf.mxu0 }
0x1458   :  { %v5387_v37 = vpack.c.bf16 %v4443_v12, %v4442_v9 }
0x1459   :  { %v2763_v17 = vpop.f32.mrf.mxu0 }
0x145a   :  { %v5375_v16 = vpack.c.bf16 %v2763_v17, %v2760_v10 }
0x145b   :  { %v4446_v14 = vpop.f32.mrf.mxu0 }
0x145c   :  { %4464 = vmatprep.mubr.msk.bf16.mxu1 %vm417_vm0, %v5375_v16 }
0x145d   :  { %v2776_v15 = vpop.f32.mrf.mxu0 }
0x145f   :  { %v4447_v26 = vpop.f32.mrf.mxu0 }
0x1460   :  { %v5380_v35 = vpack.c.bf16 %v4447_v26, %v4446_v14 }
0x1461   :  { %v2779_v27 = vpop.f32.mrf.mxu0 }
0x1462   :  { %v5383_v36 = vpack.c.bf16 %v2779_v27, %v2776_v15 }
0x1463   :  { %v4450_v28 = vpop.f32.mrf.mxu0 }
0x1465   :  { %v2792_v30 = vpop.f32.mrf.mxu0 }
0x1467   :  { %v4451_v32 = vpop.f32.mrf.mxu0 }
0x1468   :  { %v2812_v40 = vpack.c.bf16 %v4451_v32, %v4450_v28 }
0x1469   :  { %v2795_v33 = vpop.f32.mrf.mxu0 }
0x146a   :  { %v2811_v34 = vpack.c.bf16 %v2795_v33, %v2792_v30  ;;  %2829 = vrot.lane.b32.xlu0 %v2812_v40, %s4812_s18 }
0x146c   :  { %2827 = vrot.lane.b32.xlu1 %v2811_v34, %s4812_s18 }
0x146e   :  { %2825 = vrot.lane.b32.xlu0 %v5380_v35, %s4812_s18 }
0x1470   :  { %2823 = vrot.lane.b32.xlu1 %v5383_v36, %s4812_s18 }
0x1472   :  { %2821 = vrot.lane.b32.xlu0 %v5387_v37, %s4812_s18 }
0x1474   :  { %2819 = vrot.lane.b32.xlu1 %v5375_v16, %s4812_s18  ;;  %s4847_s18 = smov 46  }
0x1475   :  { %s5420_s30 = sld [smem:[%s5771_s0 + %s4847_s18]]   ;;  %s4862_s18 = smov 43  }
0x1478   :  { %3133 = vrot.lane.b32.xlu1 %v2812_v40, %s4814_s23 }
0x147b   :  { %v2962_v51 = vld [vmem:[%s5420_s30 + $0x10] sm:$0xff]  ;;  %v2960_v54 = vld [vmem:[%s5420_s30] sm:$0xff]  ;;  %v2961_v9 = vld [vmem:[%s5420_s30 + $0x8] sm:$0xff] }
0x147c   :  { %3131 = vrot.lane.b32.xlu1 %v2811_v34, %s4814_s23  ;;  %v2963_v10 = vld [vmem:[%s5420_s30 + $0x18] sm:$0xff]  ;;  %v2966_v14 = vld [vmem:[%s5420_s30 + $0x30] sm:$0xff] }
0x14dc   :  { %v2830_v38 = vpop.permute.xlu0 %2829 }
0x14dd   :  { %v2865_v41 = vsel %vm417_vm0, %v2830_v38, 0  ;;  %4557 = vmatprep.subr.msk.bf16.mxu1 %vm417_vm0, %v2830_v38  ;;  %v2967_v38 = vld [vmem:[%s5420_s30 + $0x38] sm:$0xff] }
0x14de   :  { %4453 = vmatpush3.bf16.xpose.msra.mxu1 %v2865_v41  ;;  %v2828_v29 = vpop.permute.xlu1 %2827  ;;  %v2964_v41 = vld [vmem:[%s5420_s30 + $0x20] sm:$0xff] }
0x14df   :  { %4558 = vmatprep.subr.msk.bf16.mxu1 %vm417_vm0, %v2828_v29  ;;  %v2862_v5 = vsel %vm417_vm0, %v2828_v29, 0 }
0x14e0   :  { %v2826_v48 = vpop.permute.xlu0 %2825 }
0x14e1   :  { %v2859_v44 = vsel %vm417_vm0, %v2826_v48, 0 }
0x14e2   :  { %v2824_v31 = vpop.permute.xlu1 %2823 }
0x14e3   :  { %v2856_v46 = vsel %vm417_vm0, %v2824_v31, 0 }
0x14e4   :  { %v2822_v53 = vpop.permute.xlu0 %2821 }
0x14e5   :  { %v2853_v47 = vsel %vm417_vm0, %v2822_v53, 0 }
0x14e6   :  { %4455 = vmatpush3.bf16.xpose.msra.mxu1 %v2862_v5  ;;  %v2820_v43 = vpop.permute.xlu1 %2819 }
0x14e7   :  { %4559 = vmatprep.subr.msk.bf16.mxu1 %vm417_vm0, %v2826_v48  ;;  %v2850_v49 = vsel %vm417_vm0, %v2820_v43, 0  ;;  %v2965_v48 = vld [vmem:[%s5420_s30 + $0x28] sm:$0xff] }
0x14ea   :  { %v3134_v42 = vpop.permute.xlu1 %3133 }
0x14eb   :  { %4476 = vmatprep.subr.bf16.mxu0 %v3134_v42 }
0x14ec   :  { %4477 = vmatpush3.bf16.msra.mxu0 %v3134_v42 }
0x14ee   :  { %4457 = vmatpush3.bf16.xpose.msra.mxu1 %v2859_v44  ;;  %v3132_v45 = vpop.permute.xlu1 %3131 }
0x14ef   :  { %4560 = vmatprep.subr.msk.bf16.mxu1 %vm417_vm0, %v2824_v31  ;;  %4478 = vmatprep.subr.bf16.mxu0 %v3132_v45 }
0x14f0   :  { %4479 = vmatpush3.bf16.msra.mxu0 %v3132_v45 }
0x14f6   :  { %4459 = vmatpush3.bf16.xpose.msra.mxu1 %v2856_v46 }
0x14f7   :  { %4561 = vmatprep.subr.msk.bf16.mxu1 %vm417_vm0, %v2822_v53  ;;  %v2970_v53 = vld [vmem:[%s5420_s30 + $0x50] sm:$0xff] }
0x14fe   :  { %4461 = vmatpush3.bf16.xpose.msra.mxu1 %v2853_v47 }
0x14ff   :  { %4562 = vmatprep.subr.msk.bf16.mxu1 %vm417_vm0, %v2820_v43 }
0x1506   :  { %4463 = vmatpush3.bf16.xpose.msra.mxu1 %v2850_v49 }
0x150d   :  { %4465 = vmatmul.mubr.msk.bf16.vlgmr.msra.gmra.mxu1 %vm417_vm0, %v5387_v37 }
0x150e   :  { %4468 = vmatprep.mubr.msk.bf16.mxu1 %vm417_vm0, %v5383_v36 }
0x1515   :  { %4469 = vmatmul.mubr.msk.bf16.gmra.mxu1 %vm417_vm0, %v5380_v35 }
0x1516   :  { %4472 = vmatprep.mubr.msk.bf16.mxu1 %vm417_vm0, %v2811_v34 }
0x151d   :  { %4473 = vmatmul.mubr.msk.bf16.gmra.mxu1 %vm417_vm0, %v2812_v40 }
0x15cd   :  { %v4466_v50 = vpop.f32.mrf.mxu1 }
0x15ce   :  { %v2950_v39 = vmul.f32 0.17677669, %v4466_v50 }
0x15cf   :  { %v2901_v52 = vpop.f32.mrf.mxu1 }
0x15d0   :  { %v2948_v55 = vmul.f32 0.17677669, %v2901_v52  ;;  %v5424_v63 = vadd.f32 %v2962_v51, %v2950_v39 }
0x15d1   :  { %v4467_v1 = vpop.f32.mrf.mxu1 }
0x15d2   :  { %v2951_v3 = vmul.f32 0.17677669, %v4467_v1  ;;  %v2991_v6 = vsel %vm2984_vm6, %v5424_v63, -inf  ;;  %v5428_v13 = vadd.f32 %v2960_v54, %v2948_v55  ;;  %v2971_v1 = vld [vmem:[%s5420_s30 + $0x58] sm:$0xff] }
0x15d3   :  { %2992 = vmax.xlane.f32.xlu0 %v2991_v6  ;;  %v2904_v8 = vpop.f32.mrf.mxu1 }
0x15d4   :  { %v2949_v12 = vmul.f32 0.17677669, %v2904_v8  ;;  %v2985_v26 = vsel %vm2984_vm6, %v5428_v13, -inf  ;;  %v5437_v28 = vadd.f32 %v2963_v10, %v2951_v3  ;;  %v2968_v3 = vld [vmem:[%s5420_s30 + $0x40] sm:$0xff]  ;;  %v2969_v10 = vld [vmem:[%s5420_s30 + $0x48] sm:$0xff]  ;;  %s3818_s30 = sld [smem:[%s5771_s0 + %s4862_s18]]  }
0x15d5   :  { %v4470_v17 = vpop.f32.mrf.mxu1 }
0x15d6   :  { %v2954_v15 = vmul.f32 0.17677669, %v4470_v17  ;;  %v5435_v27 = vadd.f32 %v2961_v9, %v2949_v12  ;;  %v2994_v31 = vsel %vm2984_vm6, %v5437_v28, -inf }
0x15d7   :  { %2986 = vmax.xlane.f32.xlu0 %v2985_v26  ;;  %v2917_v30 = vpop.f32.mrf.mxu1 }
0x15d8   :  { %v2952_v32 = vmul.f32 0.17677669, %v2917_v30  ;;  %v2988_v40 = vsel %vm2984_vm6, %v5435_v27, -inf  ;;  %v5441_v33 = vadd.f32 %v2966_v14, %v2954_v15 }
0x15d9   :  { %2989 = vmax.xlane.f32.xlu1 %v2988_v40  ;;  %v4471_v34 = vpop.f32.mrf.mxu1 }
0x15da   :  { %v2955_v29 = vmul.f32 0.17677669, %v4471_v34  ;;  %v3003_v42 = vsel %vm2984_vm6, %v5441_v33, -inf  ;;  %v2976_v45 = vadd.f32 %v2964_v41, %v2952_v32 }
0x15db   :  { %2995 = vmax.xlane.f32.xlu0 %v2994_v31  ;;  %v2920_v5 = vpop.f32.mrf.mxu1 }
0x15dc   :  { %v2953_v43 = vmul.f32 0.17677669, %v2920_v5  ;;  %v5450_v44 = vadd.f32 %v2967_v38, %v2955_v29  ;;  %v2997_v52 = vsel %vm2984_vm6, %v2976_v45, -inf }
0x15dd   :  { %3004 = vmax.xlane.f32.xlu1 %v3003_v42  ;;  %v4474_v46 = vpop.f32.mrf.mxu1 }
0x15de   :  { %v2958_v47 = vmul.f32 0.17677669, %v4474_v46  ;;  %v3006_v49 = vsel %vm2984_vm6, %v5450_v44, -inf  ;;  %v5455_v50 = vadd.f32 %v2965_v48, %v2953_v43 }
0x15df   :  { %3007 = vmax.xlane.f32.xlu0 %v3006_v49  ;;  %v2933_v51 = vpop.f32.mrf.mxu1 }
0x15e0   :  { %v2956_v39 = vmul.f32 0.17677669, %v2933_v51  ;;  %v2982_v54 = vadd.f32 %v2970_v53, %v2958_v47  ;;  %v3000_v8 = vsel %vm2984_vm6, %v5455_v50, -inf }
0x15e1   :  { %2998 = vmax.xlane.f32.xlu1 %v2997_v52  ;;  %v4475_v55 = vpop.f32.mrf.mxu1 }
0x15e2   :  { %v2959_v6 = vmul.f32 0.17677669, %v4475_v55  ;;  %v3015_v17 = vsel %vm2984_vm6, %v2982_v54, -inf  ;;  %v2980_v15 = vadd.f32 %v2968_v3, %v2956_v39 }
0x15e3   :  { %3001 = vmax.xlane.f32.xlu0 %v3000_v8  ;;  %v2936_v9 = vpop.f32.mrf.mxu1 }
0x15e4   :  { %v2957_v12 = vmul.f32 0.17677669, %v2936_v9  ;;  %v2983_v14 = vadd.f32 %v2971_v1, %v2959_v6  ;;  %v3009_v32 = vsel %vm2984_vm6, %v2980_v15, -inf }
0x15e5   :  { %3016 = vmax.xlane.f32.xlu1 %v3015_v17 }
0x15e6   :  { %v3018_v26 = vsel %vm2984_vm6, %v2983_v14, -inf  ;;  %v5465_v30 = vadd.f32 %v2969_v10, %v2957_v12 }
0x15e7   :  { %3019 = vmax.xlane.f32.xlu0 %v3018_v26 }
0x15e8   :  { %v3012_v40 = vsel %vm2984_vm6, %v5465_v30, -inf }
0x15e9   :  { %3010 = vmax.xlane.f32.xlu1 %v3009_v32 }
0x15eb   :  { %3013 = vmax.xlane.f32.xlu0 %v3012_v40 }
0x15fa   :  { %3127 = vrot.lane.b32.xlu1 %v5383_v36, %s4814_s23 }
0x1601   :  { %3129 = vrot.lane.b32.xlu0 %v5380_v35, %s4814_s23 }
0x165c   :  { %v2993_v34 = vpop.xlane.xlu0 %2992 }
0x165d   :  { %v3023_v38 = vsub.f32 %v5424_v63, %v2993_v34 }
0x165f   :  { %v3037_v41 = vmul.f32 1.442695, %v3023_v38 }
0x1660   :  { %v2987_v29 = vpop.xlane.xlu0 %2986 }
0x1661   :  { %4761 = vpow2.f32 %v3037_v41  ;;  %v3021_v31 = vsub.f32 %v5428_v13, %v2987_v29 }
0x1662   :  { %v2990_v5 = vpop.xlane.xlu1 %2989 }
0x1663   :  { %v3033_v48 = vmul.f32 1.442695, %v3021_v31  ;;  %v3022_v43 = vsub.f32 %v5435_v27, %v2990_v5 }
0x1664   :  { %v2996_v42 = vpop.xlane.xlu0 %2995 }
0x1665   :  { %4763 = vpow2.f32 %v3033_v48  ;;  %v3024_v46 = vsub.f32 %v5437_v28, %v2996_v42  ;;  %v3035_v53 = vmul.f32 1.442695, %v3022_v43 }
0x1666   :  { %v3005_v36 = vpop.xlane.xlu1 %3004 }
0x1667   :  { %v3039_v47 = vmul.f32 1.442695, %v3024_v46  ;;  %v3027_v35 = vsub.f32 %v5441_v33, %v3005_v36 }
0x1668   :  { %v3008_v49 = vpop.xlane.xlu0 %3007 }
0x1669   :  { %4765 = vpow2.f32 %v3039_v47  ;;  %v3045_v51 = vmul.f32 1.442695, %v3027_v35  ;;  %v3028_v27 = vsub.f32 %v5450_v44, %v3008_v49 }
0x166a   :  { %v2999_v63 = vpop.xlane.xlu1 %2998  ;;  %4767 = vpow2.f32 %v3035_v53 }
0x166b   :  { %v3025_v39 = vsub.f32 %v2976_v45, %v2999_v63  ;;  %4769 = vpow2.f32 %v3045_v51  ;;  %v3047_v10 = vmul.f32 1.442695, %v3028_v27 }
0x166c   :  { %v3002_v13 = vpop.xlane.xlu0 %3001 }
0x166d   :  { %v3041_v55 = vmul.f32 1.442695, %v3025_v39  ;;  %v3026_v12 = vsub.f32 %v5455_v50, %v3002_v13 }
0x166e   :  { %v5479_v52 = vpop.eup %4761  ;;  %v3017_v1 = vpop.xlane.xlu1 %3016 }
0x166f   :  { %v3031_v28 = vsub.f32 %v2982_v54, %v3017_v1  ;;  %v3063_v3 = vsel %vm2984_vm6, %v5479_v52, 0.0  ;;  %4771 = vpow2.f32 %v3041_v55  ;;  %v924_v55 = vld [vmem:[%s3786_s4] sm:$0xff]  ;;  %v925_v1 = vld [vmem:[%s3786_s4 + $0x8] sm:$0xff] }
0x1670   :  { %3064 = vadd.xlane.f32.xlu1 %v3063_v3  ;;  %v3020_v33 = vpop.xlane.xlu0 %3019  ;;  %v926_v3 = vld [vmem:[%s3786_s4 + $0x10] sm:$0xff]  ;;  %s3820_s4 = sld [smem:[%s5771_s0 + %s4863_s1]]  }
0x1671   :  { %v3053_v6 = vmul.f32 1.442695, %v3031_v28  ;;  %v3032_v8 = vsub.f32 %v2983_v14, %v3020_v33  ;;  %v3043_v14 = vmul.f32 1.442695, %v3026_v12  ;;  %v1666_v28 = vld [vmem:[%s3798_s8] sm:$0xff]  ;;  %v1668_v33 = vld [vmem:[%s3798_s8 + $0x10] sm:$0xff] }
0x1672   :  { %v5484_v9 = vpop.eup %4763  ;;  %v3011_v45 = vpop.xlane.xlu1 %3010  ;;  %v2486_v12 = vld [vmem:[%s3810_s12 + $0x20] sm:$0xff] }
0x1673   :  { %4773 = vpow2.f32 %v3053_v6  ;;  %v3029_v44 = vsub.f32 %v2980_v15, %v3011_v45  ;;  %v3057_v17 = vsel %vm2984_vm6, %v5484_v9, 0.0  ;;  %v3055_v26 = vmul.f32 1.442695, %v3032_v8  ;;  %v1669_v6 = vld [vmem:[%s3798_s8 + $0x18] sm:$0xff]  ;;  %v2482_v8 = vld [vmem:[%s3810_s12] sm:$0xff]  ;;  %v2484_v45 = vld [vmem:[%s3810_s12 + $0x10] sm:$0xff] }
0x1674   :  { %3058 = vadd.xlane.f32.xlu1 %v3057_v17  ;;  %v3014_v54 = vpop.xlane.xlu0 %3013  ;;  %4775 = vpow2.f32 %v3047_v10  ;;  %v2483_v10 = vld [vmem:[%s3810_s12 + $0x8] sm:$0xff] }
0x1675   :  { %v3049_v32 = vmul.f32 1.442695, %v3029_v44  ;;  %v3030_v34 = vsub.f32 %v5465_v30, %v3014_v54  ;;  %v2487_v44 = vld [vmem:[%s3810_s12 + $0x28] sm:$0xff] }
0x1676   :  { %v5489_v40 = vpop.eup %4765  ;;  %v3128_v41 = vpop.permute.xlu1 %3127 }
0x1677   :  { %4777 = vpow2.f32 %v3049_v32  ;;  %v3066_v38 = vsel %vm2984_vm6, %v5489_v40, 0.0  ;;  %v5494_v50 = vpop.eup %4767  ;;  %v3051_v29 = vmul.f32 1.442695, %v3030_v34  ;;  %v837_v34 = vlaneseq }
0x1678   :  { %3067 = vadd.xlane.f32.xlu0 %v3066_v38  ;;  %v3130_v15 = vpop.permute.xlu0 %3129  ;;  %4779 = vpow2.f32 %v3055_v26  ;;  %v3060_v31 = vsel %vm2984_vm6, %v5494_v50, 0.0  ;;  %v5498_v5 = vpop.eup %4769 }
0x1679   :  { %4480 = vmatprep.subr.bf16.mxu0 %v3130_v15  ;;  %4781 = vpow2.f32 %v3043_v14  ;;  %v3075_v48 = vsel %vm2984_vm6, %v5498_v5, 0.0 }
0x167a   :  { %4481 = vmatpush3.bf16.msra.mxu0 %v3130_v15  ;;  %4783 = vpow2.f32 %v3051_v29 }
0x167b   :  { %4482 = vmatprep.subr.bf16.mxu0 %v3128_v41 }
0x167c   :  { %3061 = vadd.xlane.f32.xlu0 %v3060_v31  ;;  %v5500_v30 = vpop.eup %4771 }
0x167d   :  { %v3069_v36 = vsel %vm2984_vm6, %v5500_v30, 0.0 }
0x167e   :  { %4483 = vmatpush3.bf16.msra.mxu0 %v3128_v41  ;;  %v838_v41 = vshrl.u32 %v837_v34, 7 }
0x1680   :  { %v5504_v43 = vpop.eup %4773  ;;  %3076 = vadd.xlane.f32.xlu0 %v3075_v48 }
0x1681   :  { %v3087_v42 = vsel %vm2984_vm6, %v5504_v43, 0.0  ;;  %v5508_v46 = vpop.eup %4775 }
0x1682   :  { %3088 = vadd.xlane.f32.xlu1 %v3087_v42  ;;  %v3078_v49 = vsel %vm2984_vm6, %v5508_v46, 0.0  ;;  %v839_v42 = vsub.s32 0, %v838_v41 }
0x1684   :  { %v5512_v53 = vpop.eup %4777  ;;  %3070 = vadd.xlane.f32.xlu0 %v3069_v36  ;;  %v843_v36 = vsub.s32 1, %v838_v41 }
0x1685   :  { %v3081_v47 = vsel %vm2984_vm6, %v5512_v53, 0.0  ;;  %v5516_v35 = vpop.eup %4779 }
0x1686   :  { %3082 = vadd.xlane.f32.xlu1 %v3081_v47  ;;  %v5520_v63 = vpop.eup %4781  ;;  %v3090_v51 = vsel %vm2984_vm6, %v5516_v35, 0.0 }
0x1687   :  { %v3072_v39 = vsel %vm2984_vm6, %v5520_v63, 0.0  ;;  %v5526_v13 = vpop.eup %4783 }
0x1688   :  { %3079 = vadd.xlane.f32.xlu0 %v3078_v49  ;;  %v3084_v27 = vsel %vm2984_vm6, %v5526_v13, 0.0  ;;  %v835_v49 = vld [vmem:[%s3784_s20] sm:$0x3] }
0x168a   :  { %3091 = vadd.xlane.f32.xlu1 %v3090_v51 }
0x168c   :  { %3073 = vadd.xlane.f32.xlu0 %v3072_v39 }
0x1690   :  { %3085 = vadd.xlane.f32.xlu0 %v3084_v27 }
0x169b   :  { %3123 = vrot.lane.b32.xlu1 %v5375_v16, %s4814_s23  ;;  %v1667_v16 = vld [vmem:[%s3798_s8 + $0x8] sm:$0xff]  ;;  %s5745_s8 = sld [smem:[%s5771_s0 + %s4864_s5]]  }
0x169f   :  { %929 = vperm.xlu1 %4619, %v924_v55  }
0x16a3   :  { %934 = vperm.xlu1 %4619, %v925_v1   ;;  %v840_v1 = vrot.slane %v835_v49, %v839_v42 }
0x16a6   :  { %3125 = vrot.lane.b32.xlu0 %v5387_v37, %s4814_s23  ;;  %v2485_v37 = vld [vmem:[%s3810_s12 + $0x18] sm:$0xff]  ;;  %s4851_s23 = smov 40  }
0x16a7   :  { %1672 = vperm.xlu1 %4619, %v1666_v28   ;;  %s5546_s15 = sld [smem:[%s5771_s0 + %s4851_s23]]   ;;  %v844_v28 = vrot.slane %v835_v49, %v843_v36 }
0x16aa   :  { %939 = vperm.xlu0 %4620, %v926_v3  }
0x16ab   :  { %1677 = vperm.xlu1 %4619, %v1667_v16  }
0x16ae   :  { %1682 = vperm.xlu0 %4620, %v1668_v33  }
0x16af   :  { %1687 = vperm.xlu1 %4619, %v1669_v6   ;;  %v1575_v6 = vld [vmem:[%s3796_s25] sm:$0x3] }
0x16b2   :  { %2490 = vperm.xlu0 %4620, %v2482_v8  }
0x16b3   :  { %2495 = vperm.xlu1 %4619, %v2483_v10  }
0x16b6   :  { %2500 = vperm.xlu0 %4620, %v2484_v45  }
0x16b7   :  { %2505 = vperm.xlu1 %4619, %v2485_v37  }
0x16ba   :  { %2510 = vperm.xlu0 %4620, %v2486_v12  }
0x16bb   :  { %2515 = vperm.xlu1 %4619, %v2487_v44  }
0x16f9   :  { %v3065_v17 = vpop.xlane.xlu1 %3064 }
0x16fd   :  { %v3059_v54 = vpop.xlane.xlu1 %3058 }
0x16fe   :  { %4785 = vrcp.f32 %v3059_v54  ;;  %v914_v54 = vadd.f32 %v5027_v60, %v844_v28 }
0x1701   :  { %v3068_v26 = vpop.xlane.xlu0 %3067 }
0x1705   :  { %v3062_v32 = vpop.xlane.xlu0 %3061 }
0x1706   :  { %4787 = vrcp.f32 %v3062_v32  ;;  %v5568_v32 = vrot.slane %v1575_v6, %v843_v36 }
0x1707   :  { %4789 = vrcp.f32 %v3068_v26  ;;  %v1580_v26 = vrot.slane %v1575_v6, %v839_v42 }
0x1708   :  { %4791 = vrcp.f32 %v3065_v17  ;;  %v912_v17 = vadd.f32 %v5025_v59, %v840_v1 }
0x1709   :  { %v3077_v14 = vpop.xlane.xlu0 %3076  ;;  %v1648_v41 = vadd.f32 %v5138_v18, %v1580_v26  ;;  %v1652_v49 = vadd.f32 %v5142_v20, %v1580_v26 }
0x170b   :  { %v5551_v38 = vpop.xlane.xlu1 %3088  ;;  %v4786_v31 = vpop.eup %4785 }
0x170c   :  { %v3105_v39 = vmul.f32 %v4786_v31, %v5484_v9  ;;  %v908_v9 = vadd.f32 %v5021_v57, %v840_v1  ;;  %v918_v31 = vadd.f32 %v5029_v61, %v840_v1 }
0x170d   :  { %v3071_v15 = vpop.xlane.xlu0 %3070 }
0x170e   :  { %4793 = vrcp.f32 %v3071_v15 }
0x170f   :  { %v3083_v29 = vpop.xlane.xlu1 %3082 }
0x1711   :  { %v3080_v48 = vpop.xlane.xlu0 %3079 }
0x1713   :  { %v4788_v47 = vpop.eup %4787  ;;  %v3092_v51 = vpop.xlane.xlu1 %3091 }
0x1714   :  { %v3106_v27 = vmul.f32 %v4788_v47, %v5494_v50  ;;  %v910_v50 = vadd.f32 %v5023_v58, %v844_v28  ;;  %v4790_v10 = vpop.eup %4789 }
0x1715   :  { %v3074_v55 = vpop.xlane.xlu0 %3073  ;;  %v4792_v44 = vpop.eup %4791  ;;  %v3108_v57 = vmul.f32 %v4790_v10, %v5489_v40  ;;  %v1650_v40 = vadd.f32 %v5140_v19, %v5568_v32 }
0x1716   :  { %4795 = vrcp.f32 %v3074_v55  ;;  %v3117_v3 = vpack.c.bf16 %v3106_v27, %v3105_v39  ;;  %v3107_v15 = vmul.f32 %v4792_v44, %v5479_v52  ;;  %v1658_v55 = vadd.f32 %v5146_v22, %v1580_v26 }
0x1717   :  { %v3124_v16 = vpop.permute.xlu1 %3123  ;;  %4797 = vrcp.f32 %v3080_v48  ;;  %v920_v48 = vadd.f32 %v5031_v62, %v844_v28  ;;  %v1654_v62 = vadd.f32 %v5144_v21, %v5568_v32  ;;  %v1660_v21 = vadd.f32 %v5148_v23, %v5568_v32 }
0x1718   :  { %4488 = vmatprep.mubr.msk.bf16.mxu0 %vm2984_vm6, %v3117_v3  ;;  %4799 = vrcp.f32 %v3077_v14  ;;  %v4701_v14 = vld [vmem:[%s5546_s15 + $0x8] sm:$0xff]   ;;  %v3118_v42 = vpack.c.bf16 %v3108_v57, %v3107_v15 }
0x1719   :  { %v3086_v33 = vpop.xlane.xlu0 %3085 }
0x171a   :  { %4801 = vrcp.f32 %v3086_v33  ;;  %v3945_v33 = vld [vmem:[%s5582_s6] ss:$0 sm:$0xff] }
0x171b   :  { %4803 = vrcp.f32 %v3083_v29  ;;  %v930_v8 = vpop.permute.xlu1 %929  ;;  %v4794_v34 = vpop.eup %4793 }
0x171c   :  { %v942_v45 = vmul.f32 %v930_v8, %v908_v9  ;;  %v943_v37 = vmul.f32 %v930_v8, %v910_v50  ;;  %4805 = vrcp.f32 %v3092_v51  ;;  %v3109_v18 = vmul.f32 %v4794_v34, %v5500_v30 }
0x171d   :  { %v3126_v12 = vpop.permute.xlu0 %3125  ;;  %4807 = vrcp.f32 %v5551_v38  ;;  %v1664_v50 = vadd.f32 %v5155_v25, %v5568_v32  ;;  %v2476_v34 = vadd.f32 %v3945_v33, %v5371_v11  ;;  %v4703_v11 = vld [vmem:[%s5651_s13 + $0x18] sm:$0xff]  }
0x171e   :  { %948 = vst [vmem:[%s5561_s28] sm:$0xff] %v942_v45  ;;  %949 = vst [vmem:[%s5561_s28 + $0x8] sm:$0xff] %v943_v37  ;;  %4484 = vmatprep.subr.bf16.mxu0 %v3126_v12  ;;  %4516 = vmatprep.subr.bf16.mxu1 %v4703_v11 }
0x171f   :  { %4485 = vmatpush3.bf16.msra.mxu0 %v3126_v12  ;;  %v935_v58 = vpop.permute.xlu1 %934  ;;  %4517 = vmatpush3.bf16.msra.mxu1 %v4703_v11 }
0x1720   :  { %v944_v59 = vmul.f32 %v935_v58, %v912_v17  ;;  %v945_v60 = vmul.f32 %v935_v58, %v914_v54  ;;  %4486 = vmatprep.subr.bf16.mxu0 %v3124_v16  ;;  %v2463_v54 = vadd.f32 %v3945_v33, %v5365_v0  ;;  %v2471_v0 = vadd.f32 %v3945_v33, %v5369_v4 }
0x1722   :  { %950 = vst [vmem:[%s5561_s28 + $0x10] sm:$0xff] %v944_v59  ;;  %951 = vst [vmem:[%s5561_s28 + $0x18] sm:$0xff] %v945_v60 }
0x1723   :  { %v4796_v29 = vpop.eup %4795  ;;  %4487 = vmatpush3.bf16.msra.mxu0 %v3124_v16  ;;  %v1673_v36 = vpop.permute.xlu1 %1672  ;;  %v1662_v16 = vadd.f32 %v5150_v24, %v1580_v26  ;;  %v2460_v24 = vadd.f32 %v3945_v33, %v5363_v56  ;;  %v2468_v26 = vadd.f32 %v3945_v33, %v5367_v2 }
0x1724   :  { %v1690_v52 = vmul.f32 %v1673_v36, %v1648_v41  ;;  %v1691_v47 = vmul.f32 %v1673_v36, %v1650_v40  ;;  %v3110_v19 = vmul.f32 %v4796_v29, %v5520_v63  ;;  %4500 = vmatprep.subr.bf16.mxu0 %v4701_v14  ;;  %v4798_v38 = vpop.eup %4797  ;;  %v2479_v40 = vadd.f32 %v3945_v33, %v5373_v7 }
0x1725   :  { %v940_v51 = vpop.permute.xlu0 %939  ;;  %v4800_v61 = vpop.eup %4799  ;;  %v3112_v22 = vmul.f32 %v4798_v38, %v5508_v46 }
0x1726   :  { %1698 = vst [vmem:[%s5575_s2] sm:$0xff] %v1690_v52  ;;  %1699 = vst.msk [vmem:[%s5575_s2 + $0x8] sm:$0xff] %vm771_vm3, %v1691_v47  ;;  %v946_v39 = vmul.f32 %v940_v51, %v918_v31  ;;  %v947_v27 = vmul.f32 %v940_v51, %v920_v48  ;;  %4489 = vmatmul.mubr.msk.bf16.vlgmr.msra.gmra.mxu0 %vm2984_vm6, %v3118_v42  ;;  %v3119_v30 = vpack.c.bf16 %v3110_v19, %v3109_v18  ;;  %v4702_v31 = vld [vmem:[%s5546_s15] sm:$0xff]  }
0x1727   :  { %v4802_v63 = vpop.eup %4801  ;;  %v1678_v20 = vpop.permute.xlu1 %1677  ;;  %4501 = vmatpush3.bf16.msra.mxu0 %v4701_v14  ;;  %v3111_v10 = vmul.f32 %v4800_v61, %v5498_v5 }
0x1728   :  { %v4804_v1 = vpop.eup %4803  ;;  %952 = vst [vmem:[%s5561_s28 + $0x20] sm:$0xff] %v946_v39  ;;  %953 = vst [vmem:[%s5561_s28 + $0x28] sm:$0xff] %v947_v27  ;;  %v1692_v28 = vmul.f32 %v1678_v20, %v1652_v49  ;;  %v1693_v3 = vmul.f32 %v1678_v20, %v1654_v62  ;;  %4492 = vmatprep.mubr.msk.bf16.mxu0 %vm2984_vm6, %v3119_v30  ;;  %v3114_v9 = vmul.f32 %v4802_v63, %v5526_v13  ;;  %v4705_v20 = vld [vmem:[%s5651_s13 + $0x8] sm:$0xff]  }
0x1729   :  { %v1683_v23 = vpop.permute.xlu0 %1682  ;;  %v3113_v46 = vmul.f32 %v4804_v1, %v5512_v53  ;;  %v3120_v37 = vpack.c.bf16 %v3112_v22, %v3111_v10  ;;  %v4806_v12 = vpop.eup %4805  ;;  %4502 = vmatprep.subr.bf16.mxu0 %v4702_v31  ;;  %v4706_v1 = vld [vmem:[%s5651_s13] sm:$0xff]  }
0x172a   :  { %1700 = vst [vmem:[%s5575_s2 + $0x10] sm:$0xff] %v1692_v28  ;;  %1701 = vst.msk [vmem:[%s5575_s2 + $0x18] sm:$0xff] %vm771_vm3, %v1693_v3  ;;  %v1694_v6 = vmul.f32 %v1683_v23, %v1658_v55  ;;  %v1695_v8 = vmul.f32 %v1683_v23, %v1660_v21  ;;  %v4808_v56 = vpop.eup %4807  ;;  %v3116_v57 = vmul.f32 %v4806_v12, %v5516_v35  ;;  %v4704_v55 = vld [vmem:[%s5651_s13 + $0x10] sm:$0xff]   ;;  %v4707_v21 = vld [vmem:[%s5702_s17 + $0x8] sm:$0xff]  }
0x172b   :  { %v1688_v45 = vpop.permute.xlu1 %1687  ;;  %v3121_v17 = vpack.c.bf16 %v3114_v9, %v3113_v46  ;;  %v3115_v60 = vmul.f32 %v4808_v56, %v5504_v43  ;;  %4503 = vmatpush3.bf16.msra.mxu0 %v4702_v31  ;;  %4518 = vmatprep.subr.bf16.mxu1 %v4704_v55  ;;  %v3982_v22 = vld [vmem:[%s3816_s22] ss:$0 sm:$0xff] }
0x172c   :  { %1702 = vst [vmem:[%s5575_s2 + $0x20] sm:$0xff] %v1694_v6  ;;  %1703 = vst.msk [vmem:[%s5575_s2 + $0x28] sm:$0xff] %vm771_vm3, %v1695_v8  ;;  %v1696_v13 = vmul.f32 %v1688_v45, %v1662_v16  ;;  %v1697_v25 = vmul.f32 %v1688_v45, %v1664_v50  ;;  %4519 = vmatpush3.bf16.msra.mxu1 %v4704_v55  ;;  %4536 = vmatprep.subr.bf16.mxu0 %v4707_v21  ;;  %v3669_v55 = vld [vmem:[%s3822_s27 + $0x28] sm:$0xff] }
0x172d   :  { %v2491_v44 = vpop.permute.xlu0 %2490  ;;  %v3122_v15 = vpack.c.bf16 %v3116_v57, %v3115_v60  ;;  %4520 = vmatprep.subr.bf16.mxu1 %v4705_v20 }
0x172e   :  { %1704 = vst [vmem:[%s5575_s2 + $0x30] sm:$0xff] %v1696_v13  ;;  %1705 = vst.msk [vmem:[%s5575_s2 + $0x38] sm:$0xff] %vm771_vm3, %v1697_v25  ;;  %v2518_v5 = vmul.f32 %v2491_v44, %v2460_v24  ;;  %4493 = vmatmul.mubr.msk.bf16.gmra.mxu0 %vm2984_vm6, %v3120_v37 }
0x172f   :  { %4496 = vmatprep.mubr.msk.bf16.mxu0 %vm2984_vm6, %v3121_v17  ;;  %v2496_v53 = vpop.permute.xlu1 %2495 }
0x1730   :  { %2524 = vst [vmem:[%s5611_s10] sm:$0xff] %v2518_v5  ;;  %v2519_v32 = vmul.f32 %v2496_v53, %v2463_v54  ;;  %4521 = vmatpush3.bf16.msra.mxu1 %v4705_v20  ;;  %v3668_v20 = vld [vmem:[%s3822_s27 + $0x20] sm:$0xff] }
0x1731   :  { %v2501_v58 = vpop.permute.xlu0 %2500  ;;  %4522 = vmatprep.subr.bf16.mxu1 %v4706_v1 }
0x1732   :  { %2525 = vst [vmem:[%s5611_s10 + $0x8] sm:$0xff] %v2519_v32  ;;  %v2520_v59 = vmul.f32 %v2501_v58, %v2468_v26 }
0x1733   :  { %v2506_v14 = vpop.permute.xlu1 %2505 }
0x1734   :  { %2526 = vst [vmem:[%s5611_s10 + $0x10] sm:$0xff] %v2520_v59  ;;  %v2521_v2 = vmul.f32 %v2506_v14, %v2471_v0  ;;  %4523 = vmatpush3.bf16.msra.mxu1 %v4706_v1  ;;  %v3671_v1 = vld [vmem:[%s3822_s27 + $0x38] sm:$0xff] }
0x1735   :  { %v2511_v41 = vpop.permute.xlu0 %2510 }
0x1736   :  { %2527 = vst [vmem:[%s5611_s10 + $0x18] sm:$0xff] %v2521_v2  ;;  %v2522_v35 = vmul.f32 %v2511_v41, %v2476_v34  ;;  %4497 = vmatmul.mubr.msk.bf16.gmra.mxu0 %vm2984_vm6, %v3122_v15 }
0x1737   :  { %v2516_v4 = vpop.permute.xlu1 %2515 }
0x1738   :  { %2528 = vst [vmem:[%s5611_s10 + $0x20] sm:$0xff] %v2522_v35  ;;  %v2523_v29 = vmul.f32 %v2516_v4, %v2479_v40 }
0x173a   :  { %2529 = vst [vmem:[%s5611_s10 + $0x28] sm:$0xff] %v2523_v29 }
0x17e6   :  { %v5654_v7 = vpop.f32.mrf.mxu0 }
0x17e8   :  { %v5656_v43 = vpop.f32.mrf.mxu0 }
0x17ea   :  { %v5658_v48 = vpop.f32.mrf.mxu0 }
0x17eb   :  { %v3241_v52 = vpack.c.bf16 %v5658_v48, %v5654_v7 }
0x17ec   :  { %v5660_v42 = vpop.f32.mrf.mxu0 }
0x17ed   :  { %v3240_v36 = vpack.c.bf16 %v5660_v42, %v5656_v43 }
0x17ee   :  { %v5666_v47 = vpop.f32.mrf.mxu0 }
0x17ef   :  { %4504 = vmatprep.mubr.msk.bf16.mxu0 %vm417_vm0, %v3240_v36 }
0x17f0   :  { %v5669_v18 = vpop.f32.mrf.mxu0  ;;  %4505 = vmatmul.mubr.msk.bf16.vlgmr.msra.gmra.mxu0 %vm417_vm0, %v3241_v52  ;;  %v4708_v52 = vld [vmem:[%s5702_s17] sm:$0xff]  }
0x17f1   :  { %4537 = vmatpush3.bf16.msra.mxu0 %v4707_v21  ;;  %v3670_v21 = vld [vmem:[%s3822_s27 + $0x30] sm:$0xff] }
0x17f2   :  { %v5672_v19 = vpop.f32.mrf.mxu0  ;;  %4538 = vmatprep.subr.bf16.mxu0 %v4708_v52 }
0x17f3   :  { %v3243_v51 = vpack.c.bf16 %v5672_v19, %v5666_v47 }
0x17f4   :  { %v5674_v38 = vpop.f32.mrf.mxu0 }
0x17f5   :  { %v3242_v49 = vpack.c.bf16 %v5674_v38, %v5669_v18  ;;  %4539 = vmatpush3.bf16.msra.mxu0 %v4708_v52 }
0x17f6   :  { %v5680_v61 = vpop.f32.mrf.mxu0 }
0x17f7   :  { %4508 = vmatprep.mubr.msk.bf16.mxu0 %vm417_vm0, %v3242_v49  ;;  %v3665_v49 = vld [vmem:[%s3822_s27 + $0x8] sm:$0xff] }
0x17f8   :  { %v5683_v62 = vpop.f32.mrf.mxu0  ;;  %4509 = vmatmul.mubr.msk.bf16.gmra.mxu0 %vm417_vm0, %v3243_v51  ;;  %3683 = vperm.xlu1 %4619, %v3665_v49   ;;  %v3664_v51 = vld [vmem:[%s3822_s27] sm:$0xff] }
0x17f9   :  { %3678 = vperm.xlu0 %4620, %v3664_v51  }
0x17fa   :  { %v5686_v39 = vpop.f32.mrf.mxu0 }
0x17fb   :  { %v3245_v63 = vpack.c.bf16 %v5686_v39, %v5680_v61 }
0x17fc   :  { %v5688_v27 = vpop.f32.mrf.mxu0 }
0x17fd   :  { %v3244_v30 = vpack.c.bf16 %v5688_v27, %v5683_v62 }
0x17ff   :  { %4512 = vmatprep.mubr.msk.bf16.mxu0 %vm417_vm0, %v3244_v30  ;;  %v3667_v30 = vld [vmem:[%s3822_s27 + $0x18] sm:$0xff] }
0x1800   :  { %4513 = vmatmul.mubr.msk.bf16.gmra.mxu0 %vm417_vm0, %v3245_v63  ;;  %v3666_v63 = vld [vmem:[%s3822_s27 + $0x10] sm:$0xff]  ;;  %3693 = vperm.xlu1 %4619, %v3667_v30  }
0x1801   :  { %3688 = vperm.xlu0 %4620, %v3666_v63  }
0x1804   :  { %3703 = vperm.xlu1 %4619, %v3669_v55  }
0x1805   :  { %3698 = vperm.xlu0 %4620, %v3668_v20  }
0x1808   :  { %3713 = vperm.xlu1 %4619, %v3671_v1  }
0x1809   :  { %3708 = vperm.xlu0 %4620, %v3670_v21  }
0x18b0   :  { %v4506_v28 = vpop.f32.mrf.mxu0 }
0x18b1   :  { %v3330_v9 = vadd.f32 %v4506_v28, %v3982_v22  ;;  %v3673_v28 = vld [vmem:[%s3822_s27 + $0x48] sm:$0xff] }
0x18b2   :  { %v3321_v3 = vpop.f32.mrf.mxu0  ;;  %3723 = vperm.xlu1 %4619, %v3673_v28  }
0x18b3   :  { %v3322_v33 = vadd.f32 %v3982_v22, %v3321_v3  ;;  %v3370_v24 = vmax.f32 %v3330_v9, 0.0  ;;  %v3672_v3 = vld [vmem:[%s3822_s27 + $0x40] sm:$0xff] }
0x18b4   :  { %v4507_v16 = vpop.f32.mrf.mxu0  ;;  %3718 = vperm.xlu0 %4620, %v3672_v3   ;;  %v3991_v9 = vld [vmem:[%s3818_s30] ss:$0 sm:$0xff] }
0x18b5   :  { %v3333_v23 = vadd.f32 %v4507_v16, %v3982_v22  ;;  %v3368_v45 = vmax.f32 %v3322_v33, 0.0  ;;  %v3674_v16 = vld [vmem:[%s3822_s27 + $0x50] sm:$0xff] }
0x18b6   :  { %v3324_v50 = vpop.f32.mrf.mxu0 }
0x18b7   :  { %v3325_v6 = vadd.f32 %v3982_v22, %v3324_v50  ;;  %v3371_v8 = vmax.f32 %v3333_v23, 0.0 }
0x18b8   :  { %v4510_v10 = vpop.f32.mrf.mxu0  ;;  %3728 = vperm.xlu0 %4620, %v3674_v16  }
0x18b9   :  { %v3369_v46 = vmax.f32 %v3325_v6, 0.0  ;;  %v3381_v37 = vpack.c.bf16 %v3371_v8, %v3370_v24  ;;  %v3346_v54 = vadd.f32 %v4510_v10, %v3982_v22 }
0x18ba   :  { %v3337_v13 = vpop.f32.mrf.mxu0 }
0x18bb   :  { %v3380_v25 = vpack.c.bf16 %v3369_v46, %v3368_v45  ;;  %v3338_v44 = vadd.f32 %v3982_v22, %v3337_v13  ;;  %v3374_v58 = vmax.f32 %v3346_v54, 0.0 }
0x18bc   :  { %v4511_v12 = vpop.f32.mrf.mxu0 }
0x18bd   :  { %v3349_v17 = vadd.f32 %v4511_v12, %v3982_v22  ;;  %4524 = vmatprep.mubr.msk.bf16.mxu1 %vm771_vm3, %v3380_v25  ;;  %v3372_v32 = vmax.f32 %v3338_v44, 0.0 }
0x18be   :  { %v3340_v5 = vpop.f32.mrf.mxu0  ;;  %4525 = vmatmul.mubr.msk.bf16.vlgmr.msra.gmra.mxu1 %vm771_vm3, %v3381_v37 }
0x18bf   :  { %v3341_v56 = vadd.f32 %v3982_v22, %v3340_v5  ;;  %v3375_v53 = vmax.f32 %v3349_v17, 0.0 }
0x18c0   :  { %v4514_v26 = vpop.f32.mrf.mxu0 }
0x18c1   :  { %v3373_v57 = vmax.f32 %v3341_v56, 0.0  ;;  %v3383_v60 = vpack.c.bf16 %v3375_v53, %v3374_v58  ;;  %v3362_v15 = vadd.f32 %v4514_v26, %v3982_v22 }
0x18c2   :  { %v3353_v0 = vpop.f32.mrf.mxu0 }
0x18c3   :  { %v3382_v59 = vpack.c.bf16 %v3373_v57, %v3372_v32  ;;  %v3354_v34 = vadd.f32 %v3982_v22, %v3353_v0  ;;  %v3378_v31 = vmax.f32 %v3362_v15, 0.0 }
0x18c4   :  { %v4515_v14 = vpop.f32.mrf.mxu0 }
0x18c5   :  { %v3365_v2 = vadd.f32 %v4515_v14, %v3982_v22  ;;  %4528 = vmatprep.mubr.msk.bf16.mxu1 %vm771_vm3, %v3382_v59  ;;  %v3376_v4 = vmax.f32 %v3354_v34, 0.0 }
0x18c6   :  { %v3356_v41 = vpop.f32.mrf.mxu0  ;;  %4529 = vmatmul.mubr.msk.bf16.gmra.mxu1 %vm771_vm3, %v3383_v60 }
0x18c7   :  { %v3357_v40 = vadd.f32 %v3982_v22, %v3356_v41  ;;  %v3379_v35 = vmax.f32 %v3365_v2, 0.0  ;;  %v3675_v22 = vld [vmem:[%s3822_s27 + $0x58] sm:$0xff] }
0x18c8   :  { %3733 = vperm.xlu1 %4619, %v3675_v22  }
0x18c9   :  { %v3377_v29 = vmax.f32 %v3357_v40, 0.0  ;;  %v3385_v36 = vpack.c.bf16 %v3379_v35, %v3378_v31  ;;  %v3684_v31 = vpop.permute.xlu1 %3683 }
0x18cb   :  { %v3384_v11 = vpack.c.bf16 %v3377_v29, %v3376_v4  ;;  %v3679_v29 = vpop.permute.xlu0 %3678 }
0x18cd   :  { %4532 = vmatprep.mubr.msk.bf16.mxu1 %vm771_vm3, %v3384_v11 }
0x18ce   :  { %4533 = vmatmul.mubr.msk.bf16.gmra.mxu1 %vm771_vm3, %v3385_v36 }
0x197e   :  { %v4526_v33 = vpop.f32.mrf.mxu1 }
0x197f   :  { %v3486_v10 = vadd.f32 %v4526_v33, %v3991_v9 }
0x1980   :  { %v3477_v23 = vpop.f32.mrf.mxu1 }
0x1981   :  { %v3478_v6 = vadd.f32 %v3991_v9, %v3477_v23  ;;  %v3526_v12 = vadd.f32 %v5654_v7, %v3486_v10 }
0x1982   :  { %v4527_v50 = vpop.f32.mrf.mxu1 }
0x1983   :  { %v3489_v8 = vadd.f32 %v4527_v50, %v3991_v9  ;;  %v3524_v25 = vadd.f32 %v3478_v6, %v5656_v43 }
0x1984   :  { %v3480_v45 = vpop.f32.mrf.mxu1 }
0x1985   :  { %v3481_v46 = vadd.f32 %v3991_v9, %v3480_v45  ;;  %v3527_v24 = vadd.f32 %v5658_v48, %v3489_v8 }
0x1986   :  { %v4530_v13 = vpop.f32.mrf.mxu1 }
0x1987   :  { %v3525_v37 = vadd.f32 %v3481_v46, %v5660_v42  ;;  %v3537_v54 = vpack.c.bf16 %v3527_v24, %v3526_v12  ;;  %v3502_v26 = vadd.f32 %v4530_v13, %v3991_v9 }
0x1988   :  { %v3493_v44 = vpop.f32.mrf.mxu1 }
0x1989   :  { %v3536_v17 = vpack.c.bf16 %v3525_v37, %v3524_v25  ;;  %v3494_v56 = vadd.f32 %v3991_v9, %v3493_v44  ;;  %v3530_v58 = vadd.f32 %v5666_v47, %v3502_v26 }
0x198a   :  { %v4531_v5 = vpop.f32.mrf.mxu1 }
0x198b   :  { %v3505_v53 = vadd.f32 %v4531_v5, %v3991_v9  ;;  %4540 = vmatprep.mubr.msk.bf16.mxu0 %vm417_vm0, %v3536_v17  ;;  %v3528_v42 = vadd.f32 %v3494_v56, %v5669_v18 }
0x198c   :  { %v3496_v32 = vpop.f32.mrf.mxu1  ;;  %4541 = vmatmul.mubr.msk.bf16.vlgmr.msra.gmra.mxu0 %vm417_vm0, %v3537_v54 }
0x198d   :  { %v3497_v48 = vadd.f32 %v3991_v9, %v3496_v32  ;;  %v3531_v57 = vadd.f32 %v5672_v19, %v3505_v53 }
0x198e   :  { %v4534_v43 = vpop.f32.mrf.mxu1 }
0x198f   :  { %v3529_v7 = vadd.f32 %v3497_v48, %v5674_v38  ;;  %v3539_v60 = vpack.c.bf16 %v3531_v57, %v3530_v58  ;;  %v3518_v15 = vadd.f32 %v4534_v43, %v3991_v9 }
0x1990   :  { %v3509_v0 = vpop.f32.mrf.mxu1 }
0x1991   :  { %v3538_v59 = vpack.c.bf16 %v3529_v7, %v3528_v42  ;;  %v3510_v34 = vadd.f32 %v3991_v9, %v3509_v0  ;;  %v3534_v47 = vadd.f32 %v5680_v61, %v3518_v15  ;;  %v3694_v61 = vpop.permute.xlu1 %3693 }
0x1992   :  { %v4535_v14 = vpop.f32.mrf.mxu1 }
0x1993   :  { %v3521_v2 = vadd.f32 %v4535_v14, %v3991_v9  ;;  %4544 = vmatprep.mubr.msk.bf16.mxu0 %vm417_vm0, %v3538_v59  ;;  %v3532_v18 = vadd.f32 %v3510_v34, %v5683_v62  ;;  %v4002_v62 = vld [vmem:[%s3820_s4] ss:$0 sm:$0xff] }
0x1994   :  { %v3512_v41 = vpop.f32.mrf.mxu1  ;;  %4545 = vmatmul.mubr.msk.bf16.gmra.mxu0 %vm417_vm0, %v3539_v60 }
0x1995   :  { %v3513_v19 = vadd.f32 %v3991_v9, %v3512_v41  ;;  %v3535_v40 = vadd.f32 %v5686_v39, %v3521_v2  ;;  %v3689_v39 = vpop.permute.xlu0 %3688  ;;  %v3704_v30 = vpop.permute.xlu1 %3703 }
0x1997   :  { %v3533_v38 = vadd.f32 %v3513_v19, %v5688_v27  ;;  %v3541_v4 = vpack.c.bf16 %v3535_v40, %v3534_v47 }
0x1999   :  { %v3540_v35 = vpack.c.bf16 %v3533_v38, %v3532_v18  ;;  %v3699_v27 = vpop.permute.xlu0 %3698  ;;  %v3714_v23 = vpop.permute.xlu1 %3713 }
0x199b   :  { %4548 = vmatprep.mubr.msk.bf16.mxu0 %vm417_vm0, %v3540_v35 }
0x199c   :  { %4549 = vmatmul.mubr.msk.bf16.gmra.mxu0 %vm417_vm0, %v3541_v4 }
0x199d   :  { %v3709_v1 = vpop.permute.xlu0 %3708  ;;  %v3724_v37 = vpop.permute.xlu1 %3723 }
0x19a1   :  { %v3719_v8 = vpop.permute.xlu0 %3718  ;;  %v3734_v57 = vpop.permute.xlu1 %3733 }
0x19a5   :  { %v3729_v54 = vpop.permute.xlu0 %3728 }
0x1a4c   :  { %v4542_v11 = vpop.f32.mrf.mxu0 }
0x1a4d   :  { %v3626_v36 = vadd.f32 %v4542_v11, %v4002_v62 }
0x1a4e   :  { %v3617_v52 = vpop.f32.mrf.mxu0 }
0x1a4f   :  { %v3738_v49 = vmul.f32 %v3689_v39, %v3626_v36  ;;  %v3618_v51 = vadd.f32 %v4002_v62, %v3617_v52 }
0x1a50   :  { %v4543_v63 = vpop.f32.mrf.mxu0 }
0x1a51   :  { %3750 = vst.msk [vmem:[%s5745_s8 + $0x10] sm:$0xff] %vm771_vm3, %v3738_v49  ;;  %v3736_v55 = vmul.f32 %v3679_v29, %v3618_v51  ;;  %v3629_v20 = vadd.f32 %v4543_v63, %v4002_v62 }
0x1a52   :  { %v3620_v21 = vpop.f32.mrf.mxu0 }
0x1a53   :  { %3748 = vst.msk [vmem:[%s5745_s8] sm:$0xff] %vm771_vm3, %v3736_v55  ;;  %v3739_v28 = vmul.f32 %v3694_v61, %v3629_v20  ;;  %v3621_v3 = vadd.f32 %v4002_v62, %v3620_v21 }
0x1a54   :  { %v4546_v22 = vpop.f32.mrf.mxu0 }
0x1a55   :  { %3751 = vst.msk [vmem:[%s5745_s8 + $0x18] sm:$0xff] %vm771_vm3, %v3739_v28  ;;  %v3737_v16 = vmul.f32 %v3684_v31, %v3621_v3  ;;  %v3642_v33 = vadd.f32 %v4546_v22, %v4002_v62 }
0x1a56   :  { %v3633_v9 = vpop.f32.mrf.mxu0 }
0x1a57   :  { %3749 = vst.msk [vmem:[%s5745_s8 + $0x8] sm:$0xff] %vm771_vm3, %v3737_v16  ;;  %v3742_v50 = vmul.f32 %v3709_v1, %v3642_v33  ;;  %v3634_v6 = vadd.f32 %v4002_v62, %v3633_v9 }
0x1a58   :  { %v4547_v10 = vpop.f32.mrf.mxu0 }
0x1a59   :  { %3754 = vst.msk [vmem:[%s5745_s8 + $0x30] sm:$0xff] %vm771_vm3, %v3742_v50  ;;  %v3740_v45 = vmul.f32 %v3699_v27, %v3634_v6  ;;  %v3645_v46 = vadd.f32 %v4547_v10, %v4002_v62 }
0x1a5a   :  { %v3636_v24 = vpop.f32.mrf.mxu0 }
0x1a5b   :  { %3752 = vst.msk [vmem:[%s5745_s8 + $0x20] sm:$0xff] %vm771_vm3, %v3740_v45  ;;  %v3743_v13 = vmul.f32 %v3714_v23, %v3645_v46  ;;  %v3637_v25 = vadd.f32 %v4002_v62, %v3636_v24 }
0x1a5c   :  { %v4550_v12 = vpop.f32.mrf.mxu0 }
0x1a5d   :  { %3755 = vst.msk [vmem:[%s5745_s8 + $0x38] sm:$0xff] %vm771_vm3, %v3743_v13  ;;  %v3741_v44 = vmul.f32 %v3704_v30, %v3637_v25  ;;  %v3658_v17 = vadd.f32 %v4550_v12, %v4002_v62 }
0x1a5e   :  { %v3649_v5 = vpop.f32.mrf.mxu0 }
0x1a5f   :  { %3753 = vst.msk [vmem:[%s5745_s8 + $0x28] sm:$0xff] %vm771_vm3, %v3741_v44  ;;  %v3746_v56 = vmul.f32 %v3729_v54, %v3658_v17  ;;  %v3650_v53 = vadd.f32 %v4002_v62, %v3649_v5 }
0x1a60   :  { %v4551_v26 = vpop.f32.mrf.mxu0 }
0x1a61   :  { %3758 = vst.msk [vmem:[%s5745_s8 + $0x50] sm:$0xff] %vm771_vm3, %v3746_v56  ;;  %v3744_v32 = vmul.f32 %v3719_v8, %v3650_v53  ;;  %v3661_v48 = vadd.f32 %v4551_v26, %v4002_v62 }
0x1a62   :  { %v3652_v43 = vpop.f32.mrf.mxu0 }
0x1a63   :  { %3756 = vst.msk [vmem:[%s5745_s8 + $0x40] sm:$0xff] %vm771_vm3, %v3744_v32  ;;  %v3747_v42 = vmul.f32 %v3734_v57, %v3661_v48  ;;  %v3653_v7 = vadd.f32 %v4002_v62, %v3652_v43 }
0x1a65   :  { %3759 = vst.msk [vmem:[%s5745_s8 + $0x58] sm:$0xff] %vm771_vm3, %v3747_v42  ;;  %v3745_v58 = vmul.f32 %v3724_v37, %v3653_v7 }
0x1a67   :  { %3757 = vst.msk [vmem:[%s5745_s8 + $0x48] sm:$0xff] %vm771_vm3, %v3745_v58 }

</bundles_post_ra>
